<compile_context>
chip_gen: v5e
topology: v5e:2x2
jax: 0.10.0
libtpu: 0.0.40
codegen_flags: <defaults>
</compile_context>

<pallas_src>
import functools

import jax
import jax.numpy as jnp
from jax import lax
from jax.experimental import pallas as pl
from jax.experimental.pallas import tpu as pltpu

_LANE = 128
_VMEM_LIMIT = 48 * 1024 * 1024  # > v5e/v6e default scoped limits, < v7x 64 MiB


def _round_up(x, m):
    return ((x + m - 1) // m) * m


# ---------------------------------------------------------------------------
# Pre-pass: hidden layer for trajectory + query rows in one big-M matmul.
# (W1 / b1 are fixed inside the inner loop, so this is hoisted out.)
# ---------------------------------------------------------------------------
def _hidden_kernel(x_ref, w1_ref, b1_ref, h_ref):
    h = jnp.dot(x_ref[...].astype(w1_ref.dtype), w1_ref[...],
                preferred_element_type=jnp.float32) + b1_ref[...]
    h_ref[...] = jnp.maximum(h, 0.0).astype(h_ref.dtype)


def _hidden_forward(x_all, w1, b1, out_dtype):
    m = x_all.shape[0]
    hd_pad = w1.shape[1]
    return pl.pallas_call(
        _hidden_kernel,
        out_shape=jax.ShapeDtypeStruct((m, hd_pad), out_dtype),
        in_specs=[
            pl.BlockSpec(memory_space=pltpu.MemorySpace.VMEM),
            pl.BlockSpec(memory_space=pltpu.MemorySpace.VMEM),
            pl.BlockSpec(memory_space=pltpu.MemorySpace.VMEM),
        ],
        out_specs=pl.BlockSpec(memory_space=pltpu.MemorySpace.VMEM),
        compiler_params=pltpu.CompilerParams(vmem_limit_bytes=_VMEM_LIMIT),
    )(x_all, w1, b1)


# ---------------------------------------------------------------------------
# Fully-collapsed plastic inner loop (single invocation, fori_loop over steps).
#   inputs : h_traj[steps, setsz, Hd], ytr_onehot[steps, setsz, C],
#            hq[querysz, Hd], yq_idx[querysz, 1], W2(slow), b2(masked),
#            plasticity (SMEM scalar)
#   output : stats (2, 128)  row0 lanes 0..steps = correct counts,
#                            row1 lane 0         = last-step training loss
# ---------------------------------------------------------------------------
def _plastic_kernel(hebbian,
                    h_ref, ytr_ref, hq_ref, yqidx_ref, w2_ref, b2_ref,
                    plast_ref, stats_ref):
    steps, setsz, _ = h_ref.shape
    querysz = hq_ref.shape[0]
    c_pad = w2_ref.shape[1]
    inv_set = jnp.float32(1.0 / setsz)

    b2 = b2_ref[...]                       # (1, c_pad); padded lanes = -1e30
    plast = plast_ref[0, 0]
    hq = hq_ref[...]                       # (Q, Hd) bf16/f32, read once
    yq_idx = yqidx_ref[...]                # (Q, 1) f32 integer labels

    lane = lax.broadcasted_iota(jnp.int32, (1, _LANE), 1)
    col_q = lax.broadcasted_iota(jnp.int32, (querysz, c_pad), 1).astype(
        jnp.float32)

    def query_correct(w2f32):
        # softmax-free query evaluation: argmax == label count, as (1, 1).
        lg = jnp.dot(hq, w2f32.astype(hq.dtype),
                     preferred_element_type=jnp.float32) + b2
        row_max = jnp.max(lg, axis=-1, keepdims=True)
        # first index achieving the row max (matches torch.argmax)
        pred = jnp.min(jnp.where(lg == row_max, col_q, jnp.float32(c_pad)),
                       axis=-1, keepdims=True)
        return jnp.sum((pred == yq_idx).astype(jnp.float32), keepdims=True)

    # ---- slow-weight query evaluation -> corrects[0] ----
    w2_slow = w2_ref[...]
    corrects0 = jnp.where(lane == 0, query_correct(w2_slow), 0.0)

    def body(k, carry):
        w2f, corrects, _ = carry
        h = h_ref[k]                                      # (setsz, Hd)
        yoh = ytr_ref[k]                                  # (setsz, c_pad)

        logits = jnp.dot(h, w2f.astype(h.dtype),
                         preferred_element_type=jnp.float32) + b2
        row_max = jnp.max(logits, axis=-1, keepdims=True)
        z = logits - row_max
        ez = jnp.exp(z)
        sez = jnp.sum(ez, axis=-1, keepdims=True)
        p = ez * pl.reciprocal(sez, approx=True)          # softmax (EUP recip)

        # training CE loss; only the last step's value survives the carry
        z_lab = jnp.sum(yoh * z, axis=-1, keepdims=True)
        loss = jnp.sum(jnp.log(sez) - z_lab, keepdims=True) * inv_set  # (1,1)

        # Oja / Hebbian plastic update of the output layer (f32)
        #   post = onehot(y) - softmax(logits)
        #   Hebb: dW = eta *  h^T @ post / B
        #   Oja : dW = eta * (h^T @ post / B - mean(post^2) * W)
        err = yoh - p
        hebb = lax.dot_general(h.astype(jnp.float32), err,
                               (((0,), (0,)), ((), ())),
                               preferred_element_type=jnp.float32) * inv_set
        if hebbian:
            delta = hebb
        else:
            decay = jnp.mean(err * err, axis=0, keepdims=True)   # (1, c_pad)
            delta = hebb - decay * w2f
        w2f_new = w2f + plast * delta

        # query eval with the in-register updated fast weights -> corrects[k+1]
        cq = query_correct(w2f_new)
        corrects = corrects + jnp.where(lane == k + 1, cq, 0.0)
        return w2f_new, corrects, loss

    init = (w2_slow, corrects0, jnp.zeros((1, 1), jnp.float32))
    _, corrects, loss = lax.fori_loop(0, steps, body, init,
                                      unroll=(steps <= 8))

    # lane-dense stats written once
    stats_ref[0:1, :] = corrects
    stats_ref[1:2, :] = jnp.where(lane == 0, loss, 0.0)


def _plastic_inner_loop(h_traj, ytr_oh, hq, yq_idx, w2, b2m, plasticity, *,
                        hebbian):
    kernel = functools.partial(_plastic_kernel, hebbian)
    return pl.pallas_call(
        kernel,
        out_shape=jax.ShapeDtypeStruct((2, _LANE), jnp.float32),
        in_specs=[
            pl.BlockSpec(memory_space=pltpu.MemorySpace.VMEM),   # h_traj
            pl.BlockSpec(memory_space=pltpu.MemorySpace.VMEM),   # ytr one-hot
            pl.BlockSpec(memory_space=pltpu.MemorySpace.VMEM),   # hq
            pl.BlockSpec(memory_space=pltpu.MemorySpace.VMEM),   # yq indices
            pl.BlockSpec(memory_space=pltpu.MemorySpace.VMEM),   # W2 (slow)
            pl.BlockSpec(memory_space=pltpu.MemorySpace.VMEM),   # b2 (masked)
            pl.BlockSpec(memory_space=pltpu.MemorySpace.SMEM),   # plasticity
        ],
        out_specs=pl.BlockSpec(memory_space=pltpu.MemorySpace.VMEM),
        compiler_params=pltpu.CompilerParams(vmem_limit_bytes=_VMEM_LIMIT),
    )(h_traj, ytr_oh, hq, yq_idx, w2, b2m, plasticity)


# ---------------------------------------------------------------------------
# Jitted forward: flatten images, hoisted hidden pre-pass, collapsed plastic
# inner loop, extract accs and the last inner-step training loss.
# ---------------------------------------------------------------------------
@functools.partial(jax.jit, static_argnames=("hebbian",))
def _meta_forward(x_traj, y_traj, x_rand, y_rand, w1, b1, w2, b2m, plasticity,
                  hebbian):
    steps, setsz = y_traj.shape
    querysz = y_rand.shape[1]
    hd_pad = w1.shape[1]
    c_pad = w2.shape[1]

    if steps + 1 > _LANE:
        raise ValueError(
            f"update_step + 1 = {steps + 1} exceeds the {_LANE}-lane stats row")

    # flatten trajectory + query images into one row block for the pre-pass
    x_traj_flat = x_traj.reshape(steps * setsz, -1).astype(jnp.float32)
    xq = x_rand[0].reshape(querysz, -1).astype(jnp.float32)
    x_all = jnp.concatenate([x_traj_flat, xq], axis=0)
    m = x_all.shape[0]
    m_pad = _round_up(m, 8)
    if m_pad != m:
        x_all = jnp.pad(x_all, ((0, m_pad - m), (0, 0)))

    h_dtype = jnp.bfloat16 if w1.dtype == jnp.bfloat16 else jnp.float32
    h_all = _hidden_forward(x_all, w1, b1, h_dtype)
    h_traj = h_all[:steps * setsz].reshape(steps, setsz, hd_pad)
    hq = h_all[steps * setsz:steps * setsz + querysz]

    ytr_oh = jax.nn.one_hot(y_traj, c_pad, dtype=jnp.float32)
    yq_idx = y_rand[0].astype(jnp.float32).reshape(querysz, 1)

    stats = _plastic_inner_loop(h_traj, ytr_oh, hq, yq_idx, w2, b2m,
                                plasticity, hebbian=hebbian)
    accs = stats[0, :steps + 1] / querysz
    loss = stats[1, 0]
    return accs, loss


class MetaLearningClassificationPallas:
    """Forward-pass equivalent of MetaLearingClassification (vary_length)."""

    def __init__(self, d_in, width, n_classes, init_plasticity=0.01,
                 hebb=False, seed=0, use_bf16_matmul=True):
        hd_pad = _round_up(width, _LANE)
        c_pad = _round_up(n_classes, _LANE)
        k1, k2 = jax.random.split(jax.random.PRNGKey(seed))

        # deterministic Kaiming-style init (synthetic weights, no checkpoint),
        # zero-padded to 128 lanes on the hidden / class dims.
        w1 = jnp.zeros((d_in, hd_pad), jnp.float32)
        w1 = w1.at[:, :width].set(
            jax.random.normal(k1, (d_in, width), jnp.float32)
            * jnp.sqrt(2.0 / d_in))
        w2 = jnp.zeros((hd_pad, c_pad), jnp.float32)
        w2 = w2.at[:width, :n_classes].set(
            jax.random.normal(k2, (width, n_classes), jnp.float32)
            * jnp.sqrt(2.0 / width))

        # bf16 storage of W1 (MXU-native, halves VMEM/DMA); plastic layer,
        # softmax and the Oja update stay in f32 inside the kernels.
        self.w1 = w1.astype(jnp.bfloat16) if use_bf16_matmul else w1
        self.b1 = jnp.zeros((1, hd_pad), jnp.float32)
        self.w2 = w2
        # class mask baked into b2: padded class lanes get -1e30 so exp()
        # underflows to exactly 0 and argmax never selects them.
        lanes = jnp.arange(c_pad)
        self.b2 = jnp.where(lanes < n_classes, 0.0, -1e30).astype(
            jnp.float32)[None, :]
        self.plasticity = jnp.full((1, 1), init_plasticity, jnp.float32)
        self.hebb = bool(hebb)
        self.n_classes = int(n_classes)

    def forward(self, x_traj, y_traj, x_rand, y_rand):
        """
        x_traj: [steps, setsz, C, H, W]   y_traj: [steps, setsz]
        x_rand: [1, querysz, C, H, W]     y_rand: [1, querysz]
        Returns (accs [update_step+1], last inner-loop training loss).
        """
        return _meta_forward(x_traj, y_traj, x_rand, y_rand,
                             self.w1, self.b1, self.w2, self.b2,
                             self.plasticity, hebbian=self.hebb)


if __name__ == "__main__":
    key = jax.random.PRNGKey(0)
    steps, setsz, querysz = 3, 8, 8
    Cimg, Himg, Wimg = 4, 16, 16
    n_classes, width = 8, 32

    kx, ky, kxr, kyr = jax.random.split(key, 4)
    x_traj = jax.random.normal(kx, (steps, setsz, Cimg, Himg, Wimg), jnp.float32)
    y_traj = jax.random.randint(ky, (steps, setsz), 0, n_classes)
    x_rand = jax.random.normal(kxr, (1, querysz, Cimg, Himg, Wimg), jnp.float32)
    y_rand = jax.random.randint(kyr, (1, querysz), 0, n_classes)

    model = MetaLearningClassificationPallas(
        d_in=Cimg * Himg * Wimg, width=width, n_classes=n_classes,
        init_plasticity=0.01, hebb=False, seed=0)

    accs, loss = model.forward(x_traj, y_traj, x_rand, y_rand)
    jax.block_until_ready((accs, loss))
    assert accs.shape == (steps + 1,)
    assert bool(jnp.isfinite(loss))
    assert bool(jnp.all(jnp.isfinite(accs)))
    print("KERNEL_OK")
</pallas_src>

<mosaic_0001>
module attributes {stable_mosaic.version = 11 : i64} {
  func.func @_hidden_kernel(%arg0: memref<32x1024xf32, #tpu.memory_space<vmem>>, %arg1: memref<1024x128xbf16, #tpu.memory_space<vmem>>, %arg2: memref<1x128xf32, #tpu.memory_space<vmem>>, %arg3: memref<32x128xbf16, #tpu.memory_space<vmem>>) attributes {dimension_semantics = [], scalar_prefetch = 0 : i64, scratch_operands = 0 : i64, tpu.core_type = #tpu.core_type<tc>} {
    %c0 = arith.constant 0 : index
    %c0_0 = arith.constant 0 : index
    %0 = vector.load %arg0[%c0, %c0_0] : memref<32x1024xf32, #tpu.memory_space<vmem>>, vector<32x1024xf32>
    %1 = arith.truncf %0 : vector<32x1024xf32> to vector<32x1024xbf16>
    %c0_1 = arith.constant 0 : index
    %c0_2 = arith.constant 0 : index
    %2 = vector.load %arg1[%c0_1, %c0_2] : memref<1024x128xbf16, #tpu.memory_space<vmem>>, vector<1024x128xbf16>
    %cst = arith.constant dense<0.000000e+00> : vector<32x128xf32>
    %3 = tpu.matmul %1, %2, %cst {dimension_numbers = #tpu.dot_dimension_numbers<[1], [0], [0], [1], [0, 0, 1, 1], [], []>} : vector<32x1024xbf16>, vector<1024x128xbf16>, vector<32x128xf32> -> vector<32x128xf32>
    %c0_3 = arith.constant 0 : index
    %c0_4 = arith.constant 0 : index
    %4 = vector.load %arg2[%c0_3, %c0_4] : memref<1x128xf32, #tpu.memory_space<vmem>>, vector<1x128xf32>
    %5 = vector.broadcast %4 : vector<1x128xf32> to vector<32x128xf32>
    %6 = arith.addf %3, %5 : vector<32x128xf32>
    %cst_5 = arith.constant 0.000000e+00 : f32
    %7 = vector.broadcast %cst_5 : f32 to vector<32x128xf32>
    %8 = arith.maximumf %6, %7 : vector<32x128xf32>
    %9 = arith.truncf %8 : vector<32x128xf32> to vector<32x128xbf16>
    %c0_6 = arith.constant 0 : index
    %c0_7 = arith.constant 0 : index
    %10 = vector.load %arg3[%c0_6, %c0_7] : memref<32x128xbf16, #tpu.memory_space<vmem>>, vector<32x128xbf16>
    tpu.vector_store %arg3[%c0_6, %c0_7], %9 {strides = array<i32>} : memref<32x128xbf16, #tpu.memory_space<vmem>>, vector<32x128xbf16>,
    return
  }
}

module attributes {stable_mosaic.version = 11 : i64} {
  func.func @_plastic_kernel(%arg0: memref<3x8x128xbf16, #tpu.memory_space<vmem>>, %arg1: memref<3x8x128xf32, #tpu.memory_space<vmem>>, %arg2: memref<8x128xbf16, #tpu.memory_space<vmem>>, %arg3: memref<8x1xf32, #tpu.memory_space<vmem>>, %arg4: memref<128x128xf32, #tpu.memory_space<vmem>>, %arg5: memref<1x128xf32, #tpu.memory_space<vmem>>, %arg6: memref<1x1xf32, #tpu.memory_space<smem>>, %arg7: memref<2x128xf32, #tpu.memory_space<vmem>>) attributes {dimension_semantics = [], scalar_prefetch = 0 : i64, scratch_operands = 0 : i64, tpu.core_type = #tpu.core_type<tc>} {
    %c0 = arith.constant 0 : index
    %c0_0 = arith.constant 0 : index
    %0 = vector.load %arg5[%c0, %c0_0] : memref<1x128xf32, #tpu.memory_space<vmem>>, vector<1x128xf32>
    %c0_1 = arith.constant 0 : index
    %c0_2 = arith.constant 0 : index
    %1 = memref.load %arg6[%c0_1, %c0_2] : memref<1x1xf32, #tpu.memory_space<smem>>
    %c0_3 = arith.constant 0 : index
    %c0_4 = arith.constant 0 : index
    %2 = vector.load %arg2[%c0_3, %c0_4] : memref<8x128xbf16, #tpu.memory_space<vmem>>, vector<8x128xbf16>
    %c0_5 = arith.constant 0 : index
    %c0_6 = arith.constant 0 : index
    %3 = vector.load %arg3[%c0_5, %c0_6] : memref<8x1xf32, #tpu.memory_space<vmem>>, vector<8x1xf32>
    %4 = tpu.iota {dimensions = array<i32: 1>} : vector<1x128xi32>
    %5 = tpu.iota {dimensions = array<i32: 1>} : vector<8x128xi32>
    %6 = arith.sitofp %5 : vector<8x128xi32> to vector<8x128xf32>
    %c0_7 = arith.constant 0 : index
    %c0_8 = arith.constant 0 : index
    %7 = vector.load %arg4[%c0_7, %c0_8] : memref<128x128xf32, #tpu.memory_space<vmem>>, vector<128x128xf32>
    %c0_i32 = arith.constant 0 : i32
    %8 = vector.broadcast %c0_i32 : i32 to vector<1x128xi32>
    %9 = arith.cmpi eq, %4, %8 : vector<1x128xi32>
    %10 = arith.truncf %7 : vector<128x128xf32> to vector<128x128xbf16>
    %cst = arith.constant dense<0.000000e+00> : vector<8x128xf32>
    %11 = tpu.matmul %2, %10, %cst {dimension_numbers = #tpu.dot_dimension_numbers<[1], [0], [0], [1], [0, 0, 1, 1], [], []>} : vector<8x128xbf16>, vector<128x128xbf16>, vector<8x128xf32> -> vector<8x128xf32>
    %12 = vector.broadcast %0 : vector<1x128xf32> to vector<8x128xf32>
    %13 = arith.addf %11, %12 : vector<8x128xf32>
    %cst_9 = arith.constant dense<0xFF800000> : vector<8xf32>
    %14 = vector.multi_reduction <maximumf>, %13, %cst_9 [1] : vector<8x128xf32> to vector<8xf32>
    %15 = vector.shape_cast %14 : vector<8xf32> to vector<8x1xf32>
    %16 = vector.broadcast %15 : vector<8x1xf32> to vector<8x128xf32>
    %17 = arith.cmpf oeq, %13, %16 : vector<8x128xf32>
    %cst_10 = arith.constant 1.280000e+02 : f32
    %18 = vector.broadcast %cst_10 : f32 to vector<8x128xf32>
    %19 = arith.select %17, %6, %18 : vector<8x128xi1>, vector<8x128xf32>
    %cst_11 = arith.constant dense<0x7F800000> : vector<8xf32>
    %20 = vector.multi_reduction <minimumf>, %19, %cst_11 [1] : vector<8x128xf32> to vector<8xf32>
    %21 = vector.shape_cast %20 : vector<8xf32> to vector<8x1xf32>
    %22 = arith.cmpf oeq, %21, %3 : vector<8x1xf32>
    %23 = arith.extui %22 : vector<8x1xi1> to vector<8x1xi32>
    %24 = arith.sitofp %23 : vector<8x1xi32> to vector<8x1xf32>
    %25 = vector.shape_cast %24 : vector<8x1xf32> to vector<1x8x1xf32>
    %cst_12 = arith.constant dense<0.000000e+00> : vector<1xf32>
    %26 = vector.multi_reduction <add>, %25, %cst_12 [1, 2] : vector<1x8x1xf32> to vector<1xf32>
    %27 = vector.shape_cast %26 : vector<1xf32> to vector<1x1x1xf32>
    %28 = vector.extract %27[0, 0, 0] : f32 from vector<1x1x1xf32>
    %29 = vector.broadcast %28 : f32 to vector<1x1xf32>
    %cst_13 = arith.constant 0.000000e+00 : f32
    %30 = vector.shape_cast %29 : vector<1x1xf32> to vector<1x1xf32>
    %31 = vector.broadcast %30 : vector<1x1xf32> to vector<1x128xf32>
    %32 = vector.broadcast %cst_13 : f32 to vector<1x128xf32>
    %33 = arith.select %9, %31, %32 : vector<1x128xi1>, vector<1x128xf32>
    %cst_14 = arith.constant 0.000000e+00 : f32
    %34 = vector.broadcast %cst_14 : f32 to vector<1x1xf32>
    %cst_15 = arith.constant 1.250000e-01 : f32
    %c0_i32_16 = arith.constant 0 : i32
    %35 = arith.index_cast %c0_i32_16 : i32 to index
    %c0_17 = arith.constant 0 : index
    %c0_18 = arith.constant 0 : index
    %36 = vector.load %arg0[%35, %c0_17, %c0_18] : memref<3x8x128xbf16, #tpu.memory_space<vmem>>, vector<1x8x128xbf16>
    %37 = vector.shape_cast %36 : vector<1x8x128xbf16> to vector<8x128xbf16>
    %38 = arith.index_cast %c0_i32_16 : i32 to index
    %c0_19 = arith.constant 0 : index
    %c0_20 = arith.constant 0 : index
    %39 = vector.load %arg1[%38, %c0_19, %c0_20] : memref<3x8x128xf32, #tpu.memory_space<vmem>>, vector<1x8x128xf32>
    %40 = vector.shape_cast %39 : vector<1x8x128xf32> to vector<8x128xf32>
    %41 = arith.truncf %7 : vector<128x128xf32> to vector<128x128xbf16>
    %cst_21 = arith.constant dense<0.000000e+00> : vector<8x128xf32>
    %42 = tpu.matmul %37, %41, %cst_21 {dimension_numbers = #tpu.dot_dimension_numbers<[1], [0], [0], [1], [0, 0, 1, 1], [], []>} : vector<8x128xbf16>, vector<128x128xbf16>, vector<8x128xf32> -> vector<8x128xf32>
    %43 = vector.broadcast %0 : vector<1x128xf32> to vector<8x128xf32>
    %44 = arith.addf %42, %43 : vector<8x128xf32>
    %cst_22 = arith.constant dense<0xFF800000> : vector<8xf32>
    %45 = vector.multi_reduction <maximumf>, %44, %cst_22 [1] : vector<8x128xf32> to vector<8xf32>
    %46 = vector.shape_cast %45 : vector<8xf32> to vector<8x1xf32>
    %47 = vector.broadcast %46 : vector<8x1xf32> to vector<8x128xf32>
    %48 = arith.subf %44, %47 : vector<8x128xf32>
    %49 = math.exp %48 : vector<8x128xf32>
    %cst_23 = arith.constant dense<0.000000e+00> : vector<8xf32>
    %50 = vector.multi_reduction <add>, %49, %cst_23 [1] : vector<8x128xf32> to vector<8xf32>
    %51 = vector.shape_cast %50 : vector<8xf32> to vector<8x1xf32>
    %52 = tpu.reciprocal %51 {approx = true} : vector<8x1xf32> -> vector<8x1xf32>
    %53 = vector.broadcast %52 : vector<8x1xf32> to vector<8x128xf32>
    %54 = arith.mulf %49, %53 : vector<8x128xf32>
    %55 = arith.mulf %40, %48 : vector<8x128xf32>
    %cst_24 = arith.constant dense<0.000000e+00> : vector<8xf32>
    %56 = vector.multi_reduction <add>, %55, %cst_24 [1] : vector<8x128xf32> to vector<8xf32>
    %57 = vector.shape_cast %56 : vector<8xf32> to vector<8x1xf32>
    %58 = math.log %51 : vector<8x1xf32>
    %59 = arith.subf %58, %57 : vector<8x1xf32>
    %60 = vector.shape_cast %59 : vector<8x1xf32> to vector<1x8x1xf32>
    %cst_25 = arith.constant dense<0.000000e+00> : vector<1xf32>
    %61 = vector.multi_reduction <add>, %60, %cst_25 [1, 2] : vector<1x8x1xf32> to vector<1xf32>
    %62 = vector.shape_cast %61 : vector<1xf32> to vector<1x1x1xf32>
    %63 = vector.extract %62[0, 0, 0] : f32 from vector<1x1x1xf32>
    %64 = vector.broadcast %63 : f32 to vector<1x1xf32>
    %65 = vector.broadcast %cst_15 : f32 to vector<1x1xf32>
    %66 = arith.mulf %64, %65 : vector<1x1xf32>
    %67 = arith.subf %40, %54 : vector<8x128xf32>
    %68 = arith.extf %37 : vector<8x128xbf16> to vector<8x128xf32>
    %cst_26 = arith.constant dense<0.000000e+00> : vector<128x128xf32>
    %69 = tpu.matmul %68, %67, %cst_26 {dimension_numbers = #tpu.dot_dimension_numbers<[0], [0], [1], [1], [0, 1, 1, 1], [], []>} : vector<8x128xf32>, vector<8x128xf32>, vector<128x128xf32> -> vector<128x128xf32>
    %70 = vector.broadcast %cst_15 : f32 to vector<128x128xf32>
    %71 = arith.mulf %69, %70 : vector<128x128xf32>
    %72 = arith.mulf %67, %67 : vector<8x128xf32>
    %cst_27 = arith.constant dense<0.000000e+00> : vector<128xf32>
    %73 = vector.multi_reduction <add>, %72, %cst_27 [0] : vector<8x128xf32> to vector<128xf32>
    %74 = vector.shape_cast %73 : vector<128xf32> to vector<1x128xf32>
    %cst_28 = arith.constant 8.000000e+00 : f32
    %75 = vector.broadcast %cst_28 : f32 to vector<1x128xf32>
    %76 = arith.divf %74, %75 : vector<1x128xf32>
    %77 = vector.broadcast %76 : vector<1x128xf32> to vector<128x128xf32>
    %78 = arith.mulf %77, %7 : vector<128x128xf32>
    %79 = arith.subf %71, %78 : vector<128x128xf32>
    %80 = vector.broadcast %1 : f32 to vector<128x128xf32>
    %81 = arith.mulf %80, %79 : vector<128x128xf32>
    %82 = arith.addf %7, %81 : vector<128x128xf32>
    %83 = arith.truncf %82 : vector<128x128xf32> to vector<128x128xbf16>
    %cst_29 = arith.constant dense<0.000000e+00> : vector<8x128xf32>
    %84 = tpu.matmul %2, %83, %cst_29 {dimension_numbers = #tpu.dot_dimension_numbers<[1], [0], [0], [1], [0, 0, 1, 1], [], []>} : vector<8x128xbf16>, vector<128x128xbf16>, vector<8x128xf32> -> vector<8x128xf32>
    %85 = vector.broadcast %0 : vector<1x128xf32> to vector<8x128xf32>
    %86 = arith.addf %84, %85 : vector<8x128xf32>
    %cst_30 = arith.constant dense<0xFF800000> : vector<8xf32>
    %87 = vector.multi_reduction <maximumf>, %86, %cst_30 [1] : vector<8x128xf32> to vector<8xf32>
    %88 = vector.shape_cast %87 : vector<8xf32> to vector<8x1xf32>
    %89 = vector.broadcast %88 : vector<8x1xf32> to vector<8x128xf32>
    %90 = arith.cmpf oeq, %86, %89 : vector<8x128xf32>
    %cst_31 = arith.constant 1.280000e+02 : f32
    %91 = vector.broadcast %cst_31 : f32 to vector<8x128xf32>
    %92 = arith.select %90, %6, %91 : vector<8x128xi1>, vector<8x128xf32>
    %cst_32 = arith.constant dense<0x7F800000> : vector<8xf32>
    %93 = vector.multi_reduction <minimumf>, %92, %cst_32 [1] : vector<8x128xf32> to vector<8xf32>
    %94 = vector.shape_cast %93 : vector<8xf32> to vector<8x1xf32>
    %95 = arith.cmpf oeq, %94, %3 : vector<8x1xf32>
    %96 = arith.extui %95 : vector<8x1xi1> to vector<8x1xi32>
    %97 = arith.sitofp %96 : vector<8x1xi32> to vector<8x1xf32>
    %98 = vector.shape_cast %97 : vector<8x1xf32> to vector<1x8x1xf32>
    %cst_33 = arith.constant dense<0.000000e+00> : vector<1xf32>
    %99 = vector.multi_reduction <add>, %98, %cst_33 [1, 2] : vector<1x8x1xf32> to vector<1xf32>
    %100 = vector.shape_cast %99 : vector<1xf32> to vector<1x1x1xf32>
    %101 = vector.extract %100[0, 0, 0] : f32 from vector<1x1x1xf32>
    %102 = vector.broadcast %101 : f32 to vector<1x1xf32>
    %c1_i32 = arith.constant 1 : i32
    %103 = arith.addi %c0_i32_16, %c1_i32 : i32
    %104 = vector.broadcast %103 : i32 to vector<1x128xi32>
    %105 = arith.cmpi eq, %4, %104 : vector<1x128xi32>
    %cst_34 = arith.constant 0.000000e+00 : f32
    %106 = vector.shape_cast %102 : vector<1x1xf32> to vector<1x1xf32>
    %107 = vector.broadcast %106 : vector<1x1xf32> to vector<1x128xf32>
    %108 = vector.broadcast %cst_34 : f32 to vector<1x128xf32>
    %109 = arith.select %105, %107, %108 : vector<1x128xi1>, vector<1x128xf32>
    %110 = arith.addf %33, %109 : vector<1x128xf32>
    %c1_i32_35 = arith.constant 1 : i32
    %111 = arith.index_cast %c1_i32_35 : i32 to index
    %c0_36 = arith.constant 0 : index
    %c0_37 = arith.constant 0 : index
    %112 = vector.load %arg0[%111, %c0_36, %c0_37] : memref<3x8x128xbf16, #tpu.memory_space<vmem>>, vector<1x8x128xbf16>
    %113 = vector.shape_cast %112 : vector<1x8x128xbf16> to vector<8x128xbf16>
    %114 = arith.index_cast %c1_i32_35 : i32 to index
    %c0_38 = arith.constant 0 : index
    %c0_39 = arith.constant 0 : index
    %115 = vector.load %arg1[%114, %c0_38, %c0_39] : memref<3x8x128xf32, #tpu.memory_space<vmem>>, vector<1x8x128xf32>
    %116 = vector.shape_cast %115 : vector<1x8x128xf32> to vector<8x128xf32>
    %117 = arith.truncf %82 : vector<128x128xf32> to vector<128x128xbf16>
    %cst_40 = arith.constant dense<0.000000e+00> : vector<8x128xf32>
    %118 = tpu.matmul %113, %117, %cst_40 {dimension_numbers = #tpu.dot_dimension_numbers<[1], [0], [0], [1], [0, 0, 1, 1], [], []>} : vector<8x128xbf16>, vector<128x128xbf16>, vector<8x128xf32> -> vector<8x128xf32>
    %119 = vector.broadcast %0 : vector<1x128xf32> to vector<8x128xf32>
    %120 = arith.addf %118, %119 : vector<8x128xf32>
    %cst_41 = arith.constant dense<0xFF800000> : vector<8xf32>
    %121 = vector.multi_reduction <maximumf>, %120, %cst_41 [1] : vector<8x128xf32> to vector<8xf32>
    %122 = vector.shape_cast %121 : vector<8xf32> to vector<8x1xf32>
    %123 = vector.broadcast %122 : vector<8x1xf32> to vector<8x128xf32>
    %124 = arith.subf %120, %123 : vector<8x128xf32>
    %125 = math.exp %124 : vector<8x128xf32>
    %cst_42 = arith.constant dense<0.000000e+00> : vector<8xf32>
    %126 = vector.multi_reduction <add>, %125, %cst_42 [1] : vector<8x128xf32> to vector<8xf32>
    %127 = vector.shape_cast %126 : vector<8xf32> to vector<8x1xf32>
    %128 = tpu.reciprocal %127 {approx = true} : vector<8x1xf32> -> vector<8x1xf32>
    %129 = vector.broadcast %128 : vector<8x1xf32> to vector<8x128xf32>
    %130 = arith.mulf %125, %129 : vector<8x128xf32>
    %131 = arith.mulf %116, %124 : vector<8x128xf32>
    %cst_43 = arith.constant dense<0.000000e+00> : vector<8xf32>
    %132 = vector.multi_reduction <add>, %131, %cst_43 [1] : vector<8x128xf32> to vector<8xf32>
    %133 = vector.shape_cast %132 : vector<8xf32> to vector<8x1xf32>
    %134 = math.log %127 : vector<8x1xf32>
    %135 = arith.subf %134, %133 : vector<8x1xf32>
    %136 = vector.shape_cast %135 : vector<8x1xf32> to vector<1x8x1xf32>
    %cst_44 = arith.constant dense<0.000000e+00> : vector<1xf32>
    %137 = vector.multi_reduction <add>, %136, %cst_44 [1, 2] : vector<1x8x1xf32> to vector<1xf32>
    %138 = vector.shape_cast %137 : vector<1xf32> to vector<1x1x1xf32>
    %139 = vector.extract %138[0, 0, 0] : f32 from vector<1x1x1xf32>
    %140 = vector.broadcast %139 : f32 to vector<1x1xf32>
    %141 = vector.broadcast %cst_15 : f32 to vector<1x1xf32>
    %142 = arith.mulf %140, %141 : vector<1x1xf32>
    %143 = arith.subf %116, %130 : vector<8x128xf32>
    %144 = arith.extf %113 : vector<8x128xbf16> to vector<8x128xf32>
    %cst_45 = arith.constant dense<0.000000e+00> : vector<128x128xf32>
    %145 = tpu.matmul %144, %143, %cst_45 {dimension_numbers = #tpu.dot_dimension_numbers<[0], [0], [1], [1], [0, 1, 1, 1], [], []>} : vector<8x128xf32>, vector<8x128xf32>, vector<128x128xf32> -> vector<128x128xf32>
    %146 = vector.broadcast %cst_15 : f32 to vector<128x128xf32>
    %147 = arith.mulf %145, %146 : vector<128x128xf32>
    %148 = arith.mulf %143, %143 : vector<8x128xf32>
    %cst_46 = arith.constant dense<0.000000e+00> : vector<128xf32>
    %149 = vector.multi_reduction <add>, %148, %cst_46 [0] : vector<8x128xf32> to vector<128xf32>
    %150 = vector.shape_cast %149 : vector<128xf32> to vector<1x128xf32>
    %cst_47 = arith.constant 8.000000e+00 : f32
    %151 = vector.broadcast %cst_47 : f32 to vector<1x128xf32>
    %152 = arith.divf %150, %151 : vector<1x128xf32>
    %153 = vector.broadcast %152 : vector<1x128xf32> to vector<128x128xf32>
    %154 = arith.mulf %153, %82 : vector<128x128xf32>
    %155 = arith.subf %147, %154 : vector<128x128xf32>
    %156 = vector.broadcast %1 : f32 to vector<128x128xf32>
    %157 = arith.mulf %156, %155 : vector<128x128xf32>
    %158 = arith.addf %82, %157 : vector<128x128xf32>
    %159 = arith.truncf %158 : vector<128x128xf32> to vector<128x128xbf16>
    %cst_48 = arith.constant dense<0.000000e+00> : vector<8x128xf32>
    %160 = tpu.matmul %2, %159, %cst_48 {dimension_numbers = #tpu.dot_dimension_numbers<[1], [0], [0], [1], [0, 0, 1, 1], [], []>} : vector<8x128xbf16>, vector<128x128xbf16>, vector<8x128xf32> -> vector<8x128xf32>
    %161 = vector.broadcast %0 : vector<1x128xf32> to vector<8x128xf32>
    %162 = arith.addf %160, %161 : vector<8x128xf32>
    %cst_49 = arith.constant dense<0xFF800000> : vector<8xf32>
    %163 = vector.multi_reduction <maximumf>, %162, %cst_49 [1] : vector<8x128xf32> to vector<8xf32>
    %164 = vector.shape_cast %163 : vector<8xf32> to vector<8x1xf32>
    %165 = vector.broadcast %164 : vector<8x1xf32> to vector<8x128xf32>
    %166 = arith.cmpf oeq, %162, %165 : vector<8x128xf32>
    %cst_50 = arith.constant 1.280000e+02 : f32
    %167 = vector.broadcast %cst_50 : f32 to vector<8x128xf32>
    %168 = arith.select %166, %6, %167 : vector<8x128xi1>, vector<8x128xf32>
    %cst_51 = arith.constant dense<0x7F800000> : vector<8xf32>
    %169 = vector.multi_reduction <minimumf>, %168, %cst_51 [1] : vector<8x128xf32> to vector<8xf32>
    %170 = vector.shape_cast %169 : vector<8xf32> to vector<8x1xf32>
    %171 = arith.cmpf oeq, %170, %3 : vector<8x1xf32>
    %172 = arith.extui %171 : vector<8x1xi1> to vector<8x1xi32>
    %173 = arith.sitofp %172 : vector<8x1xi32> to vector<8x1xf32>
    %174 = vector.shape_cast %173 : vector<8x1xf32> to vector<1x8x1xf32>
    %cst_52 = arith.constant dense<0.000000e+00> : vector<1xf32>
    %175 = vector.multi_reduction <add>, %174, %cst_52 [1, 2] : vector<1x8x1xf32> to vector<1xf32>
    %176 = vector.shape_cast %175 : vector<1xf32> to vector<1x1x1xf32>
    %177 = vector.extract %176[0, 0, 0] : f32 from vector<1x1x1xf32>
    %178 = vector.broadcast %177 : f32 to vector<1x1xf32>
    %c1_i32_53 = arith.constant 1 : i32
    %179 = arith.addi %c1_i32_35, %c1_i32_53 : i32
    %180 = vector.broadcast %179 : i32 to vector<1x128xi32>
    %181 = arith.cmpi eq, %4, %180 : vector<1x128xi32>
    %cst_54 = arith.constant 0.000000e+00 : f32
    %182 = vector.shape_cast %178 : vector<1x1xf32> to vector<1x1xf32>
    %183 = vector.broadcast %182 : vector<1x1xf32> to vector<1x128xf32>
    %184 = vector.broadcast %cst_54 : f32 to vector<1x128xf32>
    %185 = arith.select %181, %183, %184 : vector<1x128xi1>, vector<1x128xf32>
    %186 = arith.addf %110, %185 : vector<1x128xf32>
    %c2_i32 = arith.constant 2 : i32
    %187 = arith.index_cast %c2_i32 : i32 to index
    %c0_55 = arith.constant 0 : index
    %c0_56 = arith.constant 0 : index
    %188 = vector.load %arg0[%187, %c0_55, %c0_56] : memref<3x8x128xbf16, #tpu.memory_space<vmem>>, vector<1x8x128xbf16>
    %189 = vector.shape_cast %188 : vector<1x8x128xbf16> to vector<8x128xbf16>
    %190 = arith.index_cast %c2_i32 : i32 to index
    %c0_57 = arith.constant 0 : index
    %c0_58 = arith.constant 0 : index
    %191 = vector.load %arg1[%190, %c0_57, %c0_58] : memref<3x8x128xf32, #tpu.memory_space<vmem>>, vector<1x8x128xf32>
    %192 = vector.shape_cast %191 : vector<1x8x128xf32> to vector<8x128xf32>
    %193 = arith.truncf %158 : vector<128x128xf32> to vector<128x128xbf16>
    %cst_59 = arith.constant dense<0.000000e+00> : vector<8x128xf32>
    %194 = tpu.matmul %189, %193, %cst_59 {dimension_numbers = #tpu.dot_dimension_numbers<[1], [0], [0], [1], [0, 0, 1, 1], [], []>} : vector<8x128xbf16>, vector<128x128xbf16>, vector<8x128xf32> -> vector<8x128xf32>
    %195 = vector.broadcast %0 : vector<1x128xf32> to vector<8x128xf32>
    %196 = arith.addf %194, %195 : vector<8x128xf32>
    %cst_60 = arith.constant dense<0xFF800000> : vector<8xf32>
    %197 = vector.multi_reduction <maximumf>, %196, %cst_60 [1] : vector<8x128xf32> to vector<8xf32>
    %198 = vector.shape_cast %197 : vector<8xf32> to vector<8x1xf32>
    %199 = vector.broadcast %198 : vector<8x1xf32> to vector<8x128xf32>
    %200 = arith.subf %196, %199 : vector<8x128xf32>
    %201 = math.exp %200 : vector<8x128xf32>
    %cst_61 = arith.constant dense<0.000000e+00> : vector<8xf32>
    %202 = vector.multi_reduction <add>, %201, %cst_61 [1] : vector<8x128xf32> to vector<8xf32>
    %203 = vector.shape_cast %202 : vector<8xf32> to vector<8x1xf32>
    %204 = tpu.reciprocal %203 {approx = true} : vector<8x1xf32> -> vector<8x1xf32>
    %205 = vector.broadcast %204 : vector<8x1xf32> to vector<8x128xf32>
    %206 = arith.mulf %201, %205 : vector<8x128xf32>
    %207 = arith.mulf %192, %200 : vector<8x128xf32>
    %cst_62 = arith.constant dense<0.000000e+00> : vector<8xf32>
    %208 = vector.multi_reduction <add>, %207, %cst_62 [1] : vector<8x128xf32> to vector<8xf32>
    %209 = vector.shape_cast %208 : vector<8xf32> to vector<8x1xf32>
    %210 = math.log %203 : vector<8x1xf32>
    %211 = arith.subf %210, %209 : vector<8x1xf32>
    %212 = vector.shape_cast %211 : vector<8x1xf32> to vector<1x8x1xf32>
    %cst_63 = arith.constant dense<0.000000e+00> : vector<1xf32>
    %213 = vector.multi_reduction <add>, %212, %cst_63 [1, 2] : vector<1x8x1xf32> to vector<1xf32>
    %214 = vector.shape_cast %213 : vector<1xf32> to vector<1x1x1xf32>
    %215 = vector.extract %214[0, 0, 0] : f32 from vector<1x1x1xf32>
    %216 = vector.broadcast %215 : f32 to vector<1x1xf32>
    %217 = vector.broadcast %cst_15 : f32 to vector<1x1xf32>
    %218 = arith.mulf %216, %217 : vector<1x1xf32>
    %219 = arith.subf %192, %206 : vector<8x128xf32>
    %220 = arith.extf %189 : vector<8x128xbf16> to vector<8x128xf32>
    %cst_64 = arith.constant dense<0.000000e+00> : vector<128x128xf32>
    %221 = tpu.matmul %220, %219, %cst_64 {dimension_numbers = #tpu.dot_dimension_numbers<[0], [0], [1], [1], [0, 1, 1, 1], [], []>} : vector<8x128xf32>, vector<8x128xf32>, vector<128x128xf32> -> vector<128x128xf32>
    %222 = vector.broadcast %cst_15 : f32 to vector<128x128xf32>
    %223 = arith.mulf %221, %222 : vector<128x128xf32>
    %224 = arith.mulf %219, %219 : vector<8x128xf32>
    %cst_65 = arith.constant dense<0.000000e+00> : vector<128xf32>
    %225 = vector.multi_reduction <add>, %224, %cst_65 [0] : vector<8x128xf32> to vector<128xf32>
    %226 = vector.shape_cast %225 : vector<128xf32> to vector<1x128xf32>
    %cst_66 = arith.constant 8.000000e+00 : f32
    %227 = vector.broadcast %cst_66 : f32 to vector<1x128xf32>
    %228 = arith.divf %226, %227 : vector<1x128xf32>
    %229 = vector.broadcast %228 : vector<1x128xf32> to vector<128x128xf32>
    %230 = arith.mulf %229, %158 : vector<128x128xf32>
    %231 = arith.subf %223, %230 : vector<128x128xf32>
    %232 = vector.broadcast %1 : f32 to vector<128x128xf32>
    %233 = arith.mulf %232, %231 : vector<128x128xf32>
    %234 = arith.addf %158, %233 : vector<128x128xf32>
    %235 = arith.truncf %234 : vector<128x128xf32> to vector<128x128xbf16>
    %cst_67 = arith.constant dense<0.000000e+00> : vector<8x128xf32>
    %236 = tpu.matmul %2, %235, %cst_67 {dimension_numbers = #tpu.dot_dimension_numbers<[1], [0], [0], [1], [0, 0, 1, 1], [], []>} : vector<8x128xbf16>, vector<128x128xbf16>, vector<8x128xf32> -> vector<8x128xf32>
    %237 = vector.broadcast %0 : vector<1x128xf32> to vector<8x128xf32>
    %238 = arith.addf %236, %237 : vector<8x128xf32>
    %cst_68 = arith.constant dense<0xFF800000> : vector<8xf32>
    %239 = vector.multi_reduction <maximumf>, %238, %cst_68 [1] : vector<8x128xf32> to vector<8xf32>
    %240 = vector.shape_cast %239 : vector<8xf32> to vector<8x1xf32>
    %241 = vector.broadcast %240 : vector<8x1xf32> to vector<8x128xf32>
    %242 = arith.cmpf oeq, %238, %241 : vector<8x128xf32>
    %cst_69 = arith.constant 1.280000e+02 : f32
    %243 = vector.broadcast %cst_69 : f32 to vector<8x128xf32>
    %244 = arith.select %242, %6, %243 : vector<8x128xi1>, vector<8x128xf32>
    %cst_70 = arith.constant dense<0x7F800000> : vector<8xf32>
    %245 = vector.multi_reduction <minimumf>, %244, %cst_70 [1] : vector<8x128xf32> to vector<8xf32>
    %246 = vector.shape_cast %245 : vector<8xf32> to vector<8x1xf32>
    %247 = arith.cmpf oeq, %246, %3 : vector<8x1xf32>
    %248 = arith.extui %247 : vector<8x1xi1> to vector<8x1xi32>
    %249 = arith.sitofp %248 : vector<8x1xi32> to vector<8x1xf32>
    %250 = vector.shape_cast %249 : vector<8x1xf32> to vector<1x8x1xf32>
    %cst_71 = arith.constant dense<0.000000e+00> : vector<1xf32>
    %251 = vector.multi_reduction <add>, %250, %cst_71 [1, 2] : vector<1x8x1xf32> to vector<1xf32>
    %252 = vector.shape_cast %251 : vector<1xf32> to vector<1x1x1xf32>
    %253 = vector.extract %252[0, 0, 0] : f32 from vector<1x1x1xf32>
    %254 = vector.broadcast %253 : f32 to vector<1x1xf32>
    %c1_i32_72 = arith.constant 1 : i32
    %255 = arith.addi %c2_i32, %c1_i32_72 : i32
    %256 = vector.broadcast %255 : i32 to vector<1x128xi32>
    %257 = arith.cmpi eq, %4, %256 : vector<1x128xi32>
    %cst_73 = arith.constant 0.000000e+00 : f32
    %258 = vector.shape_cast %254 : vector<1x1xf32> to vector<1x1xf32>
    %259 = vector.broadcast %258 : vector<1x1xf32> to vector<1x128xf32>
    %260 = vector.broadcast %cst_73 : f32 to vector<1x128xf32>
    %261 = arith.select %257, %259, %260 : vector<1x128xi1>, vector<1x128xf32>
    %262 = arith.addf %186, %261 : vector<1x128xf32>
    %c3_i32 = arith.constant 3 : i32
    %c0_74 = arith.constant 0 : index
    %c0_75 = arith.constant 0 : index
    %263 = vector.load %arg7[%c0_74, %c0_75] : memref<2x128xf32, #tpu.memory_space<vmem>>, vector<1x128xf32>
    tpu.vector_store %arg7[%c0_74, %c0_75], %262 {strides = array<i32>} : memref<2x128xf32, #tpu.memory_space<vmem>>, vector<1x128xf32>,
    %c0_i32_76 = arith.constant 0 : i32
    %264 = vector.broadcast %c0_i32_76 : i32 to vector<1x128xi32>
    %265 = arith.cmpi eq, %4, %264 : vector<1x128xi32>
    %cst_77 = arith.constant 0.000000e+00 : f32
    %266 = vector.shape_cast %218 : vector<1x1xf32> to vector<1x1xf32>
    %267 = vector.broadcast %266 : vector<1x1xf32> to vector<1x128xf32>
    %268 = vector.broadcast %cst_77 : f32 to vector<1x128xf32>
    %269 = arith.select %265, %267, %268 : vector<1x128xi1>, vector<1x128xf32>
    %c1 = arith.constant 1 : index
    %c0_78 = arith.constant 0 : index
    %270 = vector.load %arg7[%c1, %c0_78] : memref<2x128xf32, #tpu.memory_space<vmem>>, vector<1x128xf32>
    tpu.vector_store %arg7[%c1, %c0_78], %269 {strides = array<i32>} : memref<2x128xf32, #tpu.memory_space<vmem>>, vector<1x128xf32>,
    return
  }
}

</mosaic_0001>

<bundles_post_ra>
// kernel: squeeze.4
= control target key start
LH: loop header
LB: loop body
LE: loop exit
PB: predicated region body
PF: predicated region fallthrough
CT: control target
= control target key end

     0   :  { %vm90_vm0 = vcmask 1041409   ;;  %vm94_vm1 = vcmask 1042434   ;;  %vm98_vm2 = vcmask 1043459   ;;  %vm102_vm3 = vcmask 1044484   ;;  %s2571_s25 = smov 112   ;;  %s2572_s23 = smov 96   ;;  %s4760_s0 = inlined_call_operand.vmem [shape: f32[1,8,4,16,16], index: 0, kind: input, shape index: {}]   ;;  %s4761_s1 = inlined_call_operand.vmem [shape: f32[8,1024], index: 1, kind: output, shape index: {}]  }
   0x1   :  { %vm106_vm4 = vcmask 1045509   ;;  %v2084_v0 = vld [vmem:[%s4760_s0 + $0xf] sm:$0x1]   ;;  %vm110_vm5 = vcmask 1046534   ;;  %vm114_vm6 = vcmask 1047559   ;;  %s2573_s8 = smov 80  }
   0x2   :  { %v2085_v1 = vld [vmem:[%s4760_s0 + $0x4e] sm:$0x2]   ;;  %v2067_v9 = vld [vmem:[%s4760_s0 + $0x7] sm:$0x1]   ;;  %v2129_v52 = vld [vmem:[%s4760_s0 + $0x3f] sm:$0x1]  }
   0x3   :  { %v2086_v2 = vld [vmem:[%s4760_s0 + $0x8d] sm:$0x4]   ;;  %v160_v4 = vsel %vm90_vm0, %v2085_v1, %v2084_v0  ;;  %v2068_v10 = vld [vmem:[%s4760_s0 + $0x46] sm:$0x2]   ;;  %v2130_v53 = vld [vmem:[%s4760_s0 + $0x7e] sm:$0x2]  }
   0x4   :  { %v2087_v3 = vld [vmem:[%s4760_s0 + $0xcc] sm:$0x8]   ;;  %v164_v7 = vsel %vm94_vm1, %v2086_v2, %v160_v4  ;;  %v91_v12 = vsel %vm90_vm0, %v2068_v10, %v2067_v9  ;;  %v2069_v13 = vld [vmem:[%s4760_s0 + $0x85] sm:$0x4]   ;;  %v335_v56 = vsel %vm90_vm0, %v2130_v53, %v2129_v52  ;;  %v2131_v57 = vld [vmem:[%s4760_s0 + $0xbd] sm:$0x4]  }
   0x5   :  { %v2088_v5 = vld [vmem:[%s4760_s0 + $0x10b] sm:$0x10]   ;;  %v168_v11 = vsel %vm98_vm2, %v2087_v3, %v164_v7  ;;  %v2070_v14 = vld [vmem:[%s4760_s0 + $0xc4] sm:$0x8]   ;;  %v95_v18 = vsel %vm94_vm1, %v2069_v13, %v91_v12  ;;  %v2132_v58 = vld [vmem:[%s4760_s0 + $0xfc] sm:$0x8]   ;;  %v339_v62 = vsel %vm94_vm1, %v2131_v57, %v335_v56 }
   0x6   :  { %v2089_v6 = vld [vmem:[%s4760_s0 + $0x14a] sm:$0x20]   ;;  %v2071_v15 = vld [vmem:[%s4760_s0 + $0x103] sm:$0x10]   ;;  %v172_v16 = vsel %vm102_vm3, %v2088_v5, %v168_v11  ;;  %v99_v22 = vsel %vm98_vm2, %v2070_v14, %v95_v18  ;;  %v2133_v59 = vld [vmem:[%s4760_s0 + $0x13b] sm:$0x10]   ;;  %v343_v2 = vsel %vm98_vm2, %v2132_v58, %v339_v62 }
   0x7   :  { %v2090_v8 = vld [vmem:[%s4760_s0 + $0x189] sm:$0x40]   ;;  %v2072_v19 = vld [vmem:[%s4760_s0 + $0x142] sm:$0x20]   ;;  %v176_v21 = vsel %vm106_vm4, %v2089_v6, %v172_v16  ;;  %v103_v27 = vsel %vm102_vm3, %v2071_v15, %v99_v22  ;;  %v2134_v63 = vld [vmem:[%s4760_s0 + $0x17a] sm:$0x20]   ;;  %v347_v7 = vsel %vm102_vm3, %v2133_v59, %v343_v2 }
   0x8   :  { %v2091_v17 = vld [vmem:[%s4760_s0 + $0x1c8] sm:$0x80]   ;;  %v2073_v20 = vld [vmem:[%s4760_s0 + $0x181] sm:$0x40]   ;;  %v180_v26 = vsel %vm110_vm5, %v2090_v8, %v176_v21  ;;  %v107_v33 = vsel %vm106_vm4, %v2072_v19, %v103_v27  ;;  %v2120_v3 = vld [vmem:[%s4760_s0 + $0x1f] sm:$0x1]   ;;  %v351_v12 = vsel %vm106_vm4, %v2134_v63, %v347_v7 }
   0x9   :  { %v2093_v23 = vld [vmem:[%s4760_s0 + $0x2f] sm:$0x1]   ;;  %v2074_v28 = vld [vmem:[%s4760_s0 + $0x1c0] sm:$0x80]   ;;  %v184_v32 = vsel %vm114_vm6, %v2091_v17, %v180_v26  ;;  %v111_v38 = vsel %vm110_vm5, %v2073_v20, %v107_v33  ;;  %v2121_v4 = vld [vmem:[%s4760_s0 + $0x5e] sm:$0x2]  }
   0xa   :  { %v2094_v24 = vld [vmem:[%s4760_s0 + $0x6e] sm:$0x2]   ;;  %v2075_v37 = vld [vmem:[%s4760_s0 + $0x27] sm:$0x1]   ;;  %185 = vrot.lane.b32.xlu1 %v184_v32, %s2571_s25  ;;  %v115_v43 = vsel %vm114_vm6, %v2074_v28, %v111_v38  ;;  %v2122_v5 = vld [vmem:[%s4760_s0 + $0x9d] sm:$0x4]   ;;  %v300_v8 = vsel %vm90_vm0, %v2121_v4, %v2120_v3 }
   0xb   :  { %v2095_v25 = vld [vmem:[%s4760_s0 + $0xad] sm:$0x4]   ;;  %v195_v29 = vsel %vm90_vm0, %v2094_v24, %v2093_v23  ;;  %v2076_v40 = vld [vmem:[%s4760_s0 + $0x66] sm:$0x2]   ;;  %116 = vrot.lane.b32.xlu0 %v115_v43, %s2571_s25  ;;  %v2123_v9 = vld [vmem:[%s4760_s0 + $0xdc] sm:$0x8]   ;;  %v304_v14 = vsel %vm94_vm1, %v2122_v5, %v300_v8 }
   0xc   :  { %v2096_v30 = vld [vmem:[%s4760_s0 + $0xec] sm:$0x8]   ;;  %v199_v34 = vsel %vm94_vm1, %v2095_v25, %v195_v29  ;;  %v2077_v41 = vld [vmem:[%s4760_s0 + $0xa5] sm:$0x4]   ;;  %v125_v46 = vsel %vm90_vm0, %v2076_v40, %v2075_v37  ;;  %v2124_v10 = vld [vmem:[%s4760_s0 + $0x11b] sm:$0x10]   ;;  %v308_v17 = vsel %vm98_vm2, %v2123_v9, %v304_v14 }
   0xd   :  { %v2097_v31 = vld [vmem:[%s4760_s0 + $0x12b] sm:$0x10]   ;;  %v203_v39 = vsel %vm98_vm2, %v2096_v30, %v199_v34  ;;  %v2078_v42 = vld [vmem:[%s4760_s0 + $0xe4] sm:$0x8]   ;;  %v129_v50 = vsel %vm94_vm1, %v2077_v41, %v125_v46  ;;  %v2135_v13 = vld [vmem:[%s4760_s0 + $0x1b9] sm:$0x40]   ;;  %v312_v21 = vsel %vm102_vm3, %v2124_v10, %v308_v17 }
   0xe   :  { %v2098_v35 = vld [vmem:[%s4760_s0 + $0x16a] sm:$0x20]   ;;  %v207_v44 = vsel %vm102_vm3, %v2097_v31, %v203_v39  ;;  %v2079_v47 = vld [vmem:[%s4760_s0 + $0x123] sm:$0x10]   ;;  %v133_v55 = vsel %vm98_vm2, %v2078_v42, %v129_v50  ;;  %v2125_v15 = vld [vmem:[%s4760_s0 + $0x15a] sm:$0x20]   ;;  %v355_v25 = vsel %vm110_vm5, %v2135_v13, %v351_v12 }
   0xf   :  { %v2099_v36 = vld [vmem:[%s4760_s0 + $0x1a9] sm:$0x40]   ;;  %v2080_v48 = vld [vmem:[%s4760_s0 + $0x162] sm:$0x20]   ;;  %v211_v49 = vsel %vm106_vm4, %v2098_v35, %v207_v44  ;;  %v137_v60 = vsel %vm102_vm3, %v2079_v47, %v133_v55  ;;  %v2155_v16 = vld [vmem:[%s4760_s0 + $0xe] sm:$0x1]   ;;  %v316_v27 = vsel %vm106_vm4, %v2125_v15, %v312_v21 }
  0x10   :  { %v2100_v45 = vld [vmem:[%s4760_s0 + $0x1e8] sm:$0x80]   ;;  %v2081_v51 = vld [vmem:[%s4760_s0 + $0x1a1] sm:$0x40]   ;;  %v215_v54 = vsel %vm110_vm5, %v2099_v36, %v211_v49  ;;  %v141_v1 = vsel %vm106_vm4, %v2080_v48, %v137_v60  ;;  %v2156_v18 = vld [vmem:[%s4760_s0 + $0x4d] sm:$0x2]  }
  0x11   :  { %v2082_v61 = vld [vmem:[%s4760_s0 + $0x1e0] sm:$0x80]   ;;  %v219_v0 = vsel %vm114_vm6, %v2100_v45, %v215_v54  ;;  %v145_v6 = vsel %vm110_vm5, %v2081_v51, %v141_v1  ;;  %v2157_v19 = vld [vmem:[%s4760_s0 + $0x8c] sm:$0x4]   ;;  %v2126_v22 = vld [vmem:[%s4760_s0 + $0x199] sm:$0x40]   ;;  %v439_v23 = vsel %vm90_vm0, %v2156_v18, %v2155_v16 }
  0x12   :  { %v149_v11 = vsel %vm114_vm6, %v2082_v61, %v145_v6  ;;  %220 = vrot.lane.b32.xlu1 %v219_v0, %s2571_s25  ;;  %v2158_v20 = vld [vmem:[%s4760_s0 + $0xcb] sm:$0x8]   ;;  %v2136_v26 = vld [vmem:[%s4760_s0 + $0x1f8] sm:$0x80]   ;;  %v443_v28 = vsel %vm94_vm1, %v2157_v19, %v439_v23  ;;  %v2146_v29 = vld [vmem:[%s4760_s0 + $0x26] sm:$0x1]   ;;  %v320_v36 = vsel %vm110_vm5, %v2126_v22, %v316_v27 }
  0x13   :  { %v2159_v24 = vld [vmem:[%s4760_s0 + $0x10a] sm:$0x10]   ;;  %150 = vrot.lane.b32.xlu0 %v149_v11, %s2571_s25  ;;  %v2147_v30 = vld [vmem:[%s4760_s0 + $0x65] sm:$0x2]   ;;  %v447_v31 = vsel %vm98_vm2, %v2158_v20, %v443_v28  ;;  %v2127_v37 = vld [vmem:[%s4760_s0 + $0x1d8] sm:$0x80]   ;;  %v359_v41 = vsel %vm114_vm6, %v2136_v26, %v355_v25 }
  0x14   :  { %v404_v32 = vsel %vm90_vm0, %v2147_v30, %v2146_v29  ;;  %v2148_v33 = vld [vmem:[%s4760_s0 + $0xa4] sm:$0x4]   ;;  %v451_v38 = vsel %vm102_vm3, %v2159_v24, %v447_v31  ;;  %v2160_v39 = vld [vmem:[%s4760_s0 + $0x149] sm:$0x20]   ;;  %v2102_v44 = vld [vmem:[%s4760_s0 + $0x17] sm:$0x1]   ;;  %v324_v52 = vsel %vm114_vm6, %v2127_v37, %v320_v36 }
  0x15   :  { %v2149_v34 = vld [vmem:[%s4760_s0 + $0xe3] sm:$0x8]   ;;  %v408_v40 = vsel %vm94_vm1, %v2148_v33, %v404_v32  ;;  %v2161_v42 = vld [vmem:[%s4760_s0 + $0x188] sm:$0x40]   ;;  %v2103_v45 = vld [vmem:[%s4760_s0 + $0x56] sm:$0x2]   ;;  %v455_v53 = vsel %vm106_vm4, %v2160_v39, %v451_v38 }
  0x16   :  { %v2150_v35 = vld [vmem:[%s4760_s0 + $0x122] sm:$0x10]   ;;  %v412_v43 = vsel %vm98_vm2, %v2149_v34, %v408_v40  ;;  %v2104_v46 = vld [vmem:[%s4760_s0 + $0x95] sm:$0x4]   ;;  %v230_v49 = vsel %vm90_vm0, %v2103_v45, %v2102_v44  ;;  %v2182_v57 = vld [vmem:[%s4760_s0 + $0x36] sm:$0x1]   ;;  %v459_v4 = vsel %vm110_vm5, %v2161_v42, %v455_v53 }
  0x17   :  { %v416_v47 = vsel %vm102_vm3, %v2150_v35, %v412_v43  ;;  %v2151_v48 = vld [vmem:[%s4760_s0 + $0x161] sm:$0x20]   ;;  %v2105_v50 = vld [vmem:[%s4760_s0 + $0xd4] sm:$0x8]   ;;  %v234_v54 = vsel %vm94_vm1, %v2104_v46, %v230_v49  ;;  %v2183_v59 = vld [vmem:[%s4760_s0 + $0x75] sm:$0x2]  }
  0x18   :  { %v2106_v51 = vld [vmem:[%s4760_s0 + $0x113] sm:$0x10]   ;;  %v238_v58 = vsel %vm98_vm2, %v2105_v50, %v234_v54  ;;  %v2184_v60 = vld [vmem:[%s4760_s0 + $0xb4] sm:$0x4]   ;;  %v420_v62 = vsel %vm106_vm4, %v2151_v48, %v416_v47  ;;  %v2152_v63 = vld [vmem:[%s4760_s0 + $0x1a0] sm:$0x40]   ;;  %v544_v2 = vsel %vm90_vm0, %v2183_v59, %v2182_v57 }
  0x19   :  { %v2107_v55 = vld [vmem:[%s4760_s0 + $0x152] sm:$0x20]   ;;  %v2185_v61 = vld [vmem:[%s4760_s0 + $0xf3] sm:$0x8]   ;;  %v242_v0 = vsel %vm102_vm3, %v2106_v51, %v238_v58  ;;  %v2162_v5 = vld [vmem:[%s4760_s0 + $0x1c7] sm:$0x80]   ;;  %v548_v7 = vsel %vm94_vm1, %v2184_v60, %v544_v2  ;;  %v424_v16 = vsel %vm110_vm5, %v2152_v63, %v420_v62 }
  0x1a   :  { %v2108_v56 = vld [vmem:[%s4760_s0 + $0x191] sm:$0x40]   ;;  %360 = vrot.lane.b32.xlu1 %v359_v41, %s2571_s25  ;;  %v2186_v3 = vld [vmem:[%s4760_s0 + $0x132] sm:$0x10]   ;;  %v246_v6 = vsel %vm106_vm4, %v2107_v55, %v242_v0  ;;  %v552_v11 = vsel %vm98_vm2, %v2185_v61, %v548_v7  ;;  %v2153_v17 = vld [vmem:[%s4760_s0 + $0x1df] sm:$0x80]   ;;  %v463_v22 = vsel %vm114_vm6, %v2162_v5, %v459_v4 }
  0x1b   :  { %v2109_v1 = vld [vmem:[%s4760_s0 + $0x1d0] sm:$0x80]   ;;  %325 = vrot.lane.b32.xlu0 %v324_v52, %s2571_s25  ;;  %v2173_v8 = vld [vmem:[%s4760_s0 + $0x16] sm:$0x1]   ;;  %v250_v10 = vsel %vm110_vm5, %v2108_v56, %v246_v6  ;;  %v556_v19 = vsel %vm102_vm3, %v2186_v3, %v552_v11  ;;  %v428_v33 = vsel %vm114_vm6, %v2153_v17, %v424_v16  ;;  %v2209_v38 = vld [vmem:[%s4760_s0 + $0x5] sm:$0x1]  }
  0x1c   :  { %v2174_v9 = vld [vmem:[%s4760_s0 + $0x55] sm:$0x2]   ;;  %v254_v18 = vsel %vm114_vm6, %v2109_v1, %v250_v10  ;;  %v2111_v25 = vld [vmem:[%s4760_s0 + $0x37] sm:$0x1]   ;;  %v2210_v40 = vld [vmem:[%s4760_s0 + $0x44] sm:$0x2]  }
  0x1d   :  { %v509_v12 = vsel %vm90_vm0, %v2174_v9, %v2173_v8  ;;  %v2175_v13 = vld [vmem:[%s4760_s0 + $0x94] sm:$0x4]   ;;  %255 = vrot.lane.b32.xlu2 %v254_v18, %s2571_s25  ;;  %v2112_v26 = vld [vmem:[%s4760_s0 + $0x76] sm:$0x2]   ;;  %v2211_v41 = vld [vmem:[%s4760_s0 + $0x83] sm:$0x4]   ;;  %v649_v47 = vsel %vm90_vm0, %v2210_v40, %v2209_v38 }
  0x1e   :  { %v2176_v14 = vld [vmem:[%s4760_s0 + $0xd3] sm:$0x8]   ;;  %v513_v21 = vsel %vm94_vm1, %v2175_v13, %v509_v12  ;;  %v2113_v27 = vld [vmem:[%s4760_s0 + $0xb5] sm:$0x4]   ;;  %v265_v30 = vsel %vm90_vm0, %v2112_v26, %v2111_v25  ;;  %v2212_v42 = vld [vmem:[%s4760_s0 + $0xc2] sm:$0x8]   ;;  %v653_v52 = vsel %vm94_vm1, %v2211_v41, %v649_v47 }
  0x1f   :  { %v2177_v15 = vld [vmem:[%s4760_s0 + $0x112] sm:$0x10]   ;;  %v517_v24 = vsel %vm98_vm2, %v2176_v14, %v513_v21  ;;  %v2114_v31 = vld [vmem:[%s4760_s0 + $0xf4] sm:$0x8]   ;;  %v269_v35 = vsel %vm94_vm1, %v2113_v27, %v265_v30  ;;  %v2213_v48 = vld [vmem:[%s4760_s0 + $0x101] sm:$0x10]   ;;  %v657_v56 = vsel %vm98_vm2, %v2212_v42, %v653_v52 }
  0x20   :  { %v2187_v20 = vld [vmem:[%s4760_s0 + $0x171] sm:$0x20]   ;;  %v521_v28 = vsel %vm102_vm3, %v2177_v15, %v517_v24  ;;  %v2115_v32 = vld [vmem:[%s4760_s0 + $0x133] sm:$0x10]   ;;  %v273_v39 = vsel %vm98_vm2, %v2114_v31, %v269_v35  ;;  %v2200_v53 = vld [vmem:[%s4760_s0 + $0x3e] sm:$0x1]   ;;  %v661_v0 = vsel %vm102_vm3, %v2213_v48, %v657_v56 }
  0x21   :  { %v2188_v23 = vld [vmem:[%s4760_s0 + $0x1b0] sm:$0x40]   ;;  %v560_v34 = vsel %vm106_vm4, %v2187_v20, %v556_v19  ;;  %v2116_v36 = vld [vmem:[%s4760_s0 + $0x172] sm:$0x20]   ;;  %v277_v45 = vsel %vm102_vm3, %v2115_v32, %v273_v39  ;;  %v2201_v54 = vld [vmem:[%s4760_s0 + $0x7d] sm:$0x2]  }
  0x22   :  { %v2178_v29 = vld [vmem:[%s4760_s0 + $0x151] sm:$0x20]   ;;  %v2117_v37 = vld [vmem:[%s4760_s0 + $0x1b1] sm:$0x40]   ;;  %464 = vrot.lane.b32.xlu1 %v463_v22, %s2572_s23  ;;  %v564_v49 = vsel %vm110_vm5, %v2188_v23, %v560_v34  ;;  %v281_v51 = vsel %vm106_vm4, %v2116_v36, %v277_v45  ;;  %v614_v57 = vsel %vm90_vm0, %v2201_v54, %v2200_v53  ;;  %v2202_v58 = vld [vmem:[%s4760_s0 + $0xbc] sm:$0x4]  }
  0x23   :  { %v525_v43 = vsel %vm106_vm4, %v2178_v29, %v521_v28  ;;  %v2179_v44 = vld [vmem:[%s4760_s0 + $0x190] sm:$0x40]   ;;  %v2118_v46 = vld [vmem:[%s4760_s0 + $0x1f0] sm:$0x80]   ;;  %429 = vrot.lane.b32.xlu0 %v428_v33, %s2572_s23  ;;  %v285_v55 = vsel %vm110_vm5, %v2117_v37, %v281_v51  ;;  %v2203_v59 = vld [vmem:[%s4760_s0 + $0xfb] sm:$0x8]   ;;  %v618_v2 = vsel %vm94_vm1, %v2202_v58, %v614_v57 }
  0x24   :  { %v2189_v50 = vld [vmem:[%s4760_s0 + $0x1ef] sm:$0x80]   ;;  %v2204_v60 = vld [vmem:[%s4760_s0 + $0x13a] sm:$0x10]   ;;  %v529_v61 = vsel %vm110_vm5, %v2179_v44, %v525_v43  ;;  %v289_v63 = vsel %vm114_vm6, %v2118_v46, %v285_v55  ;;  %v2214_v1 = vld [vmem:[%s4760_s0 + $0x140] sm:$0x20]   ;;  %v622_v5 = vsel %vm98_vm2, %v2203_v59, %v618_v2 }
  0x25   :  { %v2180_v62 = vld [vmem:[%s4760_s0 + $0x1cf] sm:$0x80]   ;;  %v568_v3 = vsel %vm114_vm6, %v2189_v50, %v564_v49  ;;  %290 = vrot.lane.b32.xlu2 %v289_v63, %s2571_s25  ;;  %v2215_v4 = vld [vmem:[%s4760_s0 + $0x17f] sm:$0x40]   ;;  %v2138_v6 = vld [vmem:[%s4760_s0 + $0x6] sm:$0x1]   ;;  %v626_v9 = vsel %vm102_vm3, %v2204_v60, %v622_v5  ;;  %v665_v15 = vsel %vm106_vm4, %v2214_v1, %v661_v0 }
  0x26   :  { %v2139_v7 = vld [vmem:[%s4760_s0 + $0x45] sm:$0x2]   ;;  %v2205_v10 = vld [vmem:[%s4760_s0 + $0x179] sm:$0x20]   ;;  %v533_v14 = vsel %vm114_vm6, %v2180_v62, %v529_v61  ;;  %v2235_v19 = vld [vmem:[%s4760_s0 + $0x2d] sm:$0x1]   ;;  %v669_v30 = vsel %vm110_vm5, %v2215_v4, %v665_v15 }
  0x27   :  { %v2140_v8 = vld [vmem:[%s4760_s0 + $0x84] sm:$0x4]   ;;  %v370_v11 = vsel %vm90_vm0, %v2139_v7, %v2138_v6  ;;  %v2236_v21 = vld [vmem:[%s4760_s0 + $0x6c] sm:$0x2]   ;;  %v630_v24 = vsel %vm106_vm4, %v2205_v10, %v626_v9  ;;  %v2206_v25 = vld [vmem:[%s4760_s0 + $0x1b8] sm:$0x40]  }
  0x28   :  { %v2141_v12 = vld [vmem:[%s4760_s0 + $0xc3] sm:$0x8]   ;;  %v374_v16 = vsel %vm94_vm1, %v2140_v8, %v370_v11  ;;  %v2237_v22 = vld [vmem:[%s4760_s0 + $0xab] sm:$0x4]   ;;  %v753_v28 = vsel %vm90_vm0, %v2236_v21, %v2235_v19  ;;  %v2216_v31 = vld [vmem:[%s4760_s0 + $0x1be] sm:$0x80]   ;;  %v634_v42 = vsel %vm110_vm5, %v2206_v25, %v630_v24 }
  0x29   :  { %v2142_v13 = vld [vmem:[%s4760_s0 + $0x102] sm:$0x10]   ;;  %v378_v20 = vsel %vm98_vm2, %v2141_v12, %v374_v16  ;;  %v2238_v23 = vld [vmem:[%s4760_s0 + $0xea] sm:$0x8]   ;;  %v757_v33 = vsel %vm94_vm1, %v2237_v22, %v753_v28  ;;  %v2207_v43 = vld [vmem:[%s4760_s0 + $0x1f7] sm:$0x80]   ;;  %v673_v48 = vsel %vm114_vm6, %v2216_v31, %v669_v30 }
  0x2a   :  { %v2143_v17 = vld [vmem:[%s4760_s0 + $0x141] sm:$0x20]   ;;  %569 = vrot.lane.b32.xlu1 %v568_v3, %s2572_s23  ;;  %v382_v26 = vsel %vm102_vm3, %v2142_v13, %v378_v20  ;;  %v2239_v29 = vld [vmem:[%s4760_s0 + $0x129] sm:$0x10]   ;;  %v761_v37 = vsel %vm98_vm2, %v2238_v23, %v757_v33  ;;  %v2164_v51 = vld [vmem:[%s4760_s0 + $0x2e] sm:$0x1]   ;;  %v638_v59 = vsel %vm114_vm6, %v2207_v43, %v634_v42 }
  0x2b   :  { %v2144_v18 = vld [vmem:[%s4760_s0 + $0x180] sm:$0x40]   ;;  %534 = vrot.lane.b32.xlu0 %v533_v14, %s2572_s23  ;;  %v386_v32 = vsel %vm106_vm4, %v2143_v17, %v382_v26  ;;  %v2226_v34 = vld [vmem:[%s4760_s0 + $0xd] sm:$0x1]   ;;  %v765_v45 = vsel %vm102_vm3, %v2239_v29, %v761_v37  ;;  %v2165_v52 = vld [vmem:[%s4760_s0 + $0x6d] sm:$0x2]  }
  0x2c   :  { %v2145_v27 = vld [vmem:[%s4760_s0 + $0x1bf] sm:$0x80]   ;;  %v2227_v35 = vld [vmem:[%s4760_s0 + $0x4c] sm:$0x2]   ;;  %v390_v36 = vsel %vm110_vm5, %v2144_v18, %v386_v32  ;;  %v2166_v53 = vld [vmem:[%s4760_s0 + $0xac] sm:$0x4]   ;;  %v474_v56 = vsel %vm90_vm0, %v2165_v52, %v2164_v51 }
  0x2d   :  { %v718_v38 = vsel %vm90_vm0, %v2227_v35, %v2226_v34  ;;  %v2228_v39 = vld [vmem:[%s4760_s0 + $0x8b] sm:$0x4]   ;;  %v394_v44 = vsel %vm114_vm6, %v2145_v27, %v390_v36  ;;  %v2167_v57 = vld [vmem:[%s4760_s0 + $0xeb] sm:$0x8]   ;;  %v478_v61 = vsel %vm94_vm1, %v2166_v53, %v474_v56  ;;  %v2262_v0 = vld [vmem:[%s4760_s0 + $0x1d] sm:$0x1]  }
  0x2e   :  { %v2229_v40 = vld [vmem:[%s4760_s0 + $0xca] sm:$0x8]   ;;  %v722_v47 = vsel %vm94_vm1, %v2228_v39, %v718_v38  ;;  %395 = vrot.lane.b32.xlu2 %v394_v44, %s2572_s23  ;;  %v2168_v58 = vld [vmem:[%s4760_s0 + $0x12a] sm:$0x10]   ;;  %v482_v1 = vsel %vm98_vm2, %v2167_v57, %v478_v61  ;;  %v2263_v2 = vld [vmem:[%s4760_s0 + $0x5c] sm:$0x2]  }
  0x2f   :  { %v2230_v41 = vld [vmem:[%s4760_s0 + $0x109] sm:$0x10]   ;;  %v726_v50 = vsel %vm98_vm2, %v2229_v40, %v722_v47  ;;  %v2169_v62 = vld [vmem:[%s4760_s0 + $0x169] sm:$0x20]   ;;  %v2264_v3 = vld [vmem:[%s4760_s0 + $0x9b] sm:$0x4]   ;;  %v486_v7 = vsel %vm102_vm3, %v2168_v58, %v482_v1  ;;  %v858_v9 = vsel %vm90_vm0, %v2263_v2, %v2262_v0 }
  0x30   :  { %v2240_v46 = vld [vmem:[%s4760_s0 + $0x168] sm:$0x20]   ;;  %v730_v54 = vsel %vm102_vm3, %v2230_v41, %v726_v50  ;;  %v2170_v63 = vld [vmem:[%s4760_s0 + $0x1a8] sm:$0x40]   ;;  %v2265_v4 = vld [vmem:[%s4760_s0 + $0xda] sm:$0x8]   ;;  %v490_v13 = vsel %vm106_vm4, %v2169_v62, %v486_v7  ;;  %v862_v14 = vsel %vm94_vm1, %v2264_v3, %v858_v9 }
  0x31   :  { %v2241_v49 = vld [vmem:[%s4760_s0 + $0x1a7] sm:$0x40]   ;;  %v769_v60 = vsel %vm106_vm4, %v2240_v46, %v765_v45  ;;  %v2171_v8 = vld [vmem:[%s4760_s0 + $0x1e7] sm:$0x80]   ;;  %v2266_v10 = vld [vmem:[%s4760_s0 + $0x119] sm:$0x10]   ;;  %v494_v17 = vsel %vm110_vm5, %v2170_v63, %v490_v13  ;;  %v866_v18 = vsel %vm98_vm2, %v2265_v4, %v862_v14 }
  0x32   :  { %v2231_v55 = vld [vmem:[%s4760_s0 + $0x148] sm:$0x20]   ;;  %674 = vrot.lane.b32.xlu1 %v673_v48, %s2573_s8  ;;  %v773_v11 = vsel %vm110_vm5, %v2241_v49, %v769_v60  ;;  %v2253_v15 = vld [vmem:[%s4760_s0 + $0x35] sm:$0x1]   ;;  %v498_v25 = vsel %vm114_vm6, %v2171_v8, %v494_v17  ;;  %v870_v26 = vsel %vm102_vm3, %v2266_v10, %v866_v18  ;;  %v2267_v27 = vld [vmem:[%s4760_s0 + $0x158] sm:$0x20]  }
  0x33   :  { %v734_v5 = vsel %vm106_vm4, %v2231_v55, %v730_v54  ;;  %v2232_v6 = vld [vmem:[%s4760_s0 + $0x187] sm:$0x40]   ;;  %639 = vrot.lane.b32.xlu0 %v638_v59, %s2572_s23  ;;  %v2254_v16 = vld [vmem:[%s4760_s0 + $0x74] sm:$0x2]   ;;  %v2268_v30 = vld [vmem:[%s4760_s0 + $0x197] sm:$0x40]   ;;  %v874_v41 = vsel %vm106_vm4, %v2267_v27, %v870_v26 }
  0x34   :  { %v2242_v12 = vld [vmem:[%s4760_s0 + $0x1e6] sm:$0x80]   ;;  %v823_v19 = vsel %vm90_vm0, %v2254_v16, %v2253_v15  ;;  %v2255_v20 = vld [vmem:[%s4760_s0 + $0xb3] sm:$0x4]   ;;  %v738_v23 = vsel %vm110_vm5, %v2232_v6, %v734_v5  ;;  %v2191_v32 = vld [vmem:[%s4760_s0 + $0x1e] sm:$0x1]   ;;  %v878_v56 = vsel %vm110_vm5, %v2268_v30, %v874_v41 }
  0x35   :  { %v2256_v21 = vld [vmem:[%s4760_s0 + $0xf2] sm:$0x8]   ;;  %v2233_v24 = vld [vmem:[%s4760_s0 + $0x1c6] sm:$0x80]   ;;  %v827_v28 = vsel %vm94_vm1, %v2255_v20, %v823_v19  ;;  %v777_v29 = vsel %vm114_vm6, %v2242_v12, %v773_v11  ;;  %v2192_v33 = vld [vmem:[%s4760_s0 + $0x5d] sm:$0x2]  }
  0x36   :  { %v2257_v22 = vld [vmem:[%s4760_s0 + $0x131] sm:$0x10]   ;;  %499 = vrot.lane.b32.xlu2 %v498_v25, %s2572_s23  ;;  %v831_v31 = vsel %vm98_vm2, %v2256_v21, %v827_v28  ;;  %v2193_v34 = vld [vmem:[%s4760_s0 + $0x9c] sm:$0x4]   ;;  %v579_v37 = vsel %vm90_vm0, %v2192_v33, %v2191_v32  ;;  %v742_v40 = vsel %vm114_vm6, %v2233_v24, %v738_v23  ;;  %v2288_v47 = vld [vmem:[%s4760_s0 + $0x24] sm:$0x1]  }
  0x37   :  { %v835_v35 = vsel %vm102_vm3, %v2257_v22, %v831_v31  ;;  %v2258_v36 = vld [vmem:[%s4760_s0 + $0x170] sm:$0x20]   ;;  %v2194_v38 = vld [vmem:[%s4760_s0 + $0xdb] sm:$0x8]   ;;  %v583_v43 = vsel %vm94_vm1, %v2193_v34, %v579_v37  ;;  %v2289_v48 = vld [vmem:[%s4760_s0 + $0x63] sm:$0x2]  }
  0x38   :  { %v2195_v39 = vld [vmem:[%s4760_s0 + $0x11a] sm:$0x10]   ;;  %v2259_v42 = vld [vmem:[%s4760_s0 + $0x1af] sm:$0x40]   ;;  %v587_v46 = vsel %vm98_vm2, %v2194_v38, %v583_v43  ;;  %v2290_v49 = vld [vmem:[%s4760_s0 + $0xa2] sm:$0x4]   ;;  %v839_v50 = vsel %vm106_vm4, %v2258_v36, %v835_v35  ;;  %v962_v53 = vsel %vm90_vm0, %v2289_v48, %v2288_v47 }
  0x39   :  { %v2196_v44 = vld [vmem:[%s4760_s0 + $0x159] sm:$0x20]   ;;  %v591_v51 = vsel %vm102_vm3, %v2195_v39, %v587_v46  ;;  %v2291_v54 = vld [vmem:[%s4760_s0 + $0xe1] sm:$0x8]   ;;  %v2269_v57 = vld [vmem:[%s4760_s0 + $0x1d6] sm:$0x80]   ;;  %v966_v59 = vsel %vm94_vm1, %v2290_v49, %v962_v53  ;;  %v843_v2 = vsel %vm110_vm5, %v2259_v42, %v839_v50 }
  0x3a   :  { %v2197_v45 = vld [vmem:[%s4760_s0 + $0x198] sm:$0x40]   ;;  %778 = vrot.lane.b32.xlu1 %v777_v29, %s2573_s8  ;;  %v2292_v55 = vld [vmem:[%s4760_s0 + $0x120] sm:$0x10]   ;;  %v595_v58 = vsel %vm106_vm4, %v2196_v44, %v591_v51  ;;  %v970_v62 = vsel %vm98_vm2, %v2291_v54, %v966_v59  ;;  %v2260_v3 = vld [vmem:[%s4760_s0 + $0x1ee] sm:$0x80]   ;;  %v882_v9 = vsel %vm114_vm6, %v2269_v57, %v878_v56 }
  0x3b   :  { %v2198_v52 = vld [vmem:[%s4760_s0 + $0x1d7] sm:$0x80]   ;;  %743 = vrot.lane.b32.xlu0 %v742_v40, %s2573_s8  ;;  %v2280_v60 = vld [vmem:[%s4760_s0 + $0x4] sm:$0x1]   ;;  %v599_v61 = vsel %vm110_vm5, %v2197_v45, %v595_v58  ;;  %v974_v5 = vsel %vm102_vm3, %v2292_v55, %v970_v62  ;;  %v2217_v13 = vld [vmem:[%s4760_s0 + $0x25] sm:$0x1]   ;;  %v847_v20 = vsel %vm114_vm6, %v2260_v3, %v843_v2 }
  0x3c   :  { %v2281_v63 = vld [vmem:[%s4760_s0 + $0x43] sm:$0x2]   ;;  %v603_v4 = vsel %vm114_vm6, %v2198_v52, %v599_v61  ;;  %v2218_v14 = vld [vmem:[%s4760_s0 + $0x64] sm:$0x2]   ;;  %v2315_v28 = vld [vmem:[%s4760_s0 + $0x14] sm:$0x1]  }
  0x3d   :  { %v2282_v0 = vld [vmem:[%s4760_s0 + $0x82] sm:$0x4]   ;;  %v928_v7 = vsel %vm90_vm0, %v2281_v63, %v2280_v60  ;;  %v683_v16 = vsel %vm90_vm0, %v2218_v14, %v2217_v13  ;;  %v2219_v17 = vld [vmem:[%s4760_s0 + $0xa3] sm:$0x4]   ;;  %v2316_v29 = vld [vmem:[%s4760_s0 + $0x53] sm:$0x2]  }
  0x3e   :  { %v2283_v1 = vld [vmem:[%s4760_s0 + $0xc1] sm:$0x8]   ;;  %604 = vrot.lane.b32.xlu2 %v603_v4, %s2572_s23  ;;  %v932_v11 = vsel %vm94_vm1, %v2282_v0, %v928_v7  ;;  %v2220_v18 = vld [vmem:[%s4760_s0 + $0xe2] sm:$0x8]   ;;  %v687_v24 = vsel %vm94_vm1, %v2219_v17, %v683_v16  ;;  %v2317_v30 = vld [vmem:[%s4760_s0 + $0x92] sm:$0x4]   ;;  %v1067_v34 = vsel %vm90_vm0, %v2316_v29, %v2315_v28 }
  0x3f   :  { %v2293_v6 = vld [vmem:[%s4760_s0 + $0x15f] sm:$0x20]   ;;  %v936_v15 = vsel %vm98_vm2, %v2283_v1, %v932_v11  ;;  %v2221_v19 = vld [vmem:[%s4760_s0 + $0x121] sm:$0x10]   ;;  %v691_v27 = vsel %vm98_vm2, %v2220_v18, %v687_v24  ;;  %v2318_v35 = vld [vmem:[%s4760_s0 + $0xd1] sm:$0x8]   ;;  %v1071_v40 = vsel %vm94_vm1, %v2317_v30, %v1067_v34 }
  0x40   :  { %v2284_v8 = vld [vmem:[%s4760_s0 + $0x100] sm:$0x10]   ;;  %v978_v21 = vsel %vm106_vm4, %v2293_v6, %v974_v5  ;;  %v2222_v25 = vld [vmem:[%s4760_s0 + $0x160] sm:$0x20]   ;;  %v695_v32 = vsel %vm102_vm3, %v2221_v19, %v691_v27  ;;  %v2319_v36 = vld [vmem:[%s4760_s0 + $0x110] sm:$0x10]   ;;  %v1075_v43 = vsel %vm98_vm2, %v2318_v35, %v1071_v40 }
  0x41   :  { %v2294_v10 = vld [vmem:[%s4760_s0 + $0x19e] sm:$0x40]   ;;  %v940_v22 = vsel %vm102_vm3, %v2284_v8, %v936_v15  ;;  %v2223_v26 = vld [vmem:[%s4760_s0 + $0x19f] sm:$0x40]   ;;  %v699_v39 = vsel %vm106_vm4, %v2222_v25, %v695_v32  ;;  %v2306_v41 = vld [vmem:[%s4760_s0 + $0x2c] sm:$0x1]   ;;  %v1079_v50 = vsel %vm102_vm3, %v2319_v36, %v1075_v43 }
  0x42   :  { %v2285_v12 = vld [vmem:[%s4760_s0 + $0x13f] sm:$0x20]   ;;  %883 = vrot.lane.b32.xlu1 %v882_v9, %s2573_s8  ;;  %v2224_v33 = vld [vmem:[%s4760_s0 + $0x1de] sm:$0x80]   ;;  %v982_v37 = vsel %vm110_vm5, %v2294_v10, %v978_v21  ;;  %v703_v42 = vsel %vm110_vm5, %v2223_v26, %v699_v39  ;;  %v2307_v44 = vld [vmem:[%s4760_s0 + $0x6b] sm:$0x2]  }
  0x43   :  { %v2286_v23 = vld [vmem:[%s4760_s0 + $0x17e] sm:$0x40]   ;;  %v944_v31 = vsel %vm106_vm4, %v2285_v12, %v940_v22  ;;  %848 = vrot.lane.b32.xlu0 %v847_v20, %s2573_s8  ;;  %v2308_v45 = vld [vmem:[%s4760_s0 + $0xaa] sm:$0x4]   ;;  %v707_v49 = vsel %vm114_vm6, %v2224_v33, %v703_v42  ;;  %v2320_v51 = vld [vmem:[%s4760_s0 + $0x14f] sm:$0x20]   ;;  %v1032_v52 = vsel %vm90_vm0, %v2307_v44, %v2306_v41 }
  0x44   :  { %v2295_v38 = vld [vmem:[%s4760_s0 + $0x1dd] sm:$0x80]   ;;  %v2309_v46 = vld [vmem:[%s4760_s0 + $0xe9] sm:$0x8]   ;;  %v948_v47 = vsel %vm110_vm5, %v2286_v23, %v944_v31  ;;  %v2321_v55 = vld [vmem:[%s4760_s0 + $0x18e] sm:$0x40]   ;;  %v1036_v56 = vsel %vm94_vm1, %v2308_v45, %v1032_v52  ;;  %v1083_v2 = vsel %vm106_vm4, %v2320_v51, %v1079_v50 }
  0x45   :  { %v2287_v48 = vld [vmem:[%s4760_s0 + $0x1bd] sm:$0x80]   ;;  %v2310_v53 = vld [vmem:[%s4760_s0 + $0x128] sm:$0x10]   ;;  %v986_v54 = vsel %vm114_vm6, %v2295_v38, %v982_v37  ;;  %v2244_v58 = vld [vmem:[%s4760_s0 + $0x15] sm:$0x1]   ;;  %v1040_v60 = vsel %vm98_vm2, %v2309_v46, %v1036_v56  ;;  %v1087_v18 = vsel %vm110_vm5, %v2321_v55, %v1083_v2 }
  0x46   :  { %708 = vrot.lane.b32.xlu2 %v707_v49, %s2573_s8  ;;  %v2311_v57 = vld [vmem:[%s4760_s0 + $0x167] sm:$0x20]   ;;  %v2245_v59 = vld [vmem:[%s4760_s0 + $0x54] sm:$0x2]   ;;  %v952_v1 = vsel %vm114_vm6, %v2287_v48, %v948_v47  ;;  %v1044_v3 = vsel %vm102_vm3, %v2310_v53, %v1040_v60  ;;  %s2574_s15 = smov 64   ;;  %s2575_s22 = smov 48  }
  0x47   :  { %v788_v61 = vsel %vm90_vm0, %v2245_v59, %v2244_v58  ;;  %v2246_v62 = vld [vmem:[%s4760_s0 + $0x93] sm:$0x4]   ;;  %v2312_v4 = vld [vmem:[%s4760_s0 + $0x1a6] sm:$0x40]   ;;  %v2342_v9 = vld [vmem:[%s4760_s0 + $0x3c] sm:$0x1]   ;;  %v1048_v12 = vsel %vm106_vm4, %v2311_v57, %v1044_v3 }
  0x48   :  { %v2247_v63 = vld [vmem:[%s4760_s0 + $0xd2] sm:$0x8]   ;;  %v792_v5 = vsel %vm94_vm1, %v2246_v62, %v788_v61  ;;  %v2343_v10 = vld [vmem:[%s4760_s0 + $0x7b] sm:$0x2]   ;;  %v2322_v19 = vld [vmem:[%s4760_s0 + $0x1cd] sm:$0x80]   ;;  %v1052_v28 = vsel %vm110_vm5, %v2312_v4, %v1048_v12 }
  0x49   :  { %v2248_v0 = vld [vmem:[%s4760_s0 + $0x111] sm:$0x10]   ;;  %v796_v8 = vsel %vm98_vm2, %v2247_v63, %v792_v5  ;;  %v2344_v11 = vld [vmem:[%s4760_s0 + $0xba] sm:$0x4]   ;;  %v1172_v15 = vsel %vm90_vm0, %v2343_v10, %v2342_v9  ;;  %v2313_v29 = vld [vmem:[%s4760_s0 + $0x1e5] sm:$0x80]   ;;  %v1091_v35 = vsel %vm114_vm6, %v2322_v19, %v1087_v18 }
  0x4a   :  { %v2249_v6 = vld [vmem:[%s4760_s0 + $0x150] sm:$0x20]   ;;  %987 = vrot.lane.b32.xlu1 %v986_v54, %s2574_s15  ;;  %v800_v13 = vsel %vm102_vm3, %v2248_v0, %v796_v8  ;;  %v2345_v16 = vld [vmem:[%s4760_s0 + $0xf9] sm:$0x8]   ;;  %v1176_v21 = vsel %vm94_vm1, %v2344_v11, %v1172_v15  ;;  %v2271_v39 = vld [vmem:[%s4760_s0 + $0x3d] sm:$0x1]   ;;  %v1056_v46 = vsel %vm114_vm6, %v2313_v29, %v1052_v28 }
  0x4b   :  { %v2250_v7 = vld [vmem:[%s4760_s0 + $0x18f] sm:$0x40]   ;;  %v2346_v17 = vld [vmem:[%s4760_s0 + $0x138] sm:$0x10]   ;;  %953 = vrot.lane.b32.xlu0 %v952_v1, %s2574_s15  ;;  %v804_v20 = vsel %vm106_vm4, %v2249_v6, %v800_v13  ;;  %v1180_v24 = vsel %vm98_vm2, %v2345_v16, %v1176_v21  ;;  %v2272_v40 = vld [vmem:[%s4760_s0 + $0x7c] sm:$0x2]  }
  0x4c   :  { %v2251_v14 = vld [vmem:[%s4760_s0 + $0x1ce] sm:$0x80]   ;;  %v2333_v22 = vld [vmem:[%s4760_s0 + $0x1c] sm:$0x1]   ;;  %v808_v23 = vsel %vm110_vm5, %v2250_v7, %v804_v20  ;;  %v1184_v31 = vsel %vm102_vm3, %v2346_v17, %v1180_v24  ;;  %v893_v42 = vsel %vm90_vm0, %v2272_v40, %v2271_v39  ;;  %v2273_v43 = vld [vmem:[%s4760_s0 + $0xbb] sm:$0x4]  }
  0x4d   :  { %v2334_v25 = vld [vmem:[%s4760_s0 + $0x5b] sm:$0x2]   ;;  %v812_v30 = vsel %vm114_vm6, %v2251_v14, %v808_v23  ;;  %v2274_v44 = vld [vmem:[%s4760_s0 + $0xfa] sm:$0x8]   ;;  %v897_v50 = vsel %vm94_vm1, %v2273_v43, %v893_v42  ;;  %v2368_v54 = vld [vmem:[%s4760_s0 + $0xb] sm:$0x1]  }
  0x4e   :  { %v2335_v26 = vld [vmem:[%s4760_s0 + $0x9a] sm:$0x4]   ;;  %v1137_v33 = vsel %vm90_vm0, %v2334_v25, %v2333_v22  ;;  %813 = vrot.lane.b32.xlu2 %v812_v30, %s2573_s8  ;;  %v2275_v45 = vld [vmem:[%s4760_s0 + $0x139] sm:$0x10]   ;;  %v901_v53 = vsel %vm98_vm2, %v2274_v44, %v897_v50  ;;  %v2369_v55 = vld [vmem:[%s4760_s0 + $0x4a] sm:$0x2]  }
  0x4f   :  { %v2336_v27 = vld [vmem:[%s4760_s0 + $0xd9] sm:$0x8]   ;;  %v1141_v37 = vsel %vm94_vm1, %v2335_v26, %v1137_v33  ;;  %v2276_v51 = vld [vmem:[%s4760_s0 + $0x178] sm:$0x20]   ;;  %v2370_v56 = vld [vmem:[%s4760_s0 + $0x89] sm:$0x4]   ;;  %v905_v58 = vsel %vm102_vm3, %v2275_v45, %v901_v53  ;;  %v1276_v60 = vsel %vm90_vm0, %v2369_v55, %v2368_v54 }
  0x50   :  { %v2347_v32 = vld [vmem:[%s4760_s0 + $0x177] sm:$0x20]   ;;  %v1145_v41 = vsel %vm98_vm2, %v2336_v27, %v1141_v37  ;;  %v2277_v52 = vld [vmem:[%s4760_s0 + $0x1b7] sm:$0x40]   ;;  %v2371_v61 = vld [vmem:[%s4760_s0 + $0xc8] sm:$0x8]   ;;  %v909_v1 = vsel %vm106_vm4, %v2276_v51, %v905_v58  ;;  %v1280_v2 = vsel %vm94_vm1, %v2370_v56, %v1276_v60 }
  0x51   :  { %v2337_v34 = vld [vmem:[%s4760_s0 + $0x118] sm:$0x10]   ;;  %v1188_v47 = vsel %vm106_vm4, %v2347_v32, %v1184_v31  ;;  %v2278_v59 = vld [vmem:[%s4760_s0 + $0x1f6] sm:$0x80]   ;;  %v2372_v62 = vld [vmem:[%s4760_s0 + $0x107] sm:$0x10]   ;;  %v913_v4 = vsel %vm110_vm5, %v2277_v52, %v909_v1  ;;  %v1284_v5 = vsel %vm98_vm2, %v2371_v61, %v1280_v2 }
  0x52   :  { %v2348_v36 = vld [vmem:[%s4760_s0 + $0x1b6] sm:$0x40]   ;;  %v1149_v48 = vsel %vm102_vm3, %v2337_v34, %v1145_v41  ;;  %1092 = vrot.lane.b32.xlu1 %v1091_v35, %s2574_s15  ;;  %v2359_v3 = vld [vmem:[%s4760_s0 + $0x23] sm:$0x1]   ;;  %v917_v11 = vsel %vm114_vm6, %v2278_v59, %v913_v4  ;;  %v1288_v12 = vsel %vm102_vm3, %v2372_v62, %v1284_v5  ;;  %v2373_v13 = vld [vmem:[%s4760_s0 + $0x146] sm:$0x20]  }
  0x53   :  { %v2338_v38 = vld [vmem:[%s4760_s0 + $0x157] sm:$0x20]   ;;  %1057 = vrot.lane.b32.xlu0 %v1056_v46, %s2574_s15  ;;  %v1192_v63 = vsel %vm110_vm5, %v2348_v36, %v1188_v47  ;;  %v2360_v6 = vld [vmem:[%s4760_s0 + $0x62] sm:$0x2]   ;;  %v2374_v17 = vld [vmem:[%s4760_s0 + $0x185] sm:$0x40]   ;;  %v1292_v28 = vsel %vm106_vm4, %v2373_v13, %v1288_v12 }
  0x54   :  { %v2339_v49 = vld [vmem:[%s4760_s0 + $0x196] sm:$0x40]   ;;  %v1153_v57 = vsel %vm106_vm4, %v2338_v38, %v1149_v48  ;;  %v2361_v7 = vld [vmem:[%s4760_s0 + $0xa1] sm:$0x4]   ;;  %v1241_v14 = vsel %vm90_vm0, %v2360_v6, %v2359_v3  ;;  %v2297_v20 = vld [vmem:[%s4760_s0 + $0xc] sm:$0x1]   ;;  %v1296_v44 = vsel %vm110_vm5, %v2374_v17, %v1292_v28 }
  0x55   :  { %v2349_v0 = vld [vmem:[%s4760_s0 + $0x1f5] sm:$0x80]   ;;  %v2362_v8 = vld [vmem:[%s4760_s0 + $0xe0] sm:$0x8]   ;;  %v1157_v9 = vsel %vm110_vm5, %v2339_v49, %v1153_v57  ;;  %v1245_v18 = vsel %vm94_vm1, %v2361_v7, %v1241_v14  ;;  %v2298_v21 = vld [vmem:[%s4760_s0 + $0x4b] sm:$0x2]  }
  0x56   :  { %v2340_v10 = vld [vmem:[%s4760_s0 + $0x1d5] sm:$0x80]   ;;  %v2363_v15 = vld [vmem:[%s4760_s0 + $0x11f] sm:$0x10]   ;;  %v1196_v16 = vsel %vm114_vm6, %v2349_v0, %v1192_v63  ;;  %918 = vrot.lane.b32.xlu2 %v917_v11, %s2573_s8  ;;  %v1249_v22 = vsel %vm98_vm2, %v2362_v8, %v1245_v18  ;;  %v997_v23 = vsel %vm90_vm0, %v2298_v21, %v2297_v20  ;;  %v2299_v24 = vld [vmem:[%s4760_s0 + $0x8a] sm:$0x4]  }
  0x57   :  { %v2364_v19 = vld [vmem:[%s4760_s0 + $0x15e] sm:$0x20]   ;;  %v2300_v25 = vld [vmem:[%s4760_s0 + $0xc9] sm:$0x8]   ;;  %v1161_v27 = vsel %vm114_vm6, %v2340_v10, %v1157_v9  ;;  %v1253_v29 = vsel %vm102_vm3, %v2363_v15, %v1249_v22  ;;  %v1001_v31 = vsel %vm94_vm1, %v2299_v24, %v997_v23  ;;  %v2395_v35 = vld [vmem:[%s4760_s0 + $0x33] sm:$0x1]  }
  0x58   :  { %v2301_v26 = vld [vmem:[%s4760_s0 + $0x108] sm:$0x10]   ;;  %v2365_v30 = vld [vmem:[%s4760_s0 + $0x19d] sm:$0x40]   ;;  %v1005_v34 = vsel %vm98_vm2, %v2300_v25, %v1001_v31  ;;  %v2396_v36 = vld [vmem:[%s4760_s0 + $0x72] sm:$0x2]   ;;  %v1257_v38 = vsel %vm106_vm4, %v2364_v19, %v1253_v29 }
  0x59   :  { %v2302_v32 = vld [vmem:[%s4760_s0 + $0x147] sm:$0x20]   ;;  %v2397_v37 = vld [vmem:[%s4760_s0 + $0xb1] sm:$0x4]   ;;  %v1009_v39 = vsel %vm102_vm3, %v2301_v26, %v1005_v34  ;;  %v1381_v41 = vsel %vm90_vm0, %v2396_v36, %v2395_v35  ;;  %v2375_v45 = vld [vmem:[%s4760_s0 + $0x1c4] sm:$0x80]   ;;  %v1261_v54 = vsel %vm110_vm5, %v2365_v30, %v1257_v38 }
  0x5a   :  { %v2303_v33 = vld [vmem:[%s4760_s0 + $0x186] sm:$0x40]   ;;  %1197 = vrot.lane.b32.xlu1 %v1196_v16, %s2574_s15  ;;  %v2398_v42 = vld [vmem:[%s4760_s0 + $0xf0] sm:$0x8]   ;;  %v1013_v46 = vsel %vm106_vm4, %v2302_v32, %v1009_v39  ;;  %v1385_v47 = vsel %vm94_vm1, %v2397_v37, %v1381_v41  ;;  %v2366_v55 = vld [vmem:[%s4760_s0 + $0x1dc] sm:$0x80]   ;;  %v1300_v61 = vsel %vm114_vm6, %v2375_v45, %v1296_v44 }
  0x5b   :  { %v2304_v40 = vld [vmem:[%s4760_s0 + $0x1c5] sm:$0x80]   ;;  %v2399_v43 = vld [vmem:[%s4760_s0 + $0x12f] sm:$0x10]   ;;  %1162 = vrot.lane.b32.xlu0 %v1161_v27, %s2574_s15  ;;  %v1017_v49 = vsel %vm110_vm5, %v2303_v33, %v1013_v46  ;;  %v1389_v50 = vsel %vm98_vm2, %v2398_v42, %v1385_v47  ;;  %v2324_v1 = vld [vmem:[%s4760_s0 + $0x34] sm:$0x1]   ;;  %v1265_v8 = vsel %vm114_vm6, %v2366_v55, %v1261_v54 }
  0x5c   :  { %v2386_v48 = vld [vmem:[%s4760_s0 + $0x13] sm:$0x1]   ;;  %v1021_v56 = vsel %vm114_vm6, %v2304_v40, %v1017_v49  ;;  %v1393_v57 = vsel %vm102_vm3, %v2399_v43, %v1389_v50  ;;  %v2325_v2 = vld [vmem:[%s4760_s0 + $0x73] sm:$0x2]   ;;  %v2422_v16 = vld [vmem:[%s4760_s0 + $0x2] sm:$0x1]  }
  0x5d   :  { %v2387_v51 = vld [vmem:[%s4760_s0 + $0x52] sm:$0x2]   ;;  %v1102_v4 = vsel %vm90_vm0, %v2325_v2, %v2324_v1  ;;  %v2326_v5 = vld [vmem:[%s4760_s0 + $0xb2] sm:$0x4]   ;;  %v2423_v17 = vld [vmem:[%s4760_s0 + $0x41] sm:$0x2]  }
  0x5e   :  { %v2388_v52 = vld [vmem:[%s4760_s0 + $0x91] sm:$0x4]   ;;  %v1346_v59 = vsel %vm90_vm0, %v2387_v51, %v2386_v48  ;;  %1022 = vrot.lane.b32.xlu2 %v1021_v56, %s2574_s15  ;;  %v2327_v6 = vld [vmem:[%s4760_s0 + $0xf1] sm:$0x8]   ;;  %v1106_v12 = vsel %vm94_vm1, %v2326_v5, %v1102_v4  ;;  %v2424_v18 = vld [vmem:[%s4760_s0 + $0x80] sm:$0x4]   ;;  %v1486_v22 = vsel %vm90_vm0, %v2423_v17, %v2422_v16 }
  0x5f   :  { %v2389_v53 = vld [vmem:[%s4760_s0 + $0xd0] sm:$0x8]   ;;  %v1350_v63 = vsel %vm94_vm1, %v2388_v52, %v1346_v59  ;;  %v2328_v7 = vld [vmem:[%s4760_s0 + $0x130] sm:$0x10]   ;;  %v1110_v15 = vsel %vm98_vm2, %v2327_v6, %v1106_v12  ;;  %v2425_v23 = vld [vmem:[%s4760_s0 + $0xbf] sm:$0x8]   ;;  %v1490_v29 = vsel %vm94_vm1, %v2424_v18, %v1486_v22 }
  0x60   :  { %v2400_v58 = vld [vmem:[%s4760_s0 + $0x16e] sm:$0x20]   ;;  %v1354_v3 = vsel %vm98_vm2, %v2389_v53, %v1350_v63  ;;  %v2329_v13 = vld [vmem:[%s4760_s0 + $0x16f] sm:$0x20]   ;;  %v1114_v20 = vsel %vm102_vm3, %v2328_v7, %v1110_v15  ;;  %v2426_v24 = vld [vmem:[%s4760_s0 + $0xfe] sm:$0x10]   ;;  %v1494_v31 = vsel %vm98_vm2, %v2425_v23, %v1490_v29 }
  0x61   :  { %v2390_v60 = vld [vmem:[%s4760_s0 + $0x10f] sm:$0x10]   ;;  %v1397_v9 = vsel %vm106_vm4, %v2400_v58, %v1393_v57  ;;  %v2330_v14 = vld [vmem:[%s4760_s0 + $0x1ae] sm:$0x40]   ;;  %v1118_v28 = vsel %vm106_vm4, %v2329_v13, %v1114_v20  ;;  %v2413_v32 = vld [vmem:[%s4760_s0 + $0x3b] sm:$0x1]   ;;  %v1498_v37 = vsel %vm102_vm3, %v2426_v24, %v1494_v31 }
  0x62   :  { %v2401_v62 = vld [vmem:[%s4760_s0 + $0x1ad] sm:$0x40]   ;;  %v1358_v10 = vsel %vm102_vm3, %v2390_v60, %v1354_v3  ;;  %1301 = vrot.lane.b32.xlu1 %v1300_v61, %s2575_s22  ;;  %v2331_v21 = vld [vmem:[%s4760_s0 + $0x1ed] sm:$0x80]   ;;  %v1122_v30 = vsel %vm110_vm5, %v2330_v14, %v1118_v28  ;;  %v2414_v33 = vld [vmem:[%s4760_s0 + $0x7a] sm:$0x2]  }
  0x63   :  { %v2391_v0 = vld [vmem:[%s4760_s0 + $0x14e] sm:$0x20]   ;;  %1266 = vrot.lane.b32.xlu0 %v1265_v8, %s2575_s22  ;;  %v1401_v25 = vsel %vm110_vm5, %v2401_v62, %v1397_v9  ;;  %v2415_v34 = vld [vmem:[%s4760_s0 + $0xb9] sm:$0x4]   ;;  %v1126_v36 = vsel %vm114_vm6, %v2331_v21, %v1122_v30  ;;  %v2427_v38 = vld [vmem:[%s4760_s0 + $0x13d] sm:$0x20]   ;;  %v1451_v39 = vsel %vm90_vm0, %v2414_v33, %v2413_v32 }
  0x64   :  { %v2392_v11 = vld [vmem:[%s4760_s0 + $0x18d] sm:$0x40]   ;;  %v1362_v19 = vsel %vm106_vm4, %v2391_v0, %v1358_v10  ;;  %v2416_v40 = vld [vmem:[%s4760_s0 + $0xf8] sm:$0x8]   ;;  %v2428_v43 = vld [vmem:[%s4760_s0 + $0x17c] sm:$0x40]   ;;  %v1455_v44 = vsel %vm94_vm1, %v2415_v34, %v1451_v39  ;;  %v1502_v52 = vsel %vm106_vm4, %v2427_v38, %v1498_v37 }
  0x65   :  { %v2402_v26 = vld [vmem:[%s4760_s0 + $0x1ec] sm:$0x80]   ;;  %v1366_v35 = vsel %vm110_vm5, %v2392_v11, %v1362_v19  ;;  %v2417_v41 = vld [vmem:[%s4760_s0 + $0x137] sm:$0x10]   ;;  %v2351_v46 = vld [vmem:[%s4760_s0 + $0x3] sm:$0x1]   ;;  %v1459_v47 = vsel %vm98_vm2, %v2416_v40, %v1455_v44  ;;  %v1506_v5 = vsel %vm110_vm5, %v2428_v43, %v1502_v52 }
  0x66   :  { %v2393_v27 = vld [vmem:[%s4760_s0 + $0x1cc] sm:$0x80]   ;;  %v1405_v42 = vsel %vm114_vm6, %v2402_v26, %v1401_v25  ;;  %1127 = vrot.lane.b32.xlu2 %v1126_v36, %s2574_s15  ;;  %v2418_v45 = vld [vmem:[%s4760_s0 + $0x176] sm:$0x20]   ;;  %v2352_v48 = vld [vmem:[%s4760_s0 + $0x42] sm:$0x2]   ;;  %v1463_v53 = vsel %vm102_vm3, %v2417_v41, %v1459_v47 }
  0x67   :  { %v2353_v49 = vld [vmem:[%s4760_s0 + $0x81] sm:$0x4]   ;;  %v1370_v51 = vsel %vm114_vm6, %v2393_v27, %v1366_v35  ;;  %v2419_v54 = vld [vmem:[%s4760_s0 + $0x1b5] sm:$0x40]   ;;  %v1207_v55 = vsel %vm90_vm0, %v2352_v48, %v2351_v46  ;;  %v2429_v58 = vld [vmem:[%s4760_s0 + $0x1bb] sm:$0x80]   ;;  %v1467_v63 = vsel %vm106_vm4, %v2418_v45, %v1463_v53 }
  0x68   :  { %v2354_v50 = vld [vmem:[%s4760_s0 + $0xc0] sm:$0x8]   ;;  %v1211_v59 = vsel %vm94_vm1, %v2353_v49, %v1207_v55  ;;  %v2448_v61 = vld [vmem:[%s4760_s0 + $0x2a] sm:$0x1]   ;;  %v2420_v6 = vld [vmem:[%s4760_s0 + $0x1f4] sm:$0x80]   ;;  %v1471_v15 = vsel %vm110_vm5, %v2419_v54, %v1467_v63  ;;  %v1510_v22 = vsel %vm114_vm6, %v2429_v58, %v1506_v5 }
  0x69   :  { %v2355_v56 = vld [vmem:[%s4760_s0 + $0xff] sm:$0x10]   ;;  %v2449_v62 = vld [vmem:[%s4760_s0 + $0x69] sm:$0x2]   ;;  %v1215_v0 = vsel %vm98_vm2, %v2354_v50, %v1211_v59  ;;  %v2377_v27 = vld [vmem:[%s4760_s0 + $0x2b] sm:$0x1]   ;;  %v1475_v32 = vsel %vm114_vm6, %v2420_v6, %v1471_v15 }
  0x6a   :  { %v2356_v57 = vld [vmem:[%s4760_s0 + $0x13e] sm:$0x20]   ;;  %1406 = vrot.lane.b32.xlu1 %v1405_v42, %s2575_s22  ;;  %v1590_v1 = vsel %vm90_vm0, %v2449_v62, %v2448_v61  ;;  %v2450_v2 = vld [vmem:[%s4760_s0 + $0xa8] sm:$0x4]   ;;  %v1219_v7 = vsel %vm102_vm3, %v2355_v56, %v1215_v0  ;;  %v2378_v29 = vld [vmem:[%s4760_s0 + $0x6a] sm:$0x2]  }
  0x6b   :  { %v2357_v60 = vld [vmem:[%s4760_s0 + $0x17d] sm:$0x40]   ;;  %v2451_v3 = vld [vmem:[%s4760_s0 + $0xe7] sm:$0x8]   ;;  %1371 = vrot.lane.b32.xlu0 %v1370_v51, %s2575_s22  ;;  %v1594_v9 = vsel %vm94_vm1, %v2450_v2, %v1590_v1  ;;  %v1223_v10 = vsel %vm106_vm4, %v2356_v57, %v1219_v7  ;;  %v2379_v30 = vld [vmem:[%s4760_s0 + $0xa9] sm:$0x4]   ;;  %v1311_v36 = vsel %vm90_vm0, %v2378_v29, %v2377_v27 }
  0x6c   :  { %v2452_v4 = vld [vmem:[%s4760_s0 + $0x126] sm:$0x10]   ;;  %v2358_v8 = vld [vmem:[%s4760_s0 + $0x1bc] sm:$0x80]   ;;  %v1598_v11 = vsel %vm98_vm2, %v2451_v3, %v1594_v9  ;;  %v1227_v16 = vsel %vm110_vm5, %v2357_v60, %v1223_v10  ;;  %v2380_v31 = vld [vmem:[%s4760_s0 + $0xe8] sm:$0x8]   ;;  %v1315_v39 = vsel %vm94_vm1, %v2379_v30, %v1311_v36 }
  0x6d   :  { %v2439_v12 = vld [vmem:[%s4760_s0 + $0xa] sm:$0x1]   ;;  %v1602_v17 = vsel %vm102_vm3, %v2452_v4, %v1598_v11  ;;  %v1231_v23 = vsel %vm114_vm6, %v2358_v8, %v1227_v16  ;;  %v2381_v37 = vld [vmem:[%s4760_s0 + $0x127] sm:$0x10]   ;;  %s2576_s4 = smov 32   ;;  %v1319_v44 = vsel %vm98_vm2, %v2380_v31, %v1315_v39  ;;  %vm4_vm7 = vcmask 1047556  }
  0x6e   :  { %v2440_v13 = vld [vmem:[%s4760_s0 + $0x49] sm:$0x2]   ;;  %1232 = vrot.lane.b32.xlu2 %v1231_v23, %s2575_s22  ;;  %v2382_v38 = vld [vmem:[%s4760_s0 + $0x166] sm:$0x20]   ;;  %v2475_v41 = vld [vmem:[%s4760_s0 + $0x1a] sm:$0x1]   ;;  %v1323_v52 = vsel %vm102_vm3, %v2381_v37, %v1319_v44 }
  0x6f   :  { %v2441_v14 = vld [vmem:[%s4760_s0 + $0x88] sm:$0x4]   ;;  %v1555_v19 = vsel %vm90_vm0, %v2440_v13, %v2439_v12  ;;  %v2383_v40 = vld [vmem:[%s4760_s0 + $0x1a5] sm:$0x40]   ;;  %v2476_v42 = vld [vmem:[%s4760_s0 + $0x59] sm:$0x2]   ;;  %v1327_v55 = vsel %vm106_vm4, %v2382_v38, %v1323_v52 }
  0x70   :  { %v2453_v18 = vld [vmem:[%s4760_s0 + $0x165] sm:$0x20]   ;;  %v1559_v25 = vsel %vm94_vm1, %v2441_v14, %v1555_v19  ;;  %v1695_v45 = vsel %vm90_vm0, %v2476_v42, %v2475_v41  ;;  %v2477_v46 = vld [vmem:[%s4760_s0 + $0x98] sm:$0x4]   ;;  %v2384_v53 = vld [vmem:[%s4760_s0 + $0x1e4] sm:$0x80]   ;;  %v1331_v61 = vsel %vm110_vm5, %v2383_v40, %v1327_v55 }
  0x71   :  { %v2442_v20 = vld [vmem:[%s4760_s0 + $0xc7] sm:$0x8]   ;;  %v1606_v33 = vsel %vm106_vm4, %v2453_v18, %v1602_v17  ;;  %v2478_v47 = vld [vmem:[%s4760_s0 + $0xd7] sm:$0x8]   ;;  %v1699_v54 = vsel %vm94_vm1, %v2477_v46, %v1695_v45  ;;  %v2466_v57 = vld [vmem:[%s4760_s0 + $0x32] sm:$0x1]   ;;  %v1335_v4 = vsel %vm114_vm6, %v2384_v53, %v1331_v61 }
  0x72   :  { %v2443_v21 = vld [vmem:[%s4760_s0 + $0x106] sm:$0x10]   ;;  %v1563_v28 = vsel %vm98_vm2, %v2442_v20, %v1559_v25  ;;  %1511 = vrot.lane.b32.xlu1 %v1510_v22, %s2576_s4  ;;  %v2479_v48 = vld [vmem:[%s4760_s0 + $0x116] sm:$0x10]   ;;  %v1703_v56 = vsel %vm98_vm2, %v2478_v47, %v1699_v54  ;;  %v2467_v58 = vld [vmem:[%s4760_s0 + $0x71] sm:$0x2]  }
  0x73   :  { %v2454_v24 = vld [vmem:[%s4760_s0 + $0x1a4] sm:$0x40]   ;;  %v1567_v34 = vsel %vm102_vm3, %v2443_v21, %v1563_v28  ;;  %1476 = vrot.lane.b32.xlu0 %v1475_v32, %s2575_s22  ;;  %v2468_v59 = vld [vmem:[%s4760_s0 + $0xb0] sm:$0x4]   ;;  %v1707_v62 = vsel %vm102_vm3, %v2479_v48, %v1703_v56  ;;  %v2480_v63 = vld [vmem:[%s4760_s0 + $0x155] sm:$0x20]   ;;  %v1660_v0 = vsel %vm90_vm0, %v2467_v58, %v2466_v57 }
  0x74   :  { %v2444_v26 = vld [vmem:[%s4760_s0 + $0x145] sm:$0x20]   ;;  %v1610_v49 = vsel %vm110_vm5, %v2454_v24, %v1606_v33  ;;  %v2469_v1 = vld [vmem:[%s4760_s0 + $0xef] sm:$0x8]   ;;  %v2481_v5 = vld [vmem:[%s4760_s0 + $0x194] sm:$0x40]   ;;  %v1664_v6 = vsel %vm94_vm1, %v2468_v59, %v1660_v0  ;;  %v1711_v14 = vsel %vm106_vm4, %v2480_v63, %v1707_v62 }
  0x75   :  { %v2445_v35 = vld [vmem:[%s4760_s0 + $0x184] sm:$0x40]   ;;  %v1571_v43 = vsel %vm106_vm4, %v2444_v26, %v1567_v34  ;;  %v2470_v2 = vld [vmem:[%s4760_s0 + $0x12e] sm:$0x10]   ;;  %v2404_v8 = vld [vmem:[%s4760_s0 + $0x1b] sm:$0x1]   ;;  %v1668_v9 = vsel %vm98_vm2, %v2469_v1, %v1664_v6  ;;  %v1715_v32 = vsel %vm110_vm5, %v2481_v5, %v1711_v14 }
  0x76   :  { %v2455_v50 = vld [vmem:[%s4760_s0 + $0x1e3] sm:$0x80]   ;;  %v1575_v60 = vsel %vm110_vm5, %v2445_v35, %v1571_v43  ;;  %v2471_v7 = vld [vmem:[%s4760_s0 + $0x16d] sm:$0x20]   ;;  %1336 = vrot.lane.b32.xlu2 %v1335_v4, %s2575_s22  ;;  %v2405_v10 = vld [vmem:[%s4760_s0 + $0x5a] sm:$0x2]   ;;  %v1672_v15 = vsel %vm102_vm3, %v2470_v2, %v1668_v9 }
  0x77   :  { %v2446_v51 = vld [vmem:[%s4760_s0 + $0x1c3] sm:$0x80]   ;;  %v1614_v3 = vsel %vm114_vm6, %v2455_v50, %v1610_v49  ;;  %v2406_v11 = vld [vmem:[%s4760_s0 + $0x99] sm:$0x4]   ;;  %v2472_v16 = vld [vmem:[%s4760_s0 + $0x1ac] sm:$0x40]   ;;  %v3993_v17 = vpop.permute.xlu2 %255   ;;  %v1416_v18 = vsel %vm90_vm0, %v2405_v10, %v2404_v8  ;;  %v1676_v25 = vsel %vm106_vm4, %v2471_v7, %v1672_v15 }
  0x78   :  { %v2407_v12 = vld [vmem:[%s4760_s0 + $0xd8] sm:$0x8]   ;;  %v1579_v13 = vsel %vm114_vm6, %v2446_v51, %v1575_v60  ;;  %v1420_v21 = vsel %vm94_vm1, %v2406_v11, %v1416_v18  ;;  %v2501_v23 = vld [vmem:[%s4760_s0 + $0x21] sm:$0x1]   ;;  %v2482_v33 = vld [vmem:[%s4760_s0 + $0x1d3] sm:$0x80]   ;;  %v1680_v44 = vsel %vm110_vm5, %v2472_v16, %v1676_v25 }
  0x79   :  { %v2408_v19 = vld [vmem:[%s4760_s0 + $0x117] sm:$0x10]   ;;  %v2502_v24 = vld [vmem:[%s4760_s0 + $0x60] sm:$0x2]   ;;  %v1424_v26 = vsel %vm98_vm2, %v2407_v12, %v1420_v21  ;;  %v2473_v34 = vld [vmem:[%s4760_s0 + $0x1eb] sm:$0x80]   ;;  %v1719_v51 = vsel %vm114_vm6, %v2482_v33, %v1715_v32 }
  0x7a   :  { %v2409_v20 = vld [vmem:[%s4760_s0 + $0x156] sm:$0x20]   ;;  %1615 = vrot.lane.b32.xlu1 %v1614_v3, %s2576_s4  ;;  %v1799_v27 = vsel %vm90_vm0, %v2502_v24, %v2501_v23  ;;  %v2503_v28 = vld [vmem:[%s4760_s0 + $0x9f] sm:$0x4]   ;;  %v1428_v35 = vsel %vm102_vm3, %v2408_v19, %v1424_v26  ;;  %v2430_v56 = vld [vmem:[%s4760_s0 + $0x22] sm:$0x1]   ;;  %v1684_v61 = vsel %vm114_vm6, %v2473_v34, %v1680_v44 }
  0x7b   :  { %v2410_v22 = vld [vmem:[%s4760_s0 + $0x195] sm:$0x40]   ;;  %v2504_v29 = vld [vmem:[%s4760_s0 + $0xde] sm:$0x8]   ;;  %1580 = vrot.lane.b32.xlu0 %v1579_v13, %s2576_s4  ;;  %v1803_v37 = vsel %vm94_vm1, %v2503_v28, %v1799_v27  ;;  %v1432_v38 = vsel %vm106_vm4, %v2409_v20, %v1428_v35  ;;  %v2431_v58 = vld [vmem:[%s4760_s0 + $0x61] sm:$0x2]  }
  0x7c   :  { %v2505_v30 = vld [vmem:[%s4760_s0 + $0x11d] sm:$0x10]   ;;  %v4026_v31 = vpop.permute.xlu1 %185   ;;  %v2411_v36 = vld [vmem:[%s4760_s0 + $0x1d4] sm:$0x80]   ;;  %v1807_v39 = vsel %vm98_vm2, %v2504_v29, %v1803_v37  ;;  %v1436_v45 = vsel %vm110_vm5, %v2410_v22, %v1432_v38  ;;  %v2432_v59 = vld [vmem:[%s4760_s0 + $0xa0] sm:$0x4]   ;;  %v1520_v2 = vsel %vm90_vm0, %v2431_v58, %v2430_v56 }
  0x7d   :  { %v2493_v40 = vld [vmem:[%s4760_s0 + $0x1] sm:$0x1]   ;;  %v4051_v43 = vpop.permute.xlu0 %116   ;;  %v1811_v46 = vsel %vm102_vm3, %v2505_v30, %v1807_v39  ;;  %v1440_v52 = vsel %vm114_vm6, %v2411_v36, %v1436_v45  ;;  %v2433_v60 = vld [vmem:[%s4760_s0 + $0xdf] sm:$0x8]   ;;  %v1524_v5 = vsel %vm94_vm1, %v2432_v59, %v1520_v2  ;;  %v2528_v7 = vld [vmem:[%s4760_s0 + $0x11] sm:$0x1]  }
  0x7e   :  { %v2494_v41 = vld [vmem:[%s4760_s0 + $0x40] sm:$0x2]   ;;  %1441 = vrot.lane.b32.xlu2 %v1440_v52, %s2575_s22  ;;  %v2434_v3 = vld [vmem:[%s4760_s0 + $0x11e] sm:$0x10]   ;;  %v2529_v8 = vld [vmem:[%s4760_s0 + $0x50] sm:$0x2]   ;;  %v1528_v10 = vsel %vm98_vm2, %v2433_v60, %v1524_v5 }
  0x7f   :  { %v2495_v42 = vld [vmem:[%s4760_s0 + $0x7f] sm:$0x4]   ;;  %v1765_v48 = vsel %vm90_vm0, %v2494_v41, %v2493_v40  ;;  %v4095_v1 = vpop.permute.xlu2 %290   ;;  %v2435_v4 = vld [vmem:[%s4760_s0 + $0x15d] sm:$0x20]   ;;  %v1904_v11 = vsel %vm90_vm0, %v2529_v8, %v2528_v7  ;;  %v2530_v12 = vld [vmem:[%s4760_s0 + $0x8f] sm:$0x4]   ;;  %v1532_v20 = vsel %vm102_vm3, %v2434_v3, %v1528_v10 }
  0x80   :  { %v2506_v47 = vld [vmem:[%s4760_s0 + $0x15c] sm:$0x20]   ;;  %v1769_v54 = vsel %vm94_vm1, %v2495_v42, %v1765_v48  ;;  %v2436_v6 = vld [vmem:[%s4760_s0 + $0x19c] sm:$0x40]   ;;  %v2531_v13 = vld [vmem:[%s4760_s0 + $0xce] sm:$0x8]   ;;  %v1908_v22 = vsel %vm94_vm1, %v2530_v12, %v1904_v11  ;;  %v1536_v23 = vsel %vm106_vm4, %v2435_v4, %v1532_v20 }
  0x81   :  { %v2496_v49 = vld [vmem:[%s4760_s0 + $0xbe] sm:$0x8]   ;;  %v1815_v62 = vsel %vm106_vm4, %v2506_v47, %v1811_v46  ;;  %v2532_v14 = vld [vmem:[%s4760_s0 + $0x10d] sm:$0x10]   ;;  %v2437_v21 = vld [vmem:[%s4760_s0 + $0x1db] sm:$0x80]   ;;  %v1912_v24 = vsel %vm98_vm2, %v2531_v13, %v1908_v22  ;;  %v1540_v30 = vsel %vm110_vm5, %v2436_v6, %v1536_v23 }
  0x82   :  { %v2497_v50 = vld [vmem:[%s4760_s0 + $0xfd] sm:$0x10]   ;;  %v1773_v57 = vsel %vm98_vm2, %v2496_v49, %v1769_v54  ;;  %1720 = vrot.lane.b32.xlu1 %v1719_v51, %s2576_s4  ;;  %v2519_v25 = vld [vmem:[%s4760_s0 + $0x29] sm:$0x1]   ;;  %v1916_v32 = vsel %vm102_vm3, %v2532_v14, %v1912_v24  ;;  %v2533_v33 = vld [vmem:[%s4760_s0 + $0x14c] sm:$0x20]   ;;  %v1544_v38 = vsel %vm114_vm6, %v2437_v21, %v1540_v30 }
  0x83   :  { %v2507_v53 = vld [vmem:[%s4760_s0 + $0x19b] sm:$0x40]   ;;  %v1777_v63 = vsel %vm102_vm3, %v2497_v50, %v1773_v57  ;;  %1685 = vrot.lane.b32.xlu0 %v1684_v61, %s2576_s4  ;;  %v2520_v26 = vld [vmem:[%s4760_s0 + $0x68] sm:$0x2]   ;;  %v2534_v39 = vld [vmem:[%s4760_s0 + $0x18b] sm:$0x40]   ;;  %v1920_v46 = vsel %vm106_vm4, %v2533_v33, %v1916_v32 }
  0x84   :  { %v2498_v55 = vld [vmem:[%s4760_s0 + $0x13c] sm:$0x20]   ;;  %v4128_v15 = vpop.permute.xlu1 %220   ;;  %v1819_v16 = vsel %vm110_vm5, %v2507_v53, %v1815_v62  ;;  %v2521_v27 = vld [vmem:[%s4760_s0 + $0xa7] sm:$0x4]   ;;  %v1869_v34 = vsel %vm90_vm0, %v2520_v26, %v2519_v25  ;;  %vm6_vm8 = vcmask 130048   ;;  %s2577_s3 = smov 16   ;;  %v1924_v59 = vsel %vm110_vm5, %v2534_v39, %v1920_v46 }
  0x85   :  { %v2499_v0 = vld [vmem:[%s4760_s0 + $0x17b] sm:$0x40]   ;;  %v1781_v9 = vsel %vm106_vm4, %v2498_v55, %v1777_v63  ;;  %v4153_v28 = vpop.permute.xlu0 %150   ;;  %v2522_v35 = vld [vmem:[%s4760_s0 + $0xe6] sm:$0x8]   ;;  %v1873_v40 = vsel %vm94_vm1, %v2521_v27, %v1869_v34  ;;  %v2535_v51 = vld [vmem:[%s4760_s0 + $0x1ca] sm:$0x80]  }
  0x86   :  { %v2508_v18 = vld [vmem:[%s4760_s0 + $0x1da] sm:$0x80]   ;;  %v1785_v29 = vsel %vm110_vm5, %v2499_v0, %v1781_v9  ;;  %v2523_v36 = vld [vmem:[%s4760_s0 + $0x125] sm:$0x10]   ;;  %1545 = vrot.lane.b32.xlu2 %v1544_v38, %s2576_s4  ;;  %v1877_v41 = vsel %vm98_vm2, %v2522_v35, %v1873_v40  ;;  %vm118_vm9 = vcmask 1048448   ;;  %v1928_v6 = vsel %vm114_vm6, %v2535_v51, %v1924_v59 }
  0x87   :  { %v2500_v19 = vld [vmem:[%s4760_s0 + $0x1ba] sm:$0x80]   ;;  %v1823_v37 = vsel %vm114_vm6, %v2508_v18, %v1819_v16  ;;  %v2524_v42 = vld [vmem:[%s4760_s0 + $0x164] sm:$0x20]   ;;  %v1881_v47 = vsel %vm102_vm3, %v2523_v36, %v1877_v41  ;;  %v2457_v11 = vld [vmem:[%s4760_s0 + $0x12] sm:$0x1]  }
  0x88   :  { %v2_v44 = vld [vmem:[%s4760_s0] ss:$8 sm:$0xf]   ;;  %v1789_v45 = vsel %vm114_vm6, %v2500_v19, %v1785_v29  ;;  %v2525_v48 = vld [vmem:[%s4760_s0 + $0x1a3] sm:$0x40]   ;;  %v396_v49 = vpop.permute.xlu2 %395   ;;  %v1885_v55 = vsel %vm106_vm4, %v2524_v42, %v1881_v47  ;;  %vm397_vm10 = vcmask 917248  }
  0x89   :  { %v3_v50 = vld [vmem:[%s4760_s0] ss:$8 sm:$0xf0]   ;;  %v2526_v60 = vld [vmem:[%s4760_s0 + $0x1e2] sm:$0x80]   ;;  %v1889_v3 = vsel %vm110_vm5, %v2525_v48, %v1885_v55  ;;  %vm676_vm11 = vcmask 786048  }
  0x8a   :  { %1824 = vrot.lane.b32.xlu1 %v1823_v37, %s2577_s3  ;;  %v5_v52 = vsel %vm4_vm7, %v3_v50, %v2_v44  ;;  %v2039_v53 = vld [vmem:[%s4760_s0 + $0x40] ss:$8 sm:$0xf]   ;;  %v1893_v12 = vsel %vm114_vm6, %v2526_v60, %v1889_v3  ;;  %v2458_v24 = vld [vmem:[%s4760_s0 + $0x51] sm:$0x2]   ;;  %vm955_vm12 = vcmask 654848  }
  0x8b   :  { %v2040_v54 = vld [vmem:[%s4760_s0 + $0x40] ss:$8 sm:$0xf0]   ;;  %7 = vst.msk [vmem:[%s4761_s1] ss:$8 sm:$0xf] %vm6_vm8, %v5_v52   ;;  %1790 = vrot.lane.b32.xlu0 %v1789_v45, %s2577_s3  ;;  %v1625_v25 = vsel %vm90_vm0, %v2458_v24, %v2457_v11 }
  0x8c   :  { %v14_v56 = vsel %vm4_vm7, %v2040_v54, %v2039_v53  ;;  %v2043_v57 = vld [vmem:[%s4760_s0 + $0x80] ss:$8 sm:$0xf]   ;;  %v4212_v58 = vpop.permute.xlu1 %360   ;;  %v2459_v26 = vld [vmem:[%s4760_s0 + $0x90] sm:$0x4]   ;;  %vm1234_vm13 = vcmask 523648  }
  0x8d   :  { %2041 = vst.msk [vmem:[%s4761_s1 + $0x1] ss:$8 sm:$0xf] %vm6_vm8, %v14_v56   ;;  %v2044_v61 = vld [vmem:[%s4760_s0 + $0x80] ss:$8 sm:$0xf0]   ;;  %v4232_v2 = vpop.permute.xlu0 %325   ;;  %v1629_v27 = vsel %vm94_vm1, %v2459_v26, %v1625_v25 }
  0x8e   :  { %v25_v62 = vsel %vm4_vm7, %v2044_v61, %v2043_v57  ;;  %v2047_v63 = vld [vmem:[%s4760_s0 + $0xc0] ss:$8 sm:$0xf]   ;;  %v2460_v29 = vld [vmem:[%s4760_s0 + $0xcf] sm:$0x8]   ;;  %vm1513_vm14 = vcmask 392448  }
  0x8f   :  { %v2048_v0 = vld [vmem:[%s4760_s0 + $0xc0] ss:$8 sm:$0xf0]   ;;  %2045 = vst.msk [vmem:[%s4761_s1 + $0x2] ss:$8 sm:$0xf] %vm6_vm8, %v25_v62   ;;  %v1633_v32 = vsel %vm98_vm2, %v2460_v29, %v1629_v27 }
  0x90   :  { %v36_v4 = vsel %vm4_vm7, %v2048_v0, %v2047_v63  ;;  %v2051_v5 = vld [vmem:[%s4760_s0 + $0x100] ss:$8 sm:$0xf]   ;;  %v4270_v16 = vpop.permute.xlu2 %499   ;;  %v2461_v30 = vld [vmem:[%s4760_s0 + $0x10e] sm:$0x10]   ;;  %vm1792_vm15 = vcmask 261248  }
  0x91   :  { %2049 = vst.msk [vmem:[%s4761_s1 + $0x3] ss:$8 sm:$0xf] %vm6_vm8, %v36_v4   ;;  %v2052_v7 = vld [vmem:[%s4760_s0 + $0x100] ss:$8 sm:$0xf0]   ;;  %v1637_v35 = vsel %vm102_vm3, %v2461_v30, %v1633_v32 }
  0x92   :  { %v47_v8 = vsel %vm4_vm7, %v2052_v7, %v2051_v5  ;;  %v2055_v9 = vld [vmem:[%s4760_s0 + $0x140] ss:$8 sm:$0xf]   ;;  %1929 = vrot.lane.b32.xlu1 %v1928_v6, %s2577_s3  ;;  %v2462_v33 = vld [vmem:[%s4760_s0 + $0x14d] sm:$0x20]  }
  0x93   :  { %v2056_v10 = vld [vmem:[%s4760_s0 + $0x140] ss:$8 sm:$0xf0]   ;;  %2053 = vst.msk [vmem:[%s4761_s1 + $0x4] ss:$8 sm:$0xf] %vm6_vm8, %v47_v8   ;;  %1894 = vrot.lane.b32.xlu0 %v1893_v12, %s2577_s3  ;;  %v1641_v37 = vsel %vm106_vm4, %v2462_v33, %v1637_v35 }
  0x94   :  { %v58_v13 = vsel %vm4_vm7, %v2056_v10, %v2055_v9  ;;  %v2059_v14 = vld [vmem:[%s4760_s0 + $0x180] ss:$8 sm:$0xf]   ;;  %v465_v23 = vpop.permute.xlu1 %464   ;;  %v2463_v34 = vld [vmem:[%s4760_s0 + $0x18c] sm:$0x40]  }
  0x95   :  { %2057 = vst.msk [vmem:[%s4761_s1 + $0x5] ss:$8 sm:$0xf] %vm6_vm8, %v58_v13   ;;  %v2060_v18 = vld [vmem:[%s4760_s0 + $0x180] ss:$8 sm:$0xf0]   ;;  %v1645_v40 = vsel %vm110_vm5, %v2463_v34, %v1641_v37 }
  0x96   :  { %v69_v19 = vsel %vm4_vm7, %v2060_v18, %v2059_v14  ;;  %v2063_v20 = vld [vmem:[%s4760_s0 + $0x1c0] ss:$8 sm:$0xf]   ;;  %8 = vst.msk [vmem:[%s4761_s1] ss:$8 sm:$0xf0] %vm6_vm8, %v5_v52  }
  0x97   :  { %v2064_v21 = vld [vmem:[%s4760_s0 + $0x1c0] ss:$8 sm:$0xf0]   ;;  %2061 = vst.msk [vmem:[%s4761_s1 + $0x6] ss:$8 sm:$0xf] %vm6_vm8, %v69_v19  }
  0x98   :  { %v80_v22 = vsel %vm4_vm7, %v2064_v21, %v2063_v20  ;;  %v2464_v36 = vld [vmem:[%s4760_s0 + $0x1cb] sm:$0x80]   ;;  %2042 = vst.msk [vmem:[%s4761_s1 + $0x1] ss:$8 sm:$0xf0] %vm6_vm8, %v14_v56   ;;  %v4345_v39 = vpop.permute.xlu2 %604  }
  0x99   :  { %2065 = vst.msk [vmem:[%s4761_s1 + $0x7] ss:$8 sm:$0xf] %vm6_vm8, %v80_v22   ;;  %v2555_v38 = vld [vmem:[%s4760_s0 + $0x39] sm:$0x1]   ;;  %v1649_v42 = vsel %vm114_vm6, %v2464_v36, %v1645_v40 }
  0x9a   :  { %119 = vst.msk [vmem:[%s4761_s1] sm:$0xff] %vm118_vm9, %v4051_v43   ;;  %v4309_v43 = vpop.permute.xlu0 %429   ;;  %v2556_v41 = vld [vmem:[%s4760_s0 + $0x78] sm:$0x2]   ;;  %1650 = vrot.lane.b32.xlu2 %v1649_v42, %s2576_s4  ;;  %v2484_v6 = vld [vmem:[%s4760_s0 + $0x3a] sm:$0x1]  }
  0x9b   :  { %398 = vst.msk [vmem:[%s4761_s1] sm:$0xff] %vm397_vm10, %v396_v49   ;;  %v2009_v44 = vsel %vm90_vm0, %v2556_v41, %v2555_v38  ;;  %v2557_v45 = vld [vmem:[%s4760_s0 + $0xb7] sm:$0x4]   ;;  %v2486_v9 = vld [vmem:[%s4760_s0 + $0xb8] sm:$0x4]  }
  0x9c   :  { %2046 = vst.msk [vmem:[%s4761_s1 + $0x2] ss:$8 sm:$0xf0] %vm6_vm8, %v25_v62   ;;  %v2013_v46 = vsel %vm94_vm1, %v2557_v45, %v2009_v44  ;;  %v2558_v47 = vld [vmem:[%s4760_s0 + $0xf6] sm:$0x8]   ;;  %v570_v48 = vpop.permute.xlu1 %569  }
  0x9d   :  { %2050 = vst.msk [vmem:[%s4761_s1 + $0x3] ss:$8 sm:$0xf0] %vm6_vm8, %v36_v4   ;;  %v2017_v49 = vsel %vm98_vm2, %v2558_v47, %v2013_v46  ;;  %v2559_v50 = vld [vmem:[%s4760_s0 + $0x135] sm:$0x10]  }
  0x9e   :  { %2054 = vst.msk [vmem:[%s4761_s1 + $0x4] ss:$8 sm:$0xf0] %vm6_vm8, %v47_v8   ;;  %v2021_v51 = vsel %vm102_vm3, %v2559_v50, %v2017_v49  ;;  %v2560_v52 = vld [vmem:[%s4760_s0 + $0x174] sm:$0x20]  }
  0x9f   :  { %2058 = vst.msk [vmem:[%s4761_s1 + $0x5] ss:$8 sm:$0xf0] %vm6_vm8, %v58_v13   ;;  %v2025_v54 = vsel %vm106_vm4, %v2560_v52, %v2021_v51  ;;  %v2561_v55 = vld [vmem:[%s4760_s0 + $0x1b3] sm:$0x40]  }
  0xa0   :  { %2062 = vst.msk [vmem:[%s4761_s1 + $0x6] ss:$8 sm:$0xf0] %vm6_vm8, %v69_v19   ;;  %v2562_v56 = vld [vmem:[%s4760_s0 + $0x1f2] sm:$0x80]   ;;  %v4421_v61 = vpop.permute.xlu2 %708  }
  0xa1   :  { %2066 = vst.msk [vmem:[%s4761_s1 + $0x7] ss:$8 sm:$0xf0] %vm6_vm8, %v80_v22   ;;  %v2546_v57 = vld [vmem:[%s4760_s0 + $0x19] sm:$0x1]  }
  0xa2   :  { %v535_v53 = vpop.permute.xlu0 %534   ;;  %2092 = vst.msk [vmem:[%s4761_s1 + $0x8] sm:$0xff] %vm118_vm9, %v4026_v31   ;;  %v2029_v31 = vsel %vm110_vm5, %v2561_v55, %v2025_v54  ;;  %v2547_v59 = vld [vmem:[%s4760_s0 + $0x58] sm:$0x2]   ;;  %v2485_v8 = vld [vmem:[%s4760_s0 + $0x79] sm:$0x2]  }
  0xa3   :  { %2110 = vst.msk [vmem:[%s4761_s1 + $0x10] sm:$0xff] %vm118_vm9, %v3993_v17   ;;  %v2033_v17 = vsel %vm114_vm6, %v2562_v56, %v2029_v31  ;;  %v2548_v60 = vld [vmem:[%s4760_s0 + $0x97] sm:$0x4]   ;;  %v1974_v62 = vsel %vm90_vm0, %v2547_v59, %v2546_v57  ;;  %v1730_v10 = vsel %vm90_vm0, %v2485_v8, %v2484_v6  ;;  %v2487_v11 = vld [vmem:[%s4760_s0 + $0xf7] sm:$0x8]  }
  0xa4   :  { %2128 = vst.msk [vmem:[%s4761_s1 + $0x18] sm:$0xff] %vm118_vm9, %v4232_v2   ;;  %2034 = vrot.lane.b32.xlu1 %v2033_v17, %s2577_s3  ;;  %v2549_v63 = vld [vmem:[%s4760_s0 + $0xd6] sm:$0x8]   ;;  %v1978_v2 = vsel %vm94_vm1, %v2548_v60, %v1974_v62  ;;  %v675_v7 = vpop.permute.xlu1 %674   ;;  %v2488_v12 = vld [vmem:[%s4760_s0 + $0x136] sm:$0x10]   ;;  %v1734_v14 = vsel %vm94_vm1, %v2486_v9, %v1730_v10 }
  0xa5   :  { %v2550_v0 = vld [vmem:[%s4760_s0 + $0x115] sm:$0x10]   ;;  %2163 = vst.msk [vmem:[%s4761_s1 + $0x8] sm:$0xff] %vm397_vm10, %v465_v23   ;;  %v2489_v18 = vld [vmem:[%s4760_s0 + $0x175] sm:$0x20]   ;;  %v1738_v21 = vsel %vm98_vm2, %v2487_v11, %v1734_v14 }
  0xa6   :  { %v2551_v3 = vld [vmem:[%s4760_s0 + $0x154] sm:$0x20]   ;;  %2083 = vst.msk [vmem:[%s4761_s1 + $0x20] sm:$0xff] %vm118_vm9, %v4153_v28   ;;  %v1982_v28 = vsel %vm98_vm2, %v2549_v63, %v1978_v2  ;;  %v2490_v19 = vld [vmem:[%s4760_s0 + $0x1b4] sm:$0x40]  }
  0xa7   :  { %v2552_v4 = vld [vmem:[%s4760_s0 + $0x193] sm:$0x40]   ;;  %2101 = vst.msk [vmem:[%s4761_s1 + $0x28] sm:$0xff] %vm118_vm9, %v4128_v15   ;;  %v1986_v15 = vsel %vm102_vm3, %v2550_v0, %v1982_v28  ;;  %v2491_v22 = vld [vmem:[%s4760_s0 + $0x1f3] sm:$0x80]  }
  0xa8   :  { %v2553_v5 = vld [vmem:[%s4760_s0 + $0x1d2] sm:$0x80]   ;;  %2119 = vst.msk [vmem:[%s4761_s1 + $0x30] sm:$0xff] %vm118_vm9, %v4095_v1   ;;  %v1990_v1 = vsel %vm106_vm4, %v2551_v3, %v1986_v15  ;;  %v2510_v23 = vld [vmem:[%s4760_s0 + $0x9] sm:$0x1]   ;;  %v814_v26 = vpop.permute.xlu2 %813  }
  0xa9   :  { %2137 = vst.msk [vmem:[%s4761_s1 + $0x38] sm:$0xff] %vm118_vm9, %v4212_v58   ;;  %v1994_v58 = vsel %vm110_vm5, %v2552_v4, %v1990_v1  ;;  %v2511_v24 = vld [vmem:[%s4760_s0 + $0x48] sm:$0x2]   ;;  %v2538_v41 = vld [vmem:[%s4760_s0 + $0x70] sm:$0x2]  }
  0xaa   :  { %v640_v13 = vpop.permute.xlu0 %639   ;;  %2154 = vst.msk [vmem:[%s4761_s1 + $0x20] sm:$0xff] %vm397_vm10, %v4309_v43   ;;  %v1998_v20 = vsel %vm114_vm6, %v2553_v5, %v1994_v58  ;;  %v2512_v25 = vld [vmem:[%s4760_s0 + $0x87] sm:$0x4]   ;;  %v1834_v27 = vsel %vm90_vm0, %v2511_v24, %v2510_v23  ;;  %v2539_v42 = vld [vmem:[%s4760_s0 + $0xaf] sm:$0x4]  }
  0xab   :  { %1999 = vrot.lane.b32.xlu0 %v1998_v20, %s2577_s3  ;;  %2172 = vst.msk [vmem:[%s4761_s1 + $0x28] sm:$0xff] %vm397_vm10, %v4270_v16   ;;  %v1742_v16 = vsel %vm102_vm3, %v2488_v12, %v1738_v21  ;;  %v2513_v29 = vld [vmem:[%s4760_s0 + $0xc6] sm:$0x8]   ;;  %v1838_v33 = vsel %vm94_vm1, %v2512_v25, %v1834_v27  ;;  %v2540_v47 = vld [vmem:[%s4760_s0 + $0xee] sm:$0x8]  }
  0xac   :  { %2190 = vst.msk [vmem:[%s4761_s1 + $0x30] sm:$0xff] %vm397_vm10, %v570_v48   ;;  %v1746_v43 = vsel %vm106_vm4, %v2489_v18, %v1742_v16  ;;  %v2514_v30 = vld [vmem:[%s4760_s0 + $0x105] sm:$0x10]   ;;  %v1842_v36 = vsel %vm98_vm2, %v2513_v29, %v1838_v33  ;;  %v779_v38 = vpop.permute.xlu1 %778   ;;  %v2541_v48 = vld [vmem:[%s4760_s0 + $0x12d] sm:$0x10]  }
  0xad   :  { %2181 = vst.msk [vmem:[%s4761_s1 + $0x10] sm:$0xff] %vm397_vm10, %v535_v53   ;;  %v1750_v32 = vsel %vm110_vm5, %v2490_v19, %v1746_v43  ;;  %v2515_v34 = vld [vmem:[%s4760_s0 + $0x144] sm:$0x20]   ;;  %v1846_v40 = vsel %vm102_vm3, %v2514_v30, %v1842_v36  ;;  %v2542_v54 = vld [vmem:[%s4760_s0 + $0x16c] sm:$0x20]  }
  0xae   :  { %v1754_v35 = vsel %vm114_vm6, %v2491_v22, %v1750_v32  ;;  %2199 = vst.msk [vmem:[%s4761_s1 + $0x18] sm:$0xff] %vm397_vm10, %v4345_v39   ;;  %v2516_v37 = vld [vmem:[%s4760_s0 + $0x183] sm:$0x40]   ;;  %v2537_v39 = vld [vmem:[%s4760_s0 + $0x31] sm:$0x1]   ;;  %v1850_v44 = vsel %vm106_vm4, %v2515_v34, %v1846_v40 }
  0xaf   :  { %1755 = vrot.lane.b32.xlu2 %v1754_v35, %s2576_s4  ;;  %677 = vst.msk [vmem:[%s4761_s1] sm:$0xff] %vm676_vm11, %v675_v7   ;;  %v1939_v46 = vsel %vm90_vm0, %v2538_v41, %v2537_v39  ;;  %v1854_v49 = vsel %vm110_vm5, %v2516_v37, %v1850_v44  ;;  %v2517_v50 = vld [vmem:[%s4760_s0 + $0x1c2] sm:$0x80]   ;;  %v2543_v57 = vld [vmem:[%s4760_s0 + $0x1ab] sm:$0x40]  }
  0xb0   :  { %2208 = vst.msk [vmem:[%s4761_s1 + $0x38] sm:$0xff] %vm397_vm10, %v640_v13   ;;  %v1943_v51 = vsel %vm94_vm1, %v2539_v42, %v1939_v46  ;;  %v919_v55 = vpop.permute.xlu2 %918   ;;  %v1858_v31 = vsel %vm114_vm6, %v2517_v50, %v1854_v49 }
  0xb1   :  { %2225 = vst.msk [vmem:[%s4761_s1 + $0x20] sm:$0xff] %vm676_vm11, %v4421_v61   ;;  %v1947_v52 = vsel %vm98_vm2, %v2540_v47, %v1943_v51  ;;  %v2544_v61 = vld [vmem:[%s4760_s0 + $0x1ea] sm:$0x80]  }
  0xb2   :  { %v744_v45 = vpop.permute.xlu0 %743   ;;  %2243 = vst.msk [vmem:[%s4761_s1 + $0x28] sm:$0xff] %vm676_vm11, %v779_v38   ;;  %v1951_v53 = vsel %vm102_vm3, %v2541_v48, %v1947_v52 }
  0xb3   :  { %2234 = vst.msk [vmem:[%s4761_s1 + $0x8] sm:$0xff] %vm676_vm11, %v744_v45   ;;  %v1955_v56 = vsel %vm106_vm4, %v2542_v54, %v1951_v53 }
  0xb4   :  { %2252 = vst.msk [vmem:[%s4761_s1 + $0x10] sm:$0xff] %vm676_vm11, %v814_v26   ;;  %v884_v17 = vpop.permute.xlu1 %883   ;;  %v1959_v60 = vsel %vm110_vm5, %v2543_v57, %v1955_v56 }
  0xb5   :  { %2279 = vst.msk [vmem:[%s4761_s1 + $0x38] sm:$0xff] %vm676_vm11, %v919_v55   ;;  %v1963_v63 = vsel %vm114_vm6, %v2544_v61, %v1959_v60 }
  0xb6   :  { %2270 = vst.msk [vmem:[%s4761_s1 + $0x18] sm:$0xff] %vm676_vm11, %v884_v17  }
  0xb7   :  { %1859 = vrot.lane.b32.xlu2 %v1858_v31, %s2577_s3 }
  0xb8   :  { %v1023_v62 = vpop.permute.xlu2 %1022  }
  0xb9   :  { %2305 = vst.msk [vmem:[%s4761_s1 + $0x8] sm:$0xff] %vm955_vm12, %v1023_v62  }
  0xba   :  { %v849_v59 = vpop.permute.xlu0 %848  }
  0xbb   :  { %2261 = vst.msk [vmem:[%s4761_s1 + $0x30] sm:$0xff] %vm676_vm11, %v849_v59  }
  0xbc   :  { %v988_v0 = vpop.permute.xlu1 %987  }
  0xbd   :  { %2296 = vst.msk [vmem:[%s4761_s1 + $0x20] sm:$0xff] %vm955_vm12, %v988_v0  }
  0xbf   :  { %1964 = vrot.lane.b32.xlu2 %v1963_v63, %s2577_s3 }
  0xc0   :  { %v1128_v3 = vpop.permute.xlu2 %1127  }
  0xc1   :  { %2332 = vst.msk [vmem:[%s4761_s1 + $0x30] sm:$0xff] %vm955_vm12, %v1128_v3  }
  0xc2   :  { %v954_v2 = vpop.permute.xlu0 %953  }
  0xc3   :  { %956 = vst.msk [vmem:[%s4761_s1] sm:$0xff] %vm955_vm12, %v954_v2  }
  0xc4   :  { %v1093_v4 = vpop.permute.xlu1 %1092  }
  0xc5   :  { %2323 = vst.msk [vmem:[%s4761_s1 + $0x10] sm:$0xff] %vm955_vm12, %v1093_v4  }
  0xc8   :  { %v1233_v5 = vpop.permute.xlu2 %1232  }
  0xc9   :  { %1235 = vst.msk [vmem:[%s4761_s1] sm:$0xff] %vm1234_vm13, %v1233_v5  }
  0xca   :  { %v1058_v28 = vpop.permute.xlu0 %1057  }
  0xcb   :  { %2314 = vst.msk [vmem:[%s4761_s1 + $0x28] sm:$0xff] %vm955_vm12, %v1058_v28  }
  0xcc   :  { %v1198_v6 = vpop.permute.xlu1 %1197  }
  0xcd   :  { %2350 = vst.msk [vmem:[%s4761_s1 + $0x38] sm:$0xff] %vm955_vm12, %v1198_v6  }
  0xd0   :  { %v1337_v15 = vpop.permute.xlu2 %1336  }
  0xd1   :  { %2385 = vst.msk [vmem:[%s4761_s1 + $0x28] sm:$0xff] %vm1234_vm13, %v1337_v15  }
  0xd2   :  { %v1163_v7 = vpop.permute.xlu0 %1162  }
  0xd3   :  { %2341 = vst.msk [vmem:[%s4761_s1 + $0x18] sm:$0xff] %vm955_vm12, %v1163_v7  }
  0xd4   :  { %v1302_v8 = vpop.permute.xlu1 %1301  }
  0xd5   :  { %2376 = vst.msk [vmem:[%s4761_s1 + $0x8] sm:$0xff] %vm1234_vm13, %v1302_v8  }
  0xd8   :  { %v1442_v1 = vpop.permute.xlu2 %1441  }
  0xd9   :  { %2412 = vst.msk [vmem:[%s4761_s1 + $0x18] sm:$0xff] %vm1234_vm13, %v1442_v1  }
  0xda   :  { %v1267_v9 = vpop.permute.xlu0 %1266  }
  0xdb   :  { %2367 = vst.msk [vmem:[%s4761_s1 + $0x20] sm:$0xff] %vm1234_vm13, %v1267_v9  }
  0xdc   :  { %v1407_v10 = vpop.permute.xlu1 %1406  }
  0xdd   :  { %2403 = vst.msk [vmem:[%s4761_s1 + $0x30] sm:$0xff] %vm1234_vm13, %v1407_v10  }
  0xe0   :  { %v1546_v12 = vpop.permute.xlu2 %1545  }
  0xe1   :  { %2438 = vst.msk [vmem:[%s4761_s1 + $0x20] sm:$0xff] %vm1513_vm14, %v1546_v12  }
  0xe2   :  { %v1372_v11 = vpop.permute.xlu0 %1371  }
  0xe3   :  { %2394 = vst.msk [vmem:[%s4761_s1 + $0x10] sm:$0xff] %vm1234_vm13, %v1372_v11  }
  0xe4   :  { %v1512_v13 = vpop.permute.xlu1 %1511  }
  0xe5   :  { %1514 = vst.msk [vmem:[%s4761_s1] sm:$0xff] %vm1513_vm14, %v1512_v13  }
  0xea   :  { %v1477_v58 = vpop.permute.xlu0 %1476  }
  0xeb   :  { %2421 = vst.msk [vmem:[%s4761_s1 + $0x38] sm:$0xff] %vm1234_vm13, %v1477_v58  }
  0xec   :  { %v1616_v14 = vpop.permute.xlu1 %1615  }
  0xed   :  { %2456 = vst.msk [vmem:[%s4761_s1 + $0x28] sm:$0xff] %vm1513_vm14, %v1616_v14  }
  0xf2   :  { %v1581_v18 = vpop.permute.xlu0 %1580  }
  0xf3   :  { %2447 = vst.msk [vmem:[%s4761_s1 + $0x8] sm:$0xff] %vm1513_vm14, %v1581_v18  }
  0xf4   :  { %v1721_v19 = vpop.permute.xlu1 %1720   ;;  %v1651_v20 = vpop.permute.xlu2 %1650  }
  0xf5   :  { %2483 = vst.msk [vmem:[%s4761_s1 + $0x18] sm:$0xff] %vm1513_vm14, %v1721_v19  }
  0xf6   :  { %2465 = vst.msk [vmem:[%s4761_s1 + $0x10] sm:$0xff] %vm1513_vm14, %v1651_v20  }
  0xfa   :  { %v1686_v21 = vpop.permute.xlu0 %1685  }
  0xfb   :  { %2474 = vst.msk [vmem:[%s4761_s1 + $0x30] sm:$0xff] %vm1513_vm14, %v1686_v21  }
  0xfc   :  { %v1825_v22 = vpop.permute.xlu1 %1824  }
  0xfd   :  { %2509 = vst.msk [vmem:[%s4761_s1 + $0x20] sm:$0xff] %vm1792_vm15, %v1825_v22  }
 0x102   :  { %v1791_v23 = vpop.permute.xlu0 %1790  }
 0x103   :  { %1793 = vst.msk [vmem:[%s4761_s1] sm:$0xff] %vm1792_vm15, %v1791_v23  }
 0x104   :  { %v1930_v16 = vpop.permute.xlu1 %1929  }
 0x105   :  { %2536 = vst.msk [vmem:[%s4761_s1 + $0x10] sm:$0xff] %vm1792_vm15, %v1930_v16  }
 0x109   :  { %v1756_v25 = vpop.permute.xlu2 %1755  }
 0x10a   :  { %v1895_v24 = vpop.permute.xlu0 %1894   ;;  %2492 = vst.msk [vmem:[%s4761_s1 + $0x38] sm:$0xff] %vm1513_vm14, %v1756_v25  }
 0x10b   :  { %2527 = vst.msk [vmem:[%s4761_s1 + $0x28] sm:$0xff] %vm1792_vm15, %v1895_v24  }
 0x111   :  { %v1860_v26 = vpop.permute.xlu2 %1859  }
 0x112   :  { %2518 = vst.msk [vmem:[%s4761_s1 + $0x8] sm:$0xff] %vm1792_vm15, %v1860_v26  }
 0x116   :  { %v2035_v43 = vpop.permute.xlu1 %2034  }
 0x117   :  { %2563 = vst.msk [vmem:[%s4761_s1 + $0x38] sm:$0xff] %vm1792_vm15, %v2035_v43  }
 0x119   :  { %v1965_v27 = vpop.permute.xlu2 %1964  }
 0x11a   :  { %2545 = vst.msk [vmem:[%s4761_s1 + $0x30] sm:$0xff] %vm1792_vm15, %v1965_v27  }
 0x11d   :  { %v2000_v29 = vpop.permute.xlu0 %1999  }
 0x11e   :  { %2554 = vst.msk [vmem:[%s4761_s1 + $0x18] sm:$0xff] %vm1792_vm15, %v2000_v29  }

// kernel: _meta_forward.2
= control target key start
LH: loop header
LB: loop body
LE: loop exit
PB: predicated region body
PF: predicated region fallthrough
CT: control target
= control target key end

     0   :  { %s1395_s1 = inlined_call_operand.vmem [shape: bf16[1024,128], index: 1, kind: input, shape index: {}]   ;;  %s1396_s0 = inlined_call_operand.vmem [shape: f32[32,1024], index: 0, kind: input, shape index: {}]   ;;  %s1397_s2 = inlined_call_operand.vmem [shape: f32[1,128], index: 2, kind: input, shape index: {}]   ;;  %s1398_s3 = inlined_call_operand.vmem [shape: bf16[32,128], index: 3, kind: output, shape index: {}]  }
   0x1   :  { %v1009_v0 = vld [vmem:[%s1395_s1 + $0x38] sm:$0xff]  ;;  %v1008_v4 = vld [vmem:[%s1395_s1 + $0x30] sm:$0xff]  ;;  %v1007_v8 = vld [vmem:[%s1395_s1 + $0x28] sm:$0xff] }
   0x2   :  { %v1017_v1 = vld [vmem:[%s1395_s1 + $0x78] sm:$0xff]  ;;  %578 = vmatpush.bf16.msra.mxu0 %v1009_v0  ;;  %v1016_v5 = vld [vmem:[%s1395_s1 + $0x70] sm:$0xff]  ;;  %v1015_v9 = vld [vmem:[%s1395_s1 + $0x68] sm:$0xff] }
   0x3   :  { %v1025_v2 = vld [vmem:[%s1395_s1 + $0xb8] sm:$0xff]  ;;  %597 = vmatpush.bf16.msra.mxu1 %v1017_v1  ;;  %v1024_v6 = vld [vmem:[%s1395_s1 + $0xb0] sm:$0xff]  ;;  %v1023_v10 = vld [vmem:[%s1395_s1 + $0xa8] sm:$0xff] }
   0x4   :  { %v1033_v3 = vld [vmem:[%s1395_s1 + $0xf8] sm:$0xff]  ;;  %616 = vmatpush.bf16.msra.mxu2 %v1025_v2  ;;  %v1032_v7 = vld [vmem:[%s1395_s1 + $0xf0] sm:$0xff]  ;;  %v1031_v11 = vld [vmem:[%s1395_s1 + $0xe8] sm:$0xff] }
   0x5   :  { %635 = vmatpush.bf16.msra.mxu3 %v1033_v3  ;;  %v1006_v12 = vld [vmem:[%s1395_s1 + $0x20] sm:$0xff]  ;;  %v1005_v16 = vld [vmem:[%s1395_s1 + $0x18] sm:$0xff]  ;;  %v1004_v20 = vld [vmem:[%s1395_s1 + $0x10] sm:$0xff] }
   0x6   :  { %579 = vmatpush.bf16.msra.mxu0 %v1008_v4  ;;  %v1014_v13 = vld [vmem:[%s1395_s1 + $0x60] sm:$0xff]  ;;  %v1013_v17 = vld [vmem:[%s1395_s1 + $0x58] sm:$0xff]  ;;  %v1012_v21 = vld [vmem:[%s1395_s1 + $0x50] sm:$0xff] }
   0x7   :  { %598 = vmatpush.bf16.msra.mxu1 %v1016_v5  ;;  %v1022_v14 = vld [vmem:[%s1395_s1 + $0xa0] sm:$0xff]  ;;  %v1021_v18 = vld [vmem:[%s1395_s1 + $0x98] sm:$0xff]  ;;  %v1020_v22 = vld [vmem:[%s1395_s1 + $0x90] sm:$0xff] }
   0x8   :  { %617 = vmatpush.bf16.msra.mxu2 %v1024_v6  ;;  %v1030_v15 = vld [vmem:[%s1395_s1 + $0xe0] sm:$0xff]  ;;  %v1029_v19 = vld [vmem:[%s1395_s1 + $0xd8] sm:$0xff]  ;;  %v1028_v23 = vld [vmem:[%s1395_s1 + $0xd0] sm:$0xff] }
   0x9   :  { %636 = vmatpush.bf16.msra.mxu3 %v1032_v7  ;;  %v1003_v24 = vld [vmem:[%s1395_s1 + $0x8] sm:$0xff]  ;;  %v1002_v28 = vld [vmem:[%s1395_s1] sm:$0xff]  ;;  %v16_v36 = vld [vmem:[%s1396_s0 + $0x10] sm:$0xff] }
   0xa   :  { %580 = vmatpush.bf16.msra.mxu0 %v1007_v8  ;;  %v1011_v25 = vld [vmem:[%s1395_s1 + $0x48] sm:$0xff]  ;;  %v1010_v29 = vld [vmem:[%s1395_s1 + $0x40] sm:$0xff]  ;;  %v24_v37 = vld [vmem:[%s1396_s0 + $0x50] sm:$0xff] }
   0xb   :  { %599 = vmatpush.bf16.msra.mxu1 %v1015_v9  ;;  %v1019_v26 = vld [vmem:[%s1395_s1 + $0x88] sm:$0xff]  ;;  %v1018_v30 = vld [vmem:[%s1395_s1 + $0x80] sm:$0xff]  ;;  %v17_v38 = vld [vmem:[%s1396_s0 + $0x18] sm:$0xff]  ;;  %v48_v44 = vpack.c.bf16 %v24_v37, %v16_v36 }
   0xc   :  { %618 = vmatpush.bf16.msra.mxu2 %v1023_v10  ;;  %v1027_v27 = vld [vmem:[%s1395_s1 + $0xc8] sm:$0xff]  ;;  %v1026_v31 = vld [vmem:[%s1395_s1 + $0xc0] sm:$0xff]  ;;  %v25_v39 = vld [vmem:[%s1396_s0 + $0x58] sm:$0xff] }
   0xd   :  { %637 = vmatpush.bf16.msra.mxu3 %v1031_v11  ;;  %v14_v32 = vld [vmem:[%s1396_s0] sm:$0xff]  ;;  %v15_v34 = vld [vmem:[%s1396_s0 + $0x8] sm:$0xff]  ;;  %v1057_v40 = vld [vmem:[%s1395_s1 + $0x1b8] sm:$0xff]  ;;  %v49_v45 = vpack.c.bf16 %v25_v39, %v17_v38 }
   0xe   :  { %581 = vmatpush.bf16.msra.mxu0 %v1006_v12  ;;  %v22_v33 = vld [vmem:[%s1396_s0 + $0x40] sm:$0xff]  ;;  %v23_v35 = vld [vmem:[%s1396_s0 + $0x48] sm:$0xff]  ;;  %v1041_v41 = vld [vmem:[%s1395_s1 + $0x138] sm:$0xff] }
   0xf   :  { %600 = vmatpush.bf16.msra.mxu1 %v1014_v13  ;;  %v46_v42 = vpack.c.bf16 %v22_v33, %v14_v32  ;;  %v47_v43 = vpack.c.bf16 %v23_v35, %v15_v34  ;;  %v1049_v46 = vld [vmem:[%s1395_s1 + $0x178] sm:$0xff]  ;;  %v1056_v48 = vld [vmem:[%s1395_s1 + $0x1b0] sm:$0xff]  ;;  %v1055_v52 = vld [vmem:[%s1395_s1 + $0x1a8] sm:$0xff] }
  0x10   :  { %619 = vmatpush.bf16.msra.mxu2 %v1022_v14  ;;  %v1065_v47 = vld [vmem:[%s1395_s1 + $0x1f8] sm:$0xff]  ;;  %v1040_v49 = vld [vmem:[%s1395_s1 + $0x130] sm:$0xff]  ;;  %v1039_v53 = vld [vmem:[%s1395_s1 + $0x128] sm:$0xff] }
  0x11   :  { %638 = vmatpush.bf16.msra.mxu3 %v1030_v15  ;;  %v1048_v50 = vld [vmem:[%s1395_s1 + $0x170] sm:$0xff]  ;;  %v1047_v54 = vld [vmem:[%s1395_s1 + $0x168] sm:$0xff]  ;;  %v1054_v56 = vld [vmem:[%s1395_s1 + $0x1a0] sm:$0xff] }
  0x12   :  { %582 = vmatpush.bf16.msra.mxu0 %v1005_v16  ;;  %v1064_v51 = vld [vmem:[%s1395_s1 + $0x1f0] sm:$0xff]  ;;  %v1063_v55 = vld [vmem:[%s1395_s1 + $0x1e8] sm:$0xff]  ;;  %v1038_v57 = vld [vmem:[%s1395_s1 + $0x120] sm:$0xff] }
  0x13   :  { %601 = vmatpush.bf16.msra.mxu1 %v1013_v17  ;;  %v1046_v58 = vld [vmem:[%s1395_s1 + $0x160] sm:$0xff]  ;;  %v31_v62 = vld [vmem:[%s1396_s0 + $0x88] sm:$0xff]  ;;  %v32_v0 = vld [vmem:[%s1396_s0 + $0x90] sm:$0xff] }
  0x14   :  { %620 = vmatpush.bf16.msra.mxu2 %v1021_v18  ;;  %v1062_v59 = vld [vmem:[%s1395_s1 + $0x1e0] sm:$0xff]  ;;  %v39_v63 = vld [vmem:[%s1396_s0 + $0xc8] sm:$0xff]  ;;  %v40_v1 = vld [vmem:[%s1396_s0 + $0xd0] sm:$0xff] }
  0x15   :  { %639 = vmatpush.bf16.msra.mxu3 %v1029_v19  ;;  %v30_v60 = vld [vmem:[%s1396_s0 + $0x80] sm:$0xff]  ;;  %v33_v2 = vld [vmem:[%s1396_s0 + $0x98] sm:$0xff]  ;;  %v55_v7 = vpack.c.bf16 %v39_v63, %v31_v62  ;;  %v56_v8 = vpack.c.bf16 %v40_v1, %v32_v0  ;;  %v1052_v12 = vld [vmem:[%s1395_s1 + $0x190] sm:$0xff] }
  0x16   :  { %583 = vmatpush.bf16.msra.mxu0 %v1004_v20  ;;  %v38_v61 = vld [vmem:[%s1396_s0 + $0xc0] sm:$0xff]  ;;  %v41_v3 = vld [vmem:[%s1396_s0 + $0xd8] sm:$0xff]  ;;  %v1036_v13 = vld [vmem:[%s1395_s1 + $0x110] sm:$0xff] }
  0x17   :  { %602 = vmatpush.bf16.msra.mxu1 %v1012_v21  ;;  %v1053_v4 = vld [vmem:[%s1395_s1 + $0x198] sm:$0xff]  ;;  %v54_v6 = vpack.c.bf16 %v38_v61, %v30_v60  ;;  %v57_v9 = vpack.c.bf16 %v41_v3, %v33_v2  ;;  %v1044_v14 = vld [vmem:[%s1395_s1 + $0x150] sm:$0xff]  ;;  %v1051_v16 = vld [vmem:[%s1395_s1 + $0x188] sm:$0xff] }
  0x18   :  { %621 = vmatpush.bf16.msra.mxu2 %v1020_v22  ;;  %v1037_v5 = vld [vmem:[%s1395_s1 + $0x118] sm:$0xff]  ;;  %v1060_v15 = vld [vmem:[%s1395_s1 + $0x1d0] sm:$0xff]  ;;  %v1035_v17 = vld [vmem:[%s1395_s1 + $0x108] sm:$0xff] }
  0x19   :  { %640 = vmatpush.bf16.msra.mxu3 %v1028_v23  ;;  %v1045_v10 = vld [vmem:[%s1395_s1 + $0x158] sm:$0xff]  ;;  %v1043_v18 = vld [vmem:[%s1395_s1 + $0x148] sm:$0xff]  ;;  %v1050_v20 = vld [vmem:[%s1395_s1 + $0x180] sm:$0xff] }
  0x1a   :  { %584 = vmatpush.bf16.msra.mxu0 %v1003_v24  ;;  %v1061_v11 = vld [vmem:[%s1395_s1 + $0x1d8] sm:$0xff]  ;;  %v1059_v19 = vld [vmem:[%s1395_s1 + $0x1c8] sm:$0xff]  ;;  %v1034_v21 = vld [vmem:[%s1395_s1 + $0x100] sm:$0xff] }
  0x1b   :  { %603 = vmatpush.bf16.msra.mxu1 %v1011_v25  ;;  %v1042_v22 = vld [vmem:[%s1395_s1 + $0x140] sm:$0xff]  ;;  %v35_v38 = vld [vmem:[%s1396_s0 + $0xa8] sm:$0xff] }
  0x1c   :  { %622 = vmatpush.bf16.msra.mxu2 %v1019_v26  ;;  %v1058_v23 = vld [vmem:[%s1395_s1 + $0x1c0] sm:$0xff]  ;;  %v19_v26 = vld [vmem:[%s1396_s0 + $0x28] sm:$0xff] }
  0x1d   :  { %641 = vmatpush.bf16.msra.mxu3 %v1027_v27  ;;  %v18_v24 = vld [vmem:[%s1396_s0 + $0x20] sm:$0xff]  ;;  %v27_v27 = vld [vmem:[%s1396_s0 + $0x68] sm:$0xff] }
  0x1e   :  { %585 = vmatpush.bf16.msra.mxu0 %v1002_v28  ;;  %v26_v25 = vld [vmem:[%s1396_s0 + $0x60] sm:$0xff]  ;;  %v20_v28 = vld [vmem:[%s1396_s0 + $0x30] sm:$0xff]  ;;  %v51_v33 = vpack.c.bf16 %v27_v27, %v19_v26  ;;  %v43_v39 = vld [vmem:[%s1396_s0 + $0xe8] sm:$0xff] }
  0x1f   :  { %604 = vmatpush.bf16.msra.mxu1 %v1010_v29  ;;  %v28_v29 = vld [vmem:[%s1396_s0 + $0x70] sm:$0xff]  ;;  %v50_v32 = vpack.c.bf16 %v26_v25, %v18_v24  ;;  %v34_v36 = vld [vmem:[%s1396_s0 + $0xa0] sm:$0xff] }
  0x20   :  { %623 = vmatpush.bf16.msra.mxu2 %v1018_v30  ;;  %v21_v30 = vld [vmem:[%s1396_s0 + $0x38] sm:$0xff]  ;;  %v52_v34 = vpack.c.bf16 %v28_v29, %v20_v28  ;;  %v42_v37 = vld [vmem:[%s1396_s0 + $0xe0] sm:$0xff] }
  0x21   :  { %642 = vmatpush.bf16.msra.mxu3 %v1026_v31  ;;  %586 = vmatmul.bf16.vlgmr.msra.gmra.mxu0 %v46_v42  ;;  %v29_v31 = vld [vmem:[%s1396_s0 + $0x78] sm:$0xff] }
  0x22   :  { %654 = vmatpush.bf16.msrb.mxu0 %v1041_v41  ;;  %605 = vmatmul.bf16.vlgmr.msra.gmra.mxu1 %v47_v43  ;;  %v53_v35 = vpack.c.bf16 %v29_v31, %v21_v30  ;;  %v44_v41 = vld [vmem:[%s1396_s0 + $0xf0] sm:$0xff]  ;;  %v37_v42 = vld [vmem:[%s1396_s0 + $0xb8] sm:$0xff] }
  0x23   :  { %624 = vmatmul.bf16.vlgmr.msra.gmra.mxu2 %v48_v44  ;;  %673 = vmatpush.bf16.msrb.mxu1 %v1049_v46  ;;  %v45_v43 = vld [vmem:[%s1396_s0 + $0xf8] sm:$0xff]  ;;  %v58_v44 = vpack.c.bf16 %v42_v37, %v34_v36 }
  0x24   :  { %692 = vmatpush.bf16.msrb.mxu2 %v1057_v40  ;;  %643 = vmatmul.bf16.vlgmr.msra.gmra.mxu3 %v49_v45  ;;  %v36_v40 = vld [vmem:[%s1396_s0 + $0xb0] sm:$0xff]  ;;  %v59_v45 = vpack.c.bf16 %v43_v39, %v35_v38 }
  0x25   :  { %711 = vmatpush.bf16.msrb.mxu3 %v1065_v47  ;;  %v60_v46 = vpack.c.bf16 %v44_v41, %v36_v40  ;;  %v61_v47 = vpack.c.bf16 %v45_v43, %v37_v42 }
  0x26   :  { %655 = vmatpush.bf16.msrb.mxu0 %v1040_v49 }
  0x27   :  { %674 = vmatpush.bf16.msrb.mxu1 %v1048_v50 }
  0x28   :  { %693 = vmatpush.bf16.msrb.mxu2 %v1056_v48 }
  0x29   :  { %712 = vmatpush.bf16.msrb.mxu3 %v1064_v51 }
  0x2a   :  { %656 = vmatpush.bf16.msrb.mxu0 %v1039_v53 }
  0x2b   :  { %675 = vmatpush.bf16.msrb.mxu1 %v1047_v54 }
  0x2c   :  { %694 = vmatpush.bf16.msrb.mxu2 %v1055_v52 }
  0x2d   :  { %713 = vmatpush.bf16.msrb.mxu3 %v1063_v55 }
  0x2e   :  { %657 = vmatpush.bf16.msrb.mxu0 %v1038_v57 }
  0x2f   :  { %676 = vmatpush.bf16.msrb.mxu1 %v1046_v58  ;;  %v1077_v58 = vld [vmem:[%s1397_s2] ss:$0 sm:$0xff] }
  0x30   :  { %695 = vmatpush.bf16.msrb.mxu2 %v1054_v56 }
  0x31   :  { %714 = vmatpush.bf16.msrb.mxu3 %v1062_v59  ;;  %591 = vmatmul.bf16.gmra.mxu0 %v54_v6 }
  0x32   :  { %658 = vmatpush.bf16.msrb.mxu0 %v1037_v5  ;;  %610 = vmatmul.bf16.gmra.mxu1 %v55_v7 }
  0x33   :  { %629 = vmatmul.bf16.gmra.mxu2 %v56_v8  ;;  %677 = vmatpush.bf16.msrb.mxu1 %v1045_v10 }
  0x34   :  { %696 = vmatpush.bf16.msrb.mxu2 %v1053_v4  ;;  %648 = vmatmul.bf16.gmra.mxu3 %v57_v9 }
  0x35   :  { %715 = vmatpush.bf16.msrb.mxu3 %v1061_v11 }
  0x36   :  { %659 = vmatpush.bf16.msrb.mxu0 %v1036_v13 }
  0x37   :  { %678 = vmatpush.bf16.msrb.mxu1 %v1044_v14 }
  0x38   :  { %697 = vmatpush.bf16.msrb.mxu2 %v1052_v12 }
  0x39   :  { %716 = vmatpush.bf16.msrb.mxu3 %v1060_v15 }
  0x3a   :  { %660 = vmatpush.bf16.msrb.mxu0 %v1035_v17 }
  0x3b   :  { %679 = vmatpush.bf16.msrb.mxu1 %v1043_v18 }
  0x3c   :  { %698 = vmatpush.bf16.msrb.mxu2 %v1051_v16 }
  0x3d   :  { %717 = vmatpush.bf16.msrb.mxu3 %v1059_v19 }
  0x3e   :  { %661 = vmatpush.bf16.msrb.mxu0 %v1034_v21 }
  0x3f   :  { %680 = vmatpush.bf16.msrb.mxu1 %v1042_v22 }
  0x40   :  { %699 = vmatpush.bf16.msrb.mxu2 %v1050_v20 }
  0x41   :  { %718 = vmatpush.bf16.msrb.mxu3 %v1058_v23  ;;  %662 = vmatmul.bf16.vlgmr.msrb.gmra.mxu0 %v50_v32 }
  0x42   :  { %681 = vmatmul.bf16.vlgmr.msrb.gmra.mxu1 %v51_v33 }
  0x43   :  { %700 = vmatmul.bf16.vlgmr.msrb.gmra.mxu2 %v52_v34 }
  0x44   :  { %719 = vmatmul.bf16.vlgmr.msrb.gmra.mxu3 %v53_v35 }
  0x51   :  { %667 = vmatmul.bf16.gmra.mxu0 %v58_v44 }
  0x52   :  { %686 = vmatmul.bf16.gmra.mxu1 %v59_v45 }
  0x53   :  { %705 = vmatmul.bf16.gmra.mxu2 %v60_v46 }
  0x54   :  { %724 = vmatmul.bf16.gmra.mxu3 %v61_v47 }
  0x9e   :  { %v587_v48 = vpop.f32.mrf.mxu0 }
  0x9f   :  { %v606_v49 = vpop.f32.mrf.mxu1  ;;  %v588_v61 = vadd.f32 %v1077_v58, %v587_v48 }
  0xa1   :  { %v607_v0 = vadd.f32 %v606_v49, %v588_v61 }
  0xa6   :  { %v625_v50 = vpop.f32.mrf.mxu2  ;;  %v589_v52 = vpop.f32.mrf.mxu0 }
  0xa7   :  { %v644_v51 = vpop.f32.mrf.mxu3  ;;  %v608_v53 = vpop.f32.mrf.mxu1  ;;  %v590_v1 = vadd.f32 %v1077_v58, %v589_v52  ;;  %v626_v4 = vadd.f32 %v625_v50, %v607_v0 }
  0xa9   :  { %v609_v7 = vadd.f32 %v608_v53, %v590_v1  ;;  %v645_v8 = vadd.f32 %v644_v51, %v626_v4 }
  0xae   :  { %v627_v54 = vpop.f32.mrf.mxu2  ;;  %v592_v56 = vpop.f32.mrf.mxu0 }
  0xaf   :  { %v646_v55 = vpop.f32.mrf.mxu3  ;;  %v611_v57 = vpop.f32.mrf.mxu1  ;;  %v628_v9 = vadd.f32 %v627_v54, %v609_v7  ;;  %v593_v13 = vadd.f32 %v1077_v58, %v592_v56 }
  0xb1   :  { %v647_v12 = vadd.f32 %v646_v55, %v628_v9  ;;  %v612_v19 = vadd.f32 %v611_v57, %v593_v13 }
  0xb6   :  { %v630_v59 = vpop.f32.mrf.mxu2  ;;  %v594_v62 = vpop.f32.mrf.mxu0 }
  0xb7   :  { %v649_v60 = vpop.f32.mrf.mxu3  ;;  %v613_v63 = vpop.f32.mrf.mxu1  ;;  %v595_v21 = vadd.f32 %v1077_v58, %v594_v62  ;;  %v631_v24 = vadd.f32 %v630_v59, %v612_v19 }
  0xb9   :  { %v614_v29 = vadd.f32 %v613_v63, %v595_v21  ;;  %v650_v32 = vadd.f32 %v649_v60, %v631_v24 }
  0xbe   :  { %v632_v2 = vpop.f32.mrf.mxu2  ;;  %v663_v5 = vpop.f32.mrf.mxu0 }
  0xbf   :  { %v651_v3 = vpop.f32.mrf.mxu3  ;;  %v682_v6 = vpop.f32.mrf.mxu1  ;;  %v664_v10 = vadd.f32 %v663_v5, %v645_v8  ;;  %v633_v33 = vadd.f32 %v632_v2, %v614_v29 }
  0xc1   :  { %v683_v17 = vadd.f32 %v682_v6, %v664_v10  ;;  %v652_v39 = vadd.f32 %v651_v3, %v633_v33 }
  0xc6   :  { %v701_v11 = vpop.f32.mrf.mxu2  ;;  %v665_v15 = vpop.f32.mrf.mxu0 }
  0xc7   :  { %v720_v14 = vpop.f32.mrf.mxu3  ;;  %v684_v16 = vpop.f32.mrf.mxu1  ;;  %v666_v18 = vadd.f32 %v665_v15, %v647_v12  ;;  %v702_v20 = vadd.f32 %v701_v11, %v683_v17 }
  0xc9   :  { %v685_v22 = vadd.f32 %v684_v16, %v666_v18  ;;  %v721_v25 = vadd.f32 %v720_v14, %v702_v20 }
  0xcb   :  { %v730_v34 = vmax.f32 %v721_v25, 0.0 }
  0xce   :  { %v703_v23 = vpop.f32.mrf.mxu2  ;;  %v668_v28 = vpop.f32.mrf.mxu0 }
  0xcf   :  { %v704_v26 = vadd.f32 %v703_v23, %v685_v22  ;;  %v722_v27 = vpop.f32.mrf.mxu3  ;;  %v687_v31 = vpop.f32.mrf.mxu1  ;;  %v669_v37 = vadd.f32 %v668_v28, %v650_v32 }
  0xd1   :  { %v723_v30 = vadd.f32 %v722_v27, %v704_v26  ;;  %v688_v42 = vadd.f32 %v687_v31, %v669_v37 }
  0xd3   :  { %v731_v35 = vmax.f32 %v723_v30, 0.0 }
  0xd5   :  { %v1069_v36 = vpack.c.bf16 %v731_v35, %v730_v34 }
  0xd6   :  { %v706_v38 = vpop.f32.mrf.mxu2  ;;  %v670_v41 = vpop.f32.mrf.mxu0 }
  0xd7   :  { %1070 = vst [vmem:[%s1398_s3] sm:$0xff] %v1069_v36   ;;  %v725_v40 = vpop.f32.mrf.mxu3  ;;  %v671_v43 = vadd.f32 %v670_v41, %v652_v39  ;;  %v707_v44 = vadd.f32 %v706_v38, %v688_v42  ;;  %v689_v45 = vpop.f32.mrf.mxu1 }
  0xd9   :  { %v690_v46 = vadd.f32 %v689_v45, %v671_v43  ;;  %v726_v48 = vadd.f32 %v725_v40, %v707_v44 }
  0xdb   :  { %v732_v52 = vmax.f32 %v726_v48, 0.0 }
  0xde   :  { %v708_v47 = vpop.f32.mrf.mxu2 }
  0xdf   :  { %v709_v49 = vadd.f32 %v708_v47, %v690_v46  ;;  %v727_v50 = vpop.f32.mrf.mxu3 }
  0xe1   :  { %v728_v51 = vadd.f32 %v727_v50, %v709_v49 }
  0xe3   :  { %v733_v53 = vmax.f32 %v728_v51, 0.0 }
  0xe5   :  { %v1074_v54 = vpack.c.bf16 %v733_v53, %v732_v52 }
  0xe7   :  { %1076 = vst [vmem:[%s1398_s3 + $0x8] sm:$0xff] %v1074_v54  }

// kernel: _meta_forward.3
= control target key start
LH: loop header
LB: loop body
LE: loop exit
PB: predicated region body
PF: predicated region fallthrough
CT: control target
= control target key end

     0   :  { %vm155_vm0 = vcmask 64512   ;;  %v1131_v54 = vmov 8.0   ;;  %vm84_vm6 = vcmask 7168   ;;  %s1861_s4 = inlined_call_operand.vmem [shape: f32[128,128], index: 4, kind: input, shape index: {}]   ;;  %s1862_s5 = inlined_call_operand.vmem [shape: f32[1,128], index: 5, kind: input, shape index: {}]   ;;  %s1863_s0 = inlined_call_operand.vmem [shape: bf16[3,8,128], index: 0, kind: input, shape index: {}]   ;;  %s1864_s1 = inlined_call_operand.vmem [shape: f32[3,8,128], index: 1, kind: input, shape index: {}]   ;;  %s1865_s2 = inlined_call_operand.vmem [shape: bf16[8,128], index: 2, kind: input, shape index: {}]   ;;  %s1866_s6 = inlined_call_operand.<no memory space> [shape: f32[1,1], index: 6, kind: input, shape index: {}]   ;;  %s1867_s3 = inlined_call_operand.vmem [shape: f32[8,1], index: 3, kind: input, shape index: {}]   ;;  %s1868_s7 = inlined_call_operand.vmem [shape: f32[2,128], index: 7, kind: output, shape index: {}]  }
   0x1   :  { %v1176_v0 = vld [vmem:[%s1861_s4 + $0x70] sm:$0xff]  ;;  %v1181_v1 = vld [vmem:[%s1861_s4 + $0x78] sm:$0xff]  ;;  %v1186_v2 = vld [vmem:[%s1861_s4 + $0x60] sm:$0xff] }
   0x2   :  { %v58_v3 = vpack.c.bf16 %v1181_v1, %v1176_v0  ;;  %v1193_v4 = vld [vmem:[%s1861_s4 + $0x68] sm:$0xff]  ;;  %v1200_v6 = vld [vmem:[%s1861_s4 + $0x50] sm:$0xff]  ;;  %v1205_v7 = vld [vmem:[%s1861_s4 + $0x58] sm:$0xff] }
   0x3   :  { %v57_v5 = vpack.c.bf16 %v1193_v4, %v1186_v2  ;;  %v56_v8 = vpack.c.bf16 %v1205_v7, %v1200_v6  ;;  %v1212_v9 = vld [vmem:[%s1861_s4 + $0x40] sm:$0xff]  ;;  %v1217_v10 = vld [vmem:[%s1861_s4 + $0x48] sm:$0xff]  ;;  %v1224_v12 = vld [vmem:[%s1861_s4 + $0x30] sm:$0xff] }
   0x4   :  { %99 = vmatpush.bf16.msra.mxu1 %v58_v3  ;;  %62 = vmatpush.bf16.msra.mxu0 %v58_v3  ;;  %v55_v11 = vpack.c.bf16 %v1217_v10, %v1212_v9  ;;  %v1229_v13 = vld [vmem:[%s1861_s4 + $0x38] sm:$0xff]  ;;  %v1236_v15 = vld [vmem:[%s1861_s4 + $0x20] sm:$0xff]  ;;  %v1241_v16 = vld [vmem:[%s1861_s4 + $0x28] sm:$0xff] }
   0x5   :  { %v54_v14 = vpack.c.bf16 %v1229_v13, %v1224_v12  ;;  %v53_v17 = vpack.c.bf16 %v1241_v16, %v1236_v15  ;;  %v1248_v18 = vld [vmem:[%s1861_s4 + $0x10] sm:$0xff]  ;;  %v1253_v19 = vld [vmem:[%s1861_s4 + $0x18] sm:$0xff]  ;;  %v1260_v21 = vld [vmem:[%s1861_s4] sm:$0xff] }
   0x6   :  { %v52_v20 = vpack.c.bf16 %v1253_v19, %v1248_v18  ;;  %v1265_v22 = vld [vmem:[%s1861_s4 + $0x8] sm:$0xff]  ;;  %v97_v24 = vld [vmem:[%s1863_s0] sm:$0xf] }
   0x7   :  { %v51_v23 = vpack.c.bf16 %v1265_v22, %v1260_v21  ;;  %v122_v25 = vunpack.c.l.bf16 %v97_v24  ;;  %v1275_v26 = vld [vmem:[%s1862_s5] ss:$0 sm:$0xff] }
   0x8   :  { %100 = vmatpush.bf16.msra.mxu1 %v57_v5  ;;  %63 = vmatpush.bf16.msra.mxu0 %v57_v5  ;;  %v98_v39 = vld [vmem:[%s1864_s1] sm:$0xff] }
   0x9   :  { %123 = vxpose.xlu1.b32.start.end [1/1] (short) %v122_v25, 128 }
   0xc   :  { %101 = vmatpush.bf16.msra.mxu1 %v56_v8  ;;  %64 = vmatpush.bf16.msra.mxu0 %v56_v8 }
  0x10   :  { %102 = vmatpush.bf16.msra.mxu1 %v55_v11  ;;  %65 = vmatpush.bf16.msra.mxu0 %v55_v11 }
  0x14   :  { %103 = vmatpush.bf16.msra.mxu1 %v54_v14  ;;  %66 = vmatpush.bf16.msra.mxu0 %v54_v14 }
  0x18   :  { %104 = vmatpush.bf16.msra.mxu1 %v53_v17  ;;  %67 = vmatpush.bf16.msra.mxu0 %v53_v17 }
  0x1c   :  { %105 = vmatpush.bf16.msra.mxu1 %v52_v20  ;;  %68 = vmatpush.bf16.msra.mxu0 %v52_v20 }
  0x20   :  { %106 = vmatpush.bf16.msra.mxu1 %v51_v23  ;;  %69 = vmatpush.bf16.msra.mxu0 %v51_v23 }
  0x23   :  { %107 = vmatmul.bf16.vlgmr.msra.gmra.mxu1 %v97_v24 }
  0xa0   :  { %v108_v27 = vpop.f32.mrf.mxu1 }
  0xa1   :  { %v109_v28 = vadd.f32 %v1275_v26, %v108_v27 }
  0xa3   :  { %112 = vmax.xlane.f32.xlu0 %v109_v28 }
  0xa8   :  { %v110_v29 = vpop.f32.mrf.mxu1 }
  0xad   :  { %v139_v34 = vpop.trf.xlu1 }
  0xb5   :  { %v140_v35 = vpop.trf.xlu1 }
  0xbd   :  { %v141_v37 = vpop.trf.xlu1 }
  0xc5   :  { %v142_v42 = vpop.trf.xlu1 }
  0xcd   :  { %v143_v43 = vpop.trf.xlu1 }
  0xd5   :  { %v144_v44 = vpop.trf.xlu1 }
  0xdd   :  { %v145_v45 = vpop.trf.xlu1 }
  0xe5   :  { %v146_v46 = vpop.trf.xlu1 }
  0xed   :  { %v147_v47 = vpop.trf.xlu1 }
  0xf5   :  { %v148_v48 = vpop.trf.xlu1 }
  0xfd   :  { %v149_v49 = vpop.trf.xlu1 }
 0x105   :  { %v150_v50 = vpop.trf.xlu1 }
 0x10d   :  { %v151_v51 = vpop.trf.xlu1 }
 0x115   :  { %v152_v52 = vpop.trf.xlu1 }
 0x116   :  { %v113_v30 = vpop.xlane.xlu0 %112 }
 0x117   :  { %v114_v31 = vsub.f32 %v109_v28, %v113_v30 }
 0x119   :  { %v115_v32 = vmul.f32 1.442695, %v114_v31 }
 0x11b   :  { %1114 = vpow2.f32 %v115_v32 }
 0x11d   :  { %v153_v57 = vpop.trf.xlu1 }
 0x121   :  { %v1115_v33 = vpop.eup %1114 }
 0x122   :  { %117 = vadd.xlane.f32.xlu0 %v1115_v33 }
 0x125   :  { %v154_v3 = vpop.trf.xlu1 }
 0x195   :  { %v118_v36 = vpop.xlane.xlu0 %117 }
 0x196   :  { %1116 = vrcp.f32 %v118_v36 }
 0x197   :  { %1118 = vrcp.f32 %v1131_v54 }
 0x19c   :  { %v1117_v38 = vpop.eup %1116 }
 0x19d   :  { %v120_v40 = vmul.f32 %v1117_v38, %v1115_v33  ;;  %v1119_v56 = vpop.eup %1118 }
 0x19e   :  { %v293_v59 = vmul.f32 8.0, %v1119_v56  ;;  %vm297_vm1 = vweird.f32 %v1119_v56 }
 0x19f   :  { %v121_v41 = vsub.f32 %v98_v39, %v120_v40 }
 0x1a0   :  { %v294_v61 = vsub.f32 1.0, %v293_v59 }
 0x1a1   :  { %219 = vmatpush.msra.mxu2 %v121_v41  ;;  %v285_v53 = vmul.f32 %v121_v41, %v121_v41 }
 0x1a2   :  { %1045 = vmatmul.msk.f32.vlgmr.msra.gmra.mxu2 %vm155_vm0, %v139_v34  ;;  %v295_v63 = vmul.f32 %v1119_v56, %v294_v61 }
 0x1a3   :  { %v286_v55 = vrot.slane %v285_v53, 4 }
 0x1a4   :  { %v296_v8 = vadd.f32 %v1119_v56, %v295_v63  ;;  %v1365_v63 = vld [vmem:[%s1865_s2] sm:$0xf] }
 0x1a5   :  { %v287_v58 = vadd.f32 %v286_v55, %v285_v53  ;;  %70 = vmatmul.bf16.vlgmr.msra.gmra.mxu0 %v1365_v63 }
 0x1a6   :  { %v1297_v14 = vsel %vm297_vm1, %v1119_v56, %v296_v8 }
 0x1a7   :  { %v288_v60 = vrot.slane %v287_v58, 2 }
 0x1a9   :  { %v289_v62 = vadd.f32 %v288_v60, %v287_v58 }
 0x1aa   :  { %1046 = vmatmul.msk.f32.gmra.mxu2 %vm155_vm0, %v140_v35 }
 0x1ab   :  { %v290_v5 = vrot.slane %v289_v62, 1 }
 0x1ad   :  { %v291_v11 = vadd.f32 %v290_v5, %v289_v62 }
 0x1af   :  { %v1300_v17 = vmul.f32 %v1297_v14, %v291_v11 }
 0x1b1   :  { %v1306_v24 = vmul.f32 %v1300_v17, %v1260_v21  ;;  %v1314_v29 = vmul.f32 %v1300_v17, %v1265_v22  ;;  %v1322_v33 = vmul.f32 %v1300_v17, %v1248_v18  ;;  %v1338_v41 = vmul.f32 %v1300_v17, %v1236_v15 }
 0x1b2   :  { %1047 = vmatmul.msk.f32.gmra.mxu2 %vm155_vm0, %v141_v37  ;;  %v1330_v37 = vmul.f32 %v1300_v17, %v1253_v19  ;;  %v307_v53 = vmul.f32 %v1300_v17, %v1229_v13 }
 0x1ba   :  { %1048 = vmatmul.msk.f32.gmra.mxu2 %vm155_vm0, %v142_v42 }
 0x1c2   :  { %1049 = vmatmul.msk.f32.gmra.mxu2 %vm155_vm0, %v143_v43 }
 0x1ca   :  { %1050 = vmatmul.msk.f32.gmra.mxu2 %vm155_vm0, %v144_v44 }
 0x1d2   :  { %1051 = vmatmul.msk.f32.gmra.mxu2 %vm155_vm0, %v145_v45  ;;  %v1346_v45 = vmul.f32 %v1300_v17, %v1241_v16 }
 0x1da   :  { %1052 = vmatmul.msk.f32.gmra.mxu2 %vm155_vm0, %v146_v46 }
 0x1e2   :  { %1053 = vmatmul.msk.f32.gmra.mxu2 %vm155_vm0, %v147_v47 }
 0x1ea   :  { %1054 = vmatmul.msk.f32.gmra.mxu2 %vm155_vm0, %v148_v48 }
 0x1f2   :  { %1055 = vmatmul.msk.f32.gmra.mxu2 %vm155_vm0, %v149_v49  ;;  %v1354_v49 = vmul.f32 %v1300_v17, %v1224_v12 }
 0x1fa   :  { %1056 = vmatmul.msk.f32.gmra.mxu2 %vm155_vm0, %v150_v50 }
 0x202   :  { %1057 = vmatmul.msk.f32.gmra.mxu2 %vm155_vm0, %v151_v51 }
 0x20a   :  { %1058 = vmatmul.msk.f32.gmra.mxu2 %vm155_vm0, %v152_v52 }
 0x212   :  { %1059 = vmatmul.msk.f32.gmra.mxu2 %vm155_vm0, %v153_v57  ;;  %v308_v57 = vmul.f32 %v1300_v17, %v1212_v9 }
 0x21a   :  { %1060 = vmatmul.msk.f32.gmra.mxu2 %vm155_vm0, %v154_v3 }
 0x225   :  { %v221_v20 = vpop.f32.mrf.mxu2 }
 0x226   :  { %v1302_v23 = vmul.f32 0.125, %v221_v20  ;;  %v314_v20 = vmul.f32 %v1300_v17, %v1176_v0 }
 0x22d   :  { %v224_v27 = vpop.f32.mrf.mxu2 }
 0x22e   :  { %v1310_v28 = vmul.f32 0.125, %v224_v27 }
 0x235   :  { %v227_v31 = vpop.f32.mrf.mxu2 }
 0x236   :  { %v1318_v32 = vmul.f32 0.125, %v227_v31  ;;  %v313_v31 = vmul.f32 %v1300_v17, %v1193_v4 }
 0x238   :  { %v318_v34 = vsub.f32 %v1318_v32, %v1322_v33  ;;  %v1870_v32 = vsub.f32 %v1302_v23, %v1306_v24  ;;  %v71_v24 = vpop.f32.mrf.mxu0 }
 0x23d   :  { %v230_v35 = vpop.f32.mrf.mxu2 }
 0x23e   :  { %v1326_v36 = vmul.f32 0.125, %v230_v35 }
 0x240   :  { %v319_v38 = vsub.f32 %v1326_v36, %v1330_v37  ;;  %v1869_v36 = vsub.f32 %v1310_v28, %v1314_v29 }
 0x245   :  { %v233_v39 = vpop.f32.mrf.mxu2 }
 0x246   :  { %v1334_v40 = vmul.f32 0.125, %v233_v39  ;;  %v312_v39 = vmul.f32 %v1300_v17, %v1186_v2 }
 0x248   :  { %v320_v42 = vsub.f32 %v1334_v40, %v1338_v41 }
 0x24d   :  { %v236_v43 = vpop.f32.mrf.mxu2 }
 0x24e   :  { %v1342_v44 = vmul.f32 0.125, %v236_v43 }
 0x250   :  { %v321_v46 = vsub.f32 %v1342_v44, %v1346_v45 }
 0x255   :  { %v239_v47 = vpop.f32.mrf.mxu2 }
 0x256   :  { %v1350_v48 = vmul.f32 0.125, %v239_v47 }
 0x258   :  { %v322_v50 = vsub.f32 %v1350_v48, %v1354_v49 }
 0x25d   :  { %v242_v51 = vpop.f32.mrf.mxu2 }
 0x25e   :  { %v276_v52 = vmul.f32 0.125, %v242_v51 }
 0x260   :  { %v323_v54 = vsub.f32 %v276_v52, %v307_v53  ;;  %v315_v53 = vmul.f32 %v1300_v17, %v1181_v1 }
 0x265   :  { %v245_v55 = vpop.f32.mrf.mxu2 }
 0x266   :  { %v277_v56 = vmul.f32 0.125, %v245_v55  ;;  %v1379_v55 = vstv %s1866_s6 }
 0x267   :  { %v337_v48 = vmul.f32 %v1379_v55, %v320_v42  ;;  %v336_v44 = vmul.f32 %v1379_v55, %v319_v38  ;;  %v335_v40 = vmul.f32 %v1379_v55, %v318_v34  ;;  %v334_v37 = vmul.f32 %v1379_v55, %v1869_v36 }
 0x268   :  { %v324_v58 = vsub.f32 %v277_v56, %v308_v57  ;;  %v311_v56 = vmul.f32 %v1300_v17, %v1205_v7  ;;  %v333_v33 = vmul.f32 %v1379_v55, %v1870_v32 }
 0x269   :  { %v1481_v29 = vadd.f32 %v334_v37, %v1265_v22  ;;  %v73_v22 = vpop.f32.mrf.mxu0 }
 0x26d   :  { %v248_v59 = vpop.f32.mrf.mxu2 }
 0x275   :  { %v251_v60 = vpop.f32.mrf.mxu2 }
 0x276   :  { %v279_v57 = vmul.f32 0.125, %v251_v60 }
 0x27d   :  { %v254_v61 = vpop.f32.mrf.mxu2 }
 0x27e   :  { %v280_v47 = vmul.f32 0.125, %v254_v61  ;;  %v310_v61 = vmul.f32 %v1300_v17, %v1200_v6 }
 0x280   :  { %v326_v25 = vsub.f32 %v279_v57, %v310_v61 }
 0x285   :  { %v257_v62 = vpop.f32.mrf.mxu2 }
 0x286   :  { %v281_v27 = vmul.f32 0.125, %v257_v62 }
 0x288   :  { %v328_v62 = vsub.f32 %v281_v27, %v312_v39 }
 0x28a   :  { %v345_v30 = vmul.f32 %v1379_v55, %v328_v62 }
 0x28d   :  { %v260_v3 = vpop.f32.mrf.mxu2 }
 0x28e   :  { %v282_v11 = vmul.f32 0.125, %v260_v3 }
 0x290   :  { %v329_v51 = vsub.f32 %v282_v11, %v313_v31  ;;  %v327_v11 = vsub.f32 %v280_v47, %v311_v56 }
 0x295   :  { %v263_v5 = vpop.f32.mrf.mxu2 }
 0x296   :  { %v283_v8 = vmul.f32 0.125, %v263_v5 }
 0x298   :  { %v330_v35 = vsub.f32 %v283_v8, %v314_v20  ;;  %v278_v8 = vmul.f32 0.125, %v248_v59  ;;  %v346_v20 = vmul.f32 %v1379_v55, %v329_v51  ;;  %v344_v59 = vmul.f32 %v1379_v55, %v327_v11 }
 0x299   :  { %v1405_v51 = vadd.f32 %v345_v30, %v1186_v2 }
 0x29a   :  { %v347_v3 = vmul.f32 %v1379_v55, %v330_v35  ;;  %v1401_v47 = vadd.f32 %v346_v20, %v1193_v4 }
 0x29c   :  { %v1392_v60 = vadd.f32 %v347_v3, %v1176_v0  ;;  %v1063_v3 = vld [vmem:[%s1864_s1 + $0x8] sm:$0xff] }
 0x29d   :  { %v266_v43 = vpop.f32.mrf.mxu2 }
 0x29e   :  { %v284_v52 = vmul.f32 0.125, %v266_v43  ;;  %v309_v43 = vmul.f32 %v1300_v17, %v1217_v10  ;;  %v343_v17 = vmul.f32 %v1379_v55, %v326_v25  ;;  %v340_v25 = vmul.f32 %v1379_v55, %v323_v54 }
 0x2a0   :  { %v331_v5 = vsub.f32 %v284_v52, %v315_v53  ;;  %v325_v35 = vsub.f32 %v278_v8, %v309_v43  ;;  %v1411_v52 = vadd.f32 %v344_v59, %v1205_v7  ;;  %v341_v53 = vmul.f32 %v1379_v55, %v324_v58 }
 0x2a1   :  { %v1415_v4 = vadd.f32 %v343_v17, %v1200_v6  ;;  %v339_v7 = vmul.f32 %v1379_v55, %v322_v50  ;;  %v338_v6 = vmul.f32 %v1379_v55, %v321_v46 }
 0x2a2   :  { %v348_v31 = vmul.f32 %v1379_v55, %v331_v5  ;;  %v342_v0 = vmul.f32 %v1379_v55, %v325_v35  ;;  %v1428_v58 = vadd.f32 %v341_v53, %v1212_v9 }
 0x2a3   :  { %v370_v2 = vpack.c.bf16 %v1411_v52, %v1415_v4  ;;  %v1444_v9 = vadd.f32 %v339_v7, %v1224_v12  ;;  %v1460_v12 = vadd.f32 %v337_v48, %v1236_v15  ;;  %v1476_v15 = vadd.f32 %v335_v40, %v1248_v18  ;;  %v1062_v18 = vld [vmem:[%s1863_s0 + $0x4] sm:$0xf] }
 0x2a4   :  { %v1395_v27 = vadd.f32 %v348_v31, %v1181_v1  ;;  %v371_v1 = vpack.c.bf16 %v1401_v47, %v1405_v51  ;;  %v1421_v30 = vadd.f32 %v342_v0, %v1217_v10  ;;  %v1437_v10 = vadd.f32 %v340_v25, %v1229_v13 }
 0x2a5   :  { %v1453_v13 = vadd.f32 %v338_v6, %v1241_v16  ;;  %v1469_v16 = vadd.f32 %v336_v44, %v1253_v19  ;;  %v1484_v19 = vadd.f32 %v333_v33, %v1260_v21  ;;  %v436_v56 = vunpack.c.l.bf16 %v1062_v18 }
 0x2a6   :  { %v372_v39 = vpack.c.bf16 %v1395_v27, %v1392_v60  ;;  %v369_v54 = vpack.c.bf16 %v1421_v30, %v1428_v58  ;;  %v368_v45 = vpack.c.bf16 %v1437_v10, %v1444_v9 }
 0x2a7   :  { %v367_v38 = vpack.c.bf16 %v1453_v13, %v1460_v12  ;;  %v366_v28 = vpack.c.bf16 %v1469_v16, %v1476_v15  ;;  %v365_v23 = vpack.c.bf16 %v1481_v29, %v1484_v19 }
 0x2a8   :  { %373 = vmatpush.bf16.msra.mxu3 %v372_v39  ;;  %413 = vmatpush.bf16.msrb.mxu0 %v372_v39 }
 0x2ac   :  { %374 = vmatpush.bf16.msra.mxu3 %v371_v1  ;;  %414 = vmatpush.bf16.msrb.mxu0 %v371_v1  ;;  %v1507_v1 = vadd.f32 %v1275_v26, %v71_v24 }
 0x2b0   :  { %375 = vmatpush.bf16.msra.mxu3 %v370_v2  ;;  %415 = vmatpush.bf16.msrb.mxu0 %v370_v2 }
 0x2b4   :  { %376 = vmatpush.bf16.msra.mxu3 %v369_v54  ;;  %416 = vmatpush.bf16.msrb.mxu0 %v369_v54 }
 0x2b8   :  { %377 = vmatpush.bf16.msra.mxu3 %v368_v45  ;;  %417 = vmatpush.bf16.msrb.mxu0 %v368_v45 }
 0x2bc   :  { %378 = vmatpush.bf16.msra.mxu3 %v367_v38  ;;  %418 = vmatpush.bf16.msrb.mxu0 %v367_v38 }
 0x2c0   :  { %379 = vmatpush.bf16.msra.mxu3 %v366_v28  ;;  %419 = vmatpush.bf16.msrb.mxu0 %v366_v28 }
 0x2c4   :  { %380 = vmatpush.bf16.msra.mxu3 %v365_v23  ;;  %420 = vmatpush.bf16.msrb.mxu0 %v365_v23 }
 0x2c7   :  { %421 = vmatmul.bf16.vlgmr.msrb.gmra.mxu0 %v1062_v18  ;;  %381 = vmatmul.bf16.vlgmr.msra.gmra.mxu3 %v1365_v63 }
 0x344   :  { %v422_v34 = vpop.f32.mrf.mxu0 }
 0x345   :  { %v423_v41 = vadd.f32 %v1275_v26, %v422_v34 }
 0x347   :  { %426 = vmax.xlane.f32.xlu1 %v423_v41 }
 0x34c   :  { %v424_v21 = vpop.f32.mrf.mxu0 }
 0x3ba   :  { %v427_v42 = vpop.xlane.xlu1 %426 }
 0x3bb   :  { %v428_v46 = vsub.f32 %v423_v41, %v427_v42 }
 0x3bd   :  { %v429_v49 = vmul.f32 1.442695, %v428_v46 }
 0x3bf   :  { %1120 = vpow2.f32 %v429_v49 }
 0x3c5   :  { %v1121_v50 = vpop.eup %1120 }
 0x3c6   :  { %431 = vadd.xlane.f32.xlu2 %v1121_v50 }
 0x3ef   :  { %437 = vxpose.xlu2.b32.start.end [1/1] (short) %v436_v56, 128 }
 0x439   :  { %v432_v57 = vpop.xlane.xlu2 %431 }
 0x43a   :  { %1122 = vrcp.f32 %v432_v57 }
 0x440   :  { %v1123_v62 = vpop.eup %1122 }
 0x441   :  { %v434_v5 = vmul.f32 %v1123_v62, %v1121_v50 }
 0x443   :  { %v435_v61 = vsub.f32 %v1063_v3, %v434_v5 }
 0x445   :  { %532 = vmatpush.msrb.mxu1 %v435_v61  ;;  %v598_v2 = vmul.f32 %v435_v61, %v435_v61 }
 0x447   :  { %v599_v6 = vrot.slane %v598_v2, 4 }
 0x449   :  { %v600_v54 = vadd.f32 %v599_v6, %v598_v2 }
 0x44b   :  { %v601_v44 = vrot.slane %v600_v54, 2 }
 0x44d   :  { %v602_v45 = vadd.f32 %v601_v44, %v600_v54 }
 0x44f   :  { %v603_v36 = vrot.slane %v602_v45, 1 }
 0x451   :  { %v604_v37 = vadd.f32 %v603_v36, %v602_v45 }
 0x453   :  { %v1517_v32 = vmul.f32 %v604_v37, %v1297_v14 }
 0x455   :  { %v1523_v23 = vmul.f32 %v1517_v32, %v1484_v19  ;;  %v1531_v34 = vmul.f32 %v1517_v32, %v1481_v29  ;;  %v1539_v46 = vmul.f32 %v1517_v32, %v1476_v15  ;;  %v1547_v57 = vmul.f32 %v1517_v32, %v1469_v16 }
 0x456   :  { %v1555_v61 = vmul.f32 %v1517_v32, %v1460_v12  ;;  %v614_v54 = vmul.f32 %v1517_v32, %v1428_v58 }
 0x488   :  { %v453_v8 = vpop.trf.xlu2 }
 0x489   :  { %1064 = vmatmul.msk.f32.vlgmr.msrb.gmra.mxu1 %vm155_vm0, %v453_v8 }
 0x490   :  { %v454_v11 = vpop.trf.xlu2 }
 0x491   :  { %1065 = vmatmul.msk.f32.gmra.mxu1 %vm155_vm0, %v454_v11 }
 0x498   :  { %v455_v20 = vpop.trf.xlu2 }
 0x499   :  { %1066 = vmatmul.msk.f32.gmra.mxu1 %vm155_vm0, %v455_v20 }
 0x4a0   :  { %v456_v31 = vpop.trf.xlu2 }
 0x4a1   :  { %1067 = vmatmul.msk.f32.gmra.mxu1 %vm155_vm0, %v456_v31  ;;  %v1563_v31 = vmul.f32 %v1517_v32, %v1453_v13 }
 0x4a8   :  { %v457_v43 = vpop.trf.xlu2 }
 0x4a9   :  { %1068 = vmatmul.msk.f32.gmra.mxu1 %vm155_vm0, %v457_v43 }
 0x4b0   :  { %v458_v35 = vpop.trf.xlu2 }
 0x4b1   :  { %1069 = vmatmul.msk.f32.gmra.mxu1 %vm155_vm0, %v458_v35 }
 0x4b8   :  { %v459_v59 = vpop.trf.xlu2 }
 0x4b9   :  { %1070 = vmatmul.msk.f32.gmra.mxu1 %vm155_vm0, %v459_v59 }
 0x4c0   :  { %v460_v39 = vpop.trf.xlu2 }
 0x4c1   :  { %1071 = vmatmul.msk.f32.gmra.mxu1 %vm155_vm0, %v460_v39  ;;  %v612_v39 = vmul.f32 %v1517_v32, %v1444_v9 }
 0x4c8   :  { %v461_v17 = vpop.trf.xlu2 }
 0x4c9   :  { %1072 = vmatmul.msk.f32.gmra.mxu1 %vm155_vm0, %v461_v17 }
 0x4d0   :  { %v462_v0 = vpop.trf.xlu2 }
 0x4d1   :  { %1073 = vmatmul.msk.f32.gmra.mxu1 %vm155_vm0, %v462_v0 }
 0x4d8   :  { %75 = vmax.xlane.f32.xlu2 %v1507_v1  ;;  %v463_v53 = vpop.trf.xlu2 }
 0x4d9   :  { %1074 = vmatmul.msk.f32.gmra.mxu1 %vm155_vm0, %v463_v53 }
 0x4e0   :  { %v464_v25 = vpop.trf.xlu2 }
 0x4e1   :  { %1075 = vmatmul.msk.f32.gmra.mxu1 %vm155_vm0, %v464_v25  ;;  %v613_v25 = vmul.f32 %v1517_v32, %v1437_v10 }
 0x4e8   :  { %v465_v7 = vpop.trf.xlu2 }
 0x4e9   :  { %1076 = vmatmul.msk.f32.gmra.mxu1 %vm155_vm0, %v465_v7 }
 0x4f0   :  { %v466_v48 = vpop.trf.xlu2 }
 0x4f1   :  { %1077 = vmatmul.msk.f32.gmra.mxu1 %vm155_vm0, %v466_v48 }
 0x4f8   :  { %v467_v40 = vpop.trf.xlu2 }
 0x4f9   :  { %1078 = vmatmul.msk.f32.gmra.mxu1 %vm155_vm0, %v467_v40 }
 0x500   :  { %v468_v38 = vpop.trf.xlu2 }
 0x501   :  { %1079 = vmatmul.msk.f32.gmra.mxu1 %vm155_vm0, %v468_v38 }
 0x506   :  { %v534_v33 = vpop.f32.mrf.mxu1 }
 0x507   :  { %v1519_v28 = vmul.f32 0.125, %v534_v33 }
 0x50e   :  { %v537_v24 = vpop.f32.mrf.mxu1 }
 0x50f   :  { %v1527_v22 = vmul.f32 0.125, %v537_v24 }
 0x511   :  { %v623_v41 = vsub.f32 %v1527_v22, %v1531_v34 }
 0x516   :  { %v540_v21 = vpop.f32.mrf.mxu1 }
 0x517   :  { %v1535_v42 = vmul.f32 0.125, %v540_v21  ;;  %v620_v21 = vmul.f32 %v1517_v32, %v1392_v60 }
 0x519   :  { %v624_v49 = vsub.f32 %v1535_v42, %v1539_v46  ;;  %v1871_v42 = vsub.f32 %v1519_v28, %v1523_v23 }
 0x51b   :  { %v638_v46 = vmul.f32 %v1871_v42, %v1379_v55 }
 0x51e   :  { %v543_v50 = vpop.f32.mrf.mxu1 }
 0x51f   :  { %v1543_v56 = vmul.f32 0.125, %v543_v50 }
 0x521   :  { %v625_v62 = vsub.f32 %v1543_v56, %v1547_v57  ;;  %v639_v56 = vmul.f32 %v623_v41, %v1379_v55 }
 0x523   :  { %v1681_v34 = vadd.f32 %v639_v56, %v1481_v29 }
 0x526   :  { %v546_v3 = vpop.f32.mrf.mxu1 }
 0x527   :  { %v1551_v5 = vmul.f32 0.125, %v546_v3  ;;  %v619_v3 = vmul.f32 %v1517_v32, %v1401_v47 }
 0x529   :  { %v626_v8 = vsub.f32 %v1551_v5, %v1555_v61  ;;  %v640_v5 = vmul.f32 %v624_v49, %v1379_v55 }
 0x52e   :  { %v549_v11 = vpop.f32.mrf.mxu1 }
 0x52f   :  { %v1559_v20 = vmul.f32 0.125, %v549_v11 }
 0x531   :  { %v627_v43 = vsub.f32 %v1559_v20, %v1563_v31  ;;  %v641_v20 = vmul.f32 %v625_v62, %v1379_v55 }
 0x536   :  { %v552_v35 = vpop.f32.mrf.mxu1 }
 0x537   :  { %v1567_v59 = vmul.f32 0.125, %v552_v35  ;;  %v618_v35 = vmul.f32 %v1517_v32, %v1405_v51 }
 0x539   :  { %v628_v17 = vsub.f32 %v1567_v59, %v612_v39 }
 0x53e   :  { %v555_v0 = vpop.f32.mrf.mxu1 }
 0x53f   :  { %v589_v53 = vmul.f32 0.125, %v555_v0 }
 0x541   :  { %v629_v2 = vsub.f32 %v589_v53, %v613_v25  ;;  %v621_v25 = vmul.f32 %v1517_v32, %v1395_v27 }
 0x546   :  { %v558_v7 = vpop.f32.mrf.mxu1 }
 0x547   :  { %v590_v6 = vmul.f32 0.125, %v558_v7  ;;  %v617_v7 = vmul.f32 %v1517_v32, %v1411_v52 }
 0x549   :  { %v630_v48 = vsub.f32 %v590_v6, %v614_v54 }
 0x54e   :  { %v561_v44 = vpop.f32.mrf.mxu1 }
 0x556   :  { %v564_v45 = vpop.f32.mrf.mxu1 }
 0x557   :  { %v592_v6 = vmul.f32 0.125, %v564_v45 }
 0x55e   :  { %v567_v40 = vpop.f32.mrf.mxu1 }
 0x55f   :  { %v593_v39 = vmul.f32 0.125, %v567_v40 }
 0x566   :  { %v570_v36 = vpop.f32.mrf.mxu1 }
 0x567   :  { %v594_v50 = vmul.f32 0.125, %v570_v36 }
 0x569   :  { %v634_v54 = vsub.f32 %v594_v50, %v618_v35 }
 0x56b   :  { %v650_v18 = vmul.f32 %v634_v54, %v1379_v55 }
 0x56e   :  { %v573_v37 = vpop.f32.mrf.mxu1 }
 0x56f   :  { %v595_v24 = vmul.f32 0.125, %v573_v37 }
 0x571   :  { %v635_v0 = vsub.f32 %v595_v24, %v619_v3  ;;  %v615_v3 = vmul.f32 %v1517_v32, %v1421_v30 }
 0x573   :  { %v651_v40 = vmul.f32 %v635_v0, %v1379_v55  ;;  %v1608_v0 = vadd.f32 %v650_v18, %v1405_v51 }
 0x576   :  { %v576_v38 = vpop.f32.mrf.mxu1 }
 0x577   :  { %v596_v33 = vmul.f32 0.125, %v576_v38  ;;  %v616_v38 = vmul.f32 %v1517_v32, %v1415_v4 }
 0x579   :  { %v636_v11 = vsub.f32 %v596_v33, %v620_v21  ;;  %v591_v33 = vmul.f32 0.125, %v561_v44  ;;  %v633_v21 = vsub.f32 %v593_v39, %v617_v7  ;;  %v1604_v39 = vadd.f32 %v651_v40, %v1401_v47 }
 0x57a   :  { %v645_v7 = vmul.f32 %v629_v2, %v1379_v55 }
 0x57b   :  { %v652_v36 = vmul.f32 %v636_v11, %v1379_v55  ;;  %v631_v11 = vsub.f32 %v591_v33, %v615_v3  ;;  %v649_v44 = vmul.f32 %v633_v21, %v1379_v55 }
 0x57d   :  { %v1598_v50 = vadd.f32 %v652_v36, %v1392_v60  ;;  %v676_v60 = vpack.c.bf16 %v1604_v39, %v1608_v0  ;;  %v1702_v36 = vld [vmem:[%s1864_s1 + $0x10] sm:$0xff] }
 0x57e   :  { %v579_v59 = vpop.f32.mrf.mxu1 }
 0x57f   :  { %v597_v53 = vmul.f32 0.125, %v579_v59  ;;  %v632_v59 = vsub.f32 %v592_v6, %v616_v38  ;;  %v644_v6 = vmul.f32 %v628_v17, %v1379_v55  ;;  %v382_v38 = vpop.f32.mrf.mxu3 }
 0x581   :  { %v637_v37 = vsub.f32 %v597_v53, %v621_v25  ;;  %v648_v32 = vmul.f32 %v632_v59, %v1379_v55  ;;  %v1614_v53 = vadd.f32 %v649_v44, %v1411_v52  ;;  %v646_v25 = vmul.f32 %v630_v48, %v1379_v55 }
 0x582   :  { %v1637_v48 = vadd.f32 %v645_v7, %v1437_v10  ;;  %v1718_v7 = vadd.f32 %v1275_v26, %v382_v38 }
 0x583   :  { %v653_v24 = vmul.f32 %v637_v37, %v1379_v55  ;;  %v1618_v47 = vadd.f32 %v648_v32, %v1415_v4  ;;  %v1628_v52 = vadd.f32 %v646_v25, %v1428_v58  ;;  %v643_v4 = vmul.f32 %v627_v43, %v1379_v55 }
 0x584   :  { %v1644_v58 = vadd.f32 %v644_v6, %v1444_v9 }
 0x585   :  { %v1595_v45 = vadd.f32 %v653_v24, %v1395_v27  ;;  %v647_v27 = vmul.f32 %v631_v11, %v1379_v55  ;;  %v675_v51 = vpack.c.bf16 %v1614_v53, %v1618_v47  ;;  %v1653_v10 = vadd.f32 %v643_v4, %v1453_v13 }
 0x586   :  { %v673_v31 = vpack.c.bf16 %v1637_v48, %v1644_v58  ;;  %v1669_v13 = vadd.f32 %v641_v20, %v1469_v16  ;;  %v1684_v16 = vadd.f32 %v638_v46, %v1484_v19 }
 0x587   :  { %v677_v35 = vpack.c.bf16 %v1595_v45, %v1598_v50  ;;  %v1624_v18 = vadd.f32 %v647_v27, %v1421_v30  ;;  %v642_v30 = vmul.f32 %v626_v8, %v1379_v55  ;;  %v384_v21 = vpop.f32.mrf.mxu3 }
 0x588   :  { %v670_v28 = vpack.c.bf16 %v1681_v34, %v1684_v16 }
 0x589   :  { %678 = vmatpush.bf16.msrb.mxu3 %v677_v35  ;;  %718 = vmatpush.bf16.msra.mxu0 %v677_v35  ;;  %v674_v2 = vpack.c.bf16 %v1624_v18, %v1628_v52  ;;  %v1660_v9 = vadd.f32 %v642_v30, %v1460_v12  ;;  %v1676_v12 = vadd.f32 %v640_v5, %v1476_v15  ;;  %v1081_v15 = vld [vmem:[%s1863_s0 + $0x8] sm:$0xf] }
 0x58a   :  { %v759_v8 = vunpack.c.l.bf16 %v1081_v15 }
 0x58b   :  { %v672_v57 = vpack.c.bf16 %v1653_v10, %v1660_v9  ;;  %v671_v22 = vpack.c.bf16 %v1669_v13, %v1676_v12 }
 0x58d   :  { %679 = vmatpush.bf16.msrb.mxu3 %v676_v60  ;;  %719 = vmatpush.bf16.msra.mxu0 %v676_v60 }
 0x591   :  { %680 = vmatpush.bf16.msrb.mxu3 %v675_v51  ;;  %720 = vmatpush.bf16.msra.mxu0 %v675_v51 }
 0x595   :  { %681 = vmatpush.bf16.msrb.mxu3 %v674_v2  ;;  %721 = vmatpush.bf16.msra.mxu0 %v674_v2 }
 0x599   :  { %682 = vmatpush.bf16.msrb.mxu3 %v673_v31  ;;  %722 = vmatpush.bf16.msra.mxu0 %v673_v31 }
 0x59d   :  { %683 = vmatpush.bf16.msrb.mxu3 %v672_v57  ;;  %723 = vmatpush.bf16.msra.mxu0 %v672_v57 }
 0x5a1   :  { %684 = vmatpush.bf16.msrb.mxu3 %v671_v22  ;;  %724 = vmatpush.bf16.msra.mxu0 %v671_v22 }
 0x5a5   :  { %685 = vmatpush.bf16.msrb.mxu3 %v670_v28  ;;  %725 = vmatpush.bf16.msra.mxu0 %v670_v28 }
 0x5a8   :  { %726 = vmatmul.bf16.vlgmr.msra.gmra.mxu0 %v1081_v15  ;;  %686 = vmatmul.bf16.vlgmr.msrb.gmra.mxu3 %v1365_v63 }
 0x625   :  { %v727_v23 = vpop.f32.mrf.mxu0 }
 0x626   :  { %v728_v29 = vadd.f32 %v1275_v26, %v727_v23 }
 0x628   :  { %731 = vmax.xlane.f32.xlu0 %v728_v29 }
 0x62b   :  { %v687_v24 = vpop.f32.mrf.mxu3 }
 0x62c   :  { %v1708_v3 = vadd.f32 %v1275_v26, %v687_v24 }
 0x62d   :  { %v729_v41 = vpop.f32.mrf.mxu0 }
 0x62e   :  { %691 = vmax.xlane.f32.xlu1 %v1708_v3 }
 0x633   :  { %v689_v11 = vpop.f32.mrf.mxu3 }
 0x69b   :  { %v732_v49 = vpop.xlane.xlu0 %731 }
 0x69c   :  { %v1693_v19 = vsub.f32 %v728_v29, %v732_v49 }
 0x69e   :  { %v734_v62 = vmul.f32 1.442695, %v1693_v19 }
 0x6a0   :  { %1124 = vpow2.f32 %v734_v62 }
 0x6a6   :  { %v1125_v61 = vpop.eup %1124 }
 0x6a7   :  { %736 = vadd.xlane.f32.xlu0 %v1125_v61 }
 0x6d0   :  { %760 = vxpose.xlu0.b32.start.end [1/1] (short) %v759_v8, 128 }
 0x71a   :  { %v1696_v43 = vpop.xlane.xlu0 %736 }
 0x71b   :  { %1126 = vrcp.f32 %v1696_v43 }
 0x71c   :  { %1128 = vlog2.f32 %v1696_v43 }
 0x721   :  { %v1127_v17 = vpop.eup %1126 }
 0x722   :  { %v739_v54 = vmul.f32 %v1127_v17, %v1125_v61 }
 0x724   :  { %v758_v37 = vsub.f32 %v1702_v36, %v739_v54 }
 0x726   :  { %855 = vmatpush.msrb.mxu2 %v758_v37  ;;  %1100 = vmatpush.msra.mxu3 %v758_v37  ;;  %v921_v5 = vmul.f32 %v758_v37, %v758_v37 }
 0x728   :  { %v922_v57 = vrot.slane %v921_v5, 4 }
 0x72a   :  { %v923_v42 = vadd.f32 %v922_v57, %v921_v5 }
 0x72c   :  { %v924_v22 = vrot.slane %v923_v42, 2 }
 0x72e   :  { %v925_v28 = vadd.f32 %v924_v22, %v923_v42 }
 0x730   :  { %v926_v23 = vrot.slane %v925_v28, 1 }
 0x732   :  { %v927_v29 = vadd.f32 %v926_v23, %v925_v28 }
 0x734   :  { %v1738_v49 = vmul.f32 %v927_v29, %v1297_v14 }
 0x736   :  { %v933_v61 = vmul.f32 %v1738_v49, %v1660_v9  ;;  %v934_v37 = vmul.f32 %v1738_v49, %v1653_v10  ;;  %v935_v11 = vmul.f32 %v1738_v49, %v1644_v58  ;;  %v938_v42 = vmul.f32 %v1738_v49, %v1624_v18 }
 0x774   :  { %v776_v33 = vpop.trf.xlu0 }
 0x775   :  { %1083 = vmatmul.msk.f32.vlgmr.msrb.gmra.mxu2 %vm155_vm0, %v776_v33 }
 0x77c   :  { %v777_v40 = vpop.trf.xlu0 }
 0x77d   :  { %1084 = vmatmul.msk.f32.gmra.mxu2 %vm155_vm0, %v777_v40 }
 0x784   :  { %v778_v59 = vpop.trf.xlu0 }
 0x785   :  { %1085 = vmatmul.msk.f32.gmra.mxu2 %vm155_vm0, %v778_v59 }
 0x78c   :  { %v779_v44 = vpop.trf.xlu0 }
 0x78d   :  { %1086 = vmatmul.msk.f32.gmra.mxu2 %vm155_vm0, %v779_v44 }
 0x794   :  { %v780_v35 = vpop.trf.xlu0 }
 0x795   :  { %1087 = vmatmul.msk.f32.gmra.mxu2 %vm155_vm0, %v780_v35 }
 0x79c   :  { %v781_v32 = vpop.trf.xlu0 }
 0x79d   :  { %1088 = vmatmul.msk.f32.vlgmr.msra.gmra.mxu3 %vm155_vm0, %v781_v32 }
 0x7a4   :  { %v782_v27 = vpop.trf.xlu0 }
 0x7a5   :  { %1089 = vmatmul.msk.f32.gmra.mxu3 %vm155_vm0, %v782_v27 }
 0x7ac   :  { %v783_v60 = vpop.trf.xlu0 }
 0x7ad   :  { %1090 = vmatmul.msk.f32.gmra.mxu3 %vm155_vm0, %v783_v60  ;;  %v936_v60 = vmul.f32 %v1738_v49, %v1637_v48 }
 0x7b4   :  { %v784_v25 = vpop.trf.xlu0 }
 0x7b5   :  { %1091 = vmatmul.msk.f32.gmra.mxu3 %vm155_vm0, %v784_v25 }
 0x7b9   :  { %386 = vmax.xlane.f32.xlu0 %v1718_v7 }
 0x7bc   :  { %v785_v51 = vpop.trf.xlu0 }
 0x7bd   :  { %1092 = vmatmul.msk.f32.gmra.mxu3 %vm155_vm0, %v785_v51 }
 0x7c4   :  { %v786_v6 = vpop.trf.xlu0 }
 0x7c5   :  { %1093 = vmatmul.msk.f32.gmra.mxu3 %vm155_vm0, %v786_v6 }
 0x7cc   :  { %v787_v4 = vpop.trf.xlu0 }
 0x7cd   :  { %1094 = vmatmul.msk.f32.gmra.mxu3 %vm155_vm0, %v787_v4 }
 0x7d4   :  { %v788_v2 = vpop.trf.xlu0 }
 0x7d5   :  { %1095 = vmatmul.msk.f32.gmra.mxu3 %vm155_vm0, %v788_v2 }
 0x7dc   :  { %v789_v30 = vpop.trf.xlu0 }
 0x7dd   :  { %1096 = vmatmul.msk.f32.gmra.mxu3 %vm155_vm0, %v789_v30  ;;  %v937_v30 = vmul.f32 %v1738_v49, %v1628_v52 }
 0x7e4   :  { %v790_v26 = vpop.trf.xlu0 }
 0x7e5   :  { %1097 = vmatmul.msk.f32.gmra.mxu3 %vm155_vm0, %v790_v26 }
 0x7ec   :  { %v791_v20 = vpop.trf.xlu0 }
 0x7ed   :  { %1098 = vmatmul.msk.f32.gmra.mxu3 %vm155_vm0, %v791_v20 }
 0x7f8   :  { %v1729_v31 = vpop.f32.mrf.mxu2 }
 0x800   :  { %v1731_v56 = vpop.f32.mrf.mxu2 }
 0x808   :  { %v1733_v46 = vpop.f32.mrf.mxu2 }
 0x810   :  { %v1735_v15 = vpop.f32.mrf.mxu2 }
 0x818   :  { %v869_v41 = vpop.f32.mrf.mxu2 }
 0x819   :  { %v909_v62 = vmul.f32 0.125, %v869_v41 }
 0x81b   :  { %v949_v8 = vsub.f32 %v909_v62, %v933_v61 }
 0x81d   :  { %v965_v38 = vmul.f32 %v949_v8, %v1379_v55 }
 0x81f   :  { %v1747_v40 = vadd.f32 %v965_v38, %v1660_v9  ;;  %v943_v38 = vmul.f32 %v1738_v49, %v1598_v50 }
 0x820   :  { %v872_v17 = vpop.f32.mrf.mxu3 }
 0x821   :  { %v910_v54 = vmul.f32 0.125, %v872_v17 }
 0x823   :  { %v950_v33 = vsub.f32 %v910_v54, %v934_v37 }
 0x825   :  { %v966_v21 = vmul.f32 %v950_v33, %v1379_v55 }
 0x827   :  { %v1750_v14 = vadd.f32 %v966_v21, %v1653_v10  ;;  %v942_v21 = vmul.f32 %v1738_v49, %v1604_v39 }
 0x828   :  { %v875_v24 = vpop.f32.mrf.mxu3 }
 0x829   :  { %v911_v59 = vmul.f32 0.125, %v875_v24  ;;  %v995_v44 = vpack.c.bf16 %v1750_v14, %v1747_v40 }
 0x82b   :  { %v951_v35 = vsub.f32 %v911_v59, %v935_v11 }
 0x82d   :  { %v967_v9 = vmul.f32 %v951_v35, %v1379_v55 }
 0x82f   :  { %v1761_v51 = vadd.f32 %v967_v9, %v1644_v58 }
 0x830   :  { %v878_v32 = vpop.f32.mrf.mxu3 }
 0x831   :  { %v912_v27 = vmul.f32 0.125, %v878_v32  ;;  %v944_v32 = vmul.f32 %v1738_v49, %v1595_v45 }
 0x833   :  { %v952_v25 = vsub.f32 %v912_v27, %v936_v60  ;;  %v940_v27 = vmul.f32 %v1738_v49, %v1614_v53 }
 0x835   :  { %v968_v10 = vmul.f32 %v952_v25, %v1379_v55 }
 0x837   :  { %v1764_v6 = vadd.f32 %v968_v10, %v1637_v48 }
 0x838   :  { %v881_v4 = vpop.f32.mrf.mxu3 }
 0x839   :  { %v913_v2 = vmul.f32 0.125, %v881_v4  ;;  %v996_v26 = vpack.c.bf16 %v1764_v6, %v1761_v51  ;;  %v939_v4 = vmul.f32 %v1738_v49, %v1618_v47  ;;  %v31_v6 = vlaneseq }
 0x83b   :  { %v953_v20 = vsub.f32 %v913_v2, %v937_v30  ;;  %v1830_v14 = vand.u32 127, %v31_v6 }
 0x83d   :  { %v969_v58 = vmul.f32 %v953_v20, %v1379_v55  ;;  %vm50_vm11 = vcmp.eq.s32.totalorder %v1830_v14, 0  ;;  %vm405_vm12 = vcmp.eq.s32.totalorder %v1830_v14, 1  ;;  %vm710_vm13 = vcmp.eq.s32.totalorder %v1830_v14, 2 }
 0x83e   :  { %vm1033_vm14 = vcmp.eq.s32.totalorder %v1830_v14, 3 }
 0x83f   :  { %v985_v28 = vadd.f32 %v969_v58, %v1628_v52  ;;  %v941_v52 = vmul.f32 %v1738_v49, %v1608_v0 }
 0x840   :  { %v884_v5 = vpop.f32.mrf.mxu3 }
 0x841   :  { %v914_v57 = vmul.f32 0.125, %v884_v5 }
 0x843   :  { %v954_v22 = vsub.f32 %v914_v57, %v938_v42 }
 0x845   :  { %v970_v48 = vmul.f32 %v954_v22, %v1379_v55 }
 0x847   :  { %v986_v23 = vadd.f32 %v970_v48, %v1624_v18 }
 0x848   :  { %v887_v29 = vpop.f32.mrf.mxu3 }
 0x849   :  { %v997_v41 = vpack.c.bf16 %v986_v23, %v985_v28  ;;  %v915_v60 = vmul.f32 0.125, %v887_v29 }
 0x84b   :  { %v955_v5 = vsub.f32 %v915_v60, %v939_v4  ;;  %v30_v60 = vld [vmem:[%s1867_s3] sm:$0xff] }
 0x84d   :  { %v971_v23 = vmul.f32 %v955_v5, %v1379_v55 }
 0x850   :  { %v890_v62 = vpop.f32.mrf.mxu3 }
 0x851   :  { %v916_v59 = vmul.f32 0.125, %v890_v62 }
 0x853   :  { %v956_v2 = vsub.f32 %v916_v59, %v940_v27 }
 0x855   :  { %v972_v22 = vmul.f32 %v956_v2, %v1379_v55 }
 0x858   :  { %v893_v61 = vpop.f32.mrf.mxu3 }
 0x859   :  { %v917_v33 = vmul.f32 0.125, %v893_v61  ;;  %v988_v61 = vadd.f32 %v972_v22, %v1614_v53  ;;  %v905_v53 = vmul.f32 0.125, %v1729_v31 }
 0x85b   :  { %v957_v9 = vsub.f32 %v917_v33, %v941_v52 }
 0x85d   :  { %v973_v57 = vmul.f32 %v957_v9, %v1379_v55  ;;  %v1132_v9 = vmov 0.0  }
 0x85f   :  { %v989_v29 = vadd.f32 %v973_v57, %v1608_v0  ;;  %v931_v0 = vmul.f32 %v1738_v49, %v1676_v12 }
 0x860   :  { %v896_v8 = vpop.f32.mrf.mxu3 }
 0x861   :  { %v918_v37 = vmul.f32 0.125, %v896_v8  ;;  %v987_v8 = vadd.f32 %v971_v23, %v1618_v47  ;;  %v930_v47 = vmul.f32 %v1738_v49, %v1681_v34 }
 0x863   :  { %v958_v11 = vsub.f32 %v918_v37, %v942_v21 }
 0x865   :  { %v974_v30 = vmul.f32 %v958_v11, %v1379_v55  ;;  %v692_v11 = vpop.xlane.xlu1 %691 }
 0x866   :  { %vm693_vm4 = vcmp.eq.f32.partialorder %v1708_v3, %v692_v11 }
 0x867   :  { %v990_v28 = vadd.f32 %v974_v30, %v1604_v39  ;;  %v906_v39 = vmul.f32 0.125, %v1731_v56 }
 0x868   :  { %v899_v17 = vpop.f32.mrf.mxu3 }
 0x869   :  { %v919_v54 = vmul.f32 0.125, %v899_v17  ;;  %v999_v62 = vpack.c.bf16 %v990_v28, %v989_v29  ;;  %v998_v17 = vpack.c.bf16 %v988_v61, %v987_v8 }
 0x86b   :  { %v959_v24 = vsub.f32 %v919_v54, %v943_v38  ;;  %v932_v54 = vmul.f32 %v1738_v49, %v1669_v13 }
 0x86d   :  { %v975_v25 = vmul.f32 %v959_v24, %v1379_v55 }
 0x86f   :  { %v991_v42 = vadd.f32 %v975_v25, %v1598_v50  ;;  %v908_v50 = vmul.f32 0.125, %v1735_v15  ;;  %v946_v15 = vsub.f32 %v906_v39, %v930_v47 }
 0x870   :  { %v902_v18 = vpop.f32.mrf.mxu3 }
 0x871   :  { %v920_v35 = vmul.f32 0.125, %v902_v18  ;;  %v948_v37 = vsub.f32 %v908_v50, %v932_v54  ;;  %v962_v31 = vmul.f32 %v946_v15, %v1379_v55 }
 0x873   :  { %v960_v10 = vsub.f32 %v920_v35, %v944_v32  ;;  %v964_v33 = vmul.f32 %v948_v37, %v1379_v55  ;;  %v978_v18 = vadd.f32 %v962_v31, %v1681_v34  ;;  %v33_v34 = vcvt.s32.f32 %v1830_v14 }
 0x874   :  { %v740_v32 = vmul.f32 %v1702_v36, %v1693_v19 }
 0x875   :  { %v976_v20 = vmul.f32 %v960_v10, %v1379_v55  ;;  %v980_v24 = vadd.f32 %v964_v33, %v1669_v13  ;;  %v694_v35 = vsel %vm693_vm4, %v33_v34, 128.0 }
 0x877   :  { %v992_v58 = vadd.f32 %v976_v20, %v1595_v45  ;;  %v907_v45 = vmul.f32 0.125, %v1733_v46  ;;  %v929_v46 = vmul.f32 %v1738_v49, %v1684_v16  ;;  %v1129_v20 = vpop.eup %1128 }
 0x878   :  { %v744_v5 = vmul.f32 0.6931472, %v1129_v20 }
 0x879   :  { %v1000_v48 = vpack.c.bf16 %v992_v58, %v991_v42  ;;  %v947_v38 = vsub.f32 %v907_v45, %v931_v0  ;;  %v945_v21 = vsub.f32 %v905_v53, %v929_v46 }
 0x87b   :  { %1001 = vmatpush.bf16.msrb.mxu0 %v1000_v48  ;;  %v963_v56 = vmul.f32 %v947_v38, %v1379_v55  ;;  %v961_v52 = vmul.f32 %v945_v21, %v1379_v55  ;;  %v1130_v55 = vld [vmem:[%s1862_s5] ss:$0 sm:$0xff] }
 0x87d   :  { %v979_v49 = vadd.f32 %v963_v56, %v1676_v12  ;;  %v977_v59 = vadd.f32 %v961_v52, %v1684_v16  ;;  %v76_v12 = vpop.xlane.xlu2 %75 }
 0x87e   :  { %vm77_vm2 = vcmp.eq.f32.partialorder %v1507_v1, %v76_v12 }
 0x87f   :  { %1002 = vmatpush.bf16.msrb.mxu0 %v999_v62  ;;  %v993_v51 = vpack.c.bf16 %v978_v18, %v977_v59 }
 0x883   :  { %1003 = vmatpush.bf16.msrb.mxu0 %v998_v17 }
 0x887   :  { %1004 = vmatpush.bf16.msrb.mxu0 %v997_v41  ;;  %v994_v41 = vpack.c.bf16 %v980_v24, %v979_v49 }
 0x88b   :  { %1005 = vmatpush.bf16.msrb.mxu0 %v996_v26  ;;  %v387_v26 = vpop.xlane.xlu0 %386 }
 0x88c   :  { %vm388_vm3 = vcmp.eq.f32.partialorder %v1718_v7, %v387_v26 }
 0x88f   :  { %1006 = vmatpush.bf16.msrb.mxu0 %v995_v44  ;;  %v78_v44 = vsel %vm77_vm2, %v33_v34, 128.0 }
 0x893   :  { %1007 = vmatpush.bf16.msrb.mxu0 %v994_v41 }
 0x897   :  { %1008 = vmatpush.bf16.msrb.mxu0 %v993_v51 }
 0x89a   :  { %1009 = vmatmul.bf16.vlgmr.msrb.gmra.mxu0 %v1365_v63  ;;  %v389_v63 = vsel %vm388_vm3, %v33_v34, 128.0 }
 0x917   :  { %v1010_v13 = vpop.f32.mrf.mxu0 }
 0x918   :  { %v1011_v40 = vadd.f32 %v1130_v55, %v1010_v13 }
 0x91a   :  { %1014 = vmax.xlane.f32.xlu1 %v1011_v40 }
 0x91f   :  { %v1012_v16 = vpop.f32.mrf.mxu0 }
 0x922   :  { %79 = vmin.xlane.f32.xlu1 %v78_v44 }
 0x92a   :  { %390 = vmin.xlane.f32.xlu1 %v389_v63 }
 0x932   :  { %695 = vmin.xlane.f32.xlu1 %v694_v35 }
 0x93a   :  { %741 = vadd.xlane.f32.xlu1 %v740_v32 }
 0x98d   :  { %v1015_v27 = vpop.xlane.xlu1 %1014 }
 0x98e   :  { %vm1016_vm5 = vcmp.eq.f32.partialorder %v1011_v40, %v1015_v27 }
 0x98f   :  { %v1017_v1 = vsel %vm1016_vm5, %v33_v34, 128.0 }
 0x990   :  { %1018 = vmin.xlane.f32.xlu1 %v1017_v1 }
 0x995   :  { %v80_v7 = vpop.xlane.xlu1 %79 }
 0x996   :  { %vm81_vm7 = vcmp.eq.f32.partialorder %v80_v7, %v30_v60 }
 0x997   :  { %v1044_v25 = vsel %vm81_vm7, 1.0, %v1132_v9 }
 0x998   :  { %v85_v3 = vsel %vm84_vm6, %v1044_v25, 0.0 }
 0x999   :  { %86 = vadd.xlane.f32.xlu1 %v85_v3 }
 0x99d   :  { %v391_v10 = vpop.xlane.xlu1 %390 }
 0x99e   :  { %vm392_vm8 = vcmp.eq.f32.partialorder %v391_v10, %v30_v60 }
 0x99f   :  { %v1061_v19 = vsel %vm392_vm8, 1.0, %v1132_v9 }
 0x9a0   :  { %v395_v36 = vsel %vm84_vm6, %v1061_v19, 0.0 }
 0x9a1   :  { %396 = vadd.xlane.f32.xlu2 %v395_v36 }
 0x9a5   :  { %v696_v4 = vpop.xlane.xlu1 %695 }
 0x9a6   :  { %vm697_vm9 = vcmp.eq.f32.partialorder %v696_v4, %v30_v60 }
 0x9a7   :  { %v1080_v2 = vsel %vm697_vm9, 1.0, %v1132_v9 }
 0x9a8   :  { %v700_v30 = vsel %vm84_vm6, %v1080_v2, 0.0 }
 0x9a9   :  { %701 = vadd.xlane.f32.xlu1 %v700_v30 }
 0x9ad   :  { %v742_v57 = vpop.xlane.xlu1 %741 }
 0x9ae   :  { %v745_v42 = vsub.f32 %v744_v5, %v742_v57 }
 0x9b0   :  { %v746_v58 = vsel %vm84_vm6, %v745_v42, 0.0 }
 0x9b1   :  { %747 = vadd.xlane.f32.xlu2 %v746_v58 }
 0xa03   :  { %v1019_v22 = vpop.xlane.xlu1 %1018 }
 0xa04   :  { %vm1020_vm10 = vcmp.eq.f32.partialorder %v1019_v22, %v30_v60 }
 0xa05   :  { %v1099_v48 = vsel %vm1020_vm10, 1.0, %v1132_v9 }
 0xa06   :  { %v1023_v28 = vsel %vm84_vm6, %v1099_v48, 0.0 }
 0xa07   :  { %1024 = vadd.xlane.f32.xlu1 %v1023_v28 }
 0xa0c   :  { %v87_v43 = vpop.xlane.xlu1 %86 }
 0xa0d   :  { %v88_v23 = vrot.slane %v87_v43, 4 }
 0xa0f   :  { %v89_v29 = vadd.f32 %v88_v23, %v87_v43 }
 0xa11   :  { %v90_v62 = vrot.slane %v89_v29, 2 }
 0xa13   :  { %v91_v61 = vadd.f32 %v90_v62, %v89_v29 }
 0xa14   :  { %v397_v8 = vpop.xlane.xlu2 %396 }
 0xa15   :  { %v398_v50 = vrot.slane %v397_v8, 4  ;;  %v92_v17 = vrot.slane %v91_v61, 1 }
 0xa17   :  { %v399_v45 = vadd.f32 %v398_v50, %v397_v8  ;;  %v93_v54 = vadd.f32 %v92_v17, %v91_v61 }
 0xa19   :  { %v400_v39 = vrot.slane %v399_v45, 2  ;;  %1101 = vpush %v93_v54 }
 0xa1b   :  { %v401_v0 = vadd.f32 %v400_v39, %v399_v45 }
 0xa1c   :  { %v702_v37 = vpop.xlane.xlu1 %701 }
 0xa1d   :  { %v703_v53 = vrot.slane %v702_v37, 4  ;;  %v402_v47 = vrot.slane %v401_v0, 1 }
 0xa1f   :  { %v704_v38 = vadd.f32 %v703_v53, %v702_v37  ;;  %v403_v46 = vadd.f32 %v402_v47, %v401_v0 }
 0xa21   :  { %v705_v15 = vrot.slane %v704_v38, 2  ;;  %1103 = vpush %v403_v46 }
 0xa23   :  { %v706_v33 = vadd.f32 %v705_v15, %v704_v38 }
 0xa24   :  { %v748_v21 = vpop.xlane.xlu2 %747 }
 0xa25   :  { %v749_v56 = vrot.slane %v748_v21, 4  ;;  %v707_v31 = vrot.slane %v706_v33, 1 }
 0xa27   :  { %v750_v24 = vadd.f32 %v749_v56, %v748_v21  ;;  %v708_v52 = vadd.f32 %v707_v31, %v706_v33 }
 0xa29   :  { %v751_v49 = vrot.slane %v750_v24, 2  ;;  %1105 = vpush %v708_v52 }
 0xa2b   :  { %v752_v41 = vadd.f32 %v751_v49, %v750_v24 }
 0xa2d   :  { %v753_v18 = vrot.slane %v752_v41, 1 }
 0xa2f   :  { %v754_v59 = vadd.f32 %v753_v18, %v752_v41 }
 0xa31   :  { %1107 = vpush %v754_v59 }
 0xa4a   :  { %s1102_s3 = spop %1101 }
 0xa4b   :  { %v95_v51 = vstv %s1102_s3 }
 0xa4c   :  { %v96_v6 = vsel %vm50_vm11, %v95_v51, 0.0 }
 0xa52   :  { %s1104_s26 = spop %1103 }
 0xa53   :  { %v406_v13 = vstv %s1104_s26 }
 0xa54   :  { %v407_v55 = vsel %vm405_vm12, %v406_v13, 0.0 }
 0xa55   :  { %v408_v40 = vadd.f32 %v407_v55, %v96_v6 }
 0xa5a   :  { %s1106_s27 = spop %1105 }
 0xa5b   :  { %v711_v12 = vstv %s1106_s27 }
 0xa5c   :  { %v712_v34 = vsel %vm710_vm13, %v711_v12, 0.0 }
 0xa5d   :  { %v713_v16 = vadd.f32 %v712_v34, %v408_v40 }
 0xa62   :  { %s1108_s28 = spop %1107 }
 0xa63   :  { %v756_v44 = vstv %s1108_s28 }
 0xa64   :  { %v757_v26 = vmul.f32 0.125, %v756_v44 }
 0xa66   :  { %v1038_v63 = vsel %vm50_vm11, %v757_v26, 0.0 }
 0xa67   :  { %1039 = vst [vmem:[%s1868_s7 + $0x1] sm:$0x1] %v1038_v63 }
 0xa7a   :  { %v1025_v11 = vpop.xlane.xlu1 %1024 }
 0xa7b   :  { %v1026_v35 = vrot.slane %v1025_v11, 4 }
 0xa7d   :  { %v1027_v32 = vadd.f32 %v1026_v35, %v1025_v11 }
 0xa7f   :  { %v1028_v27 = vrot.slane %v1027_v32, 2 }
 0xa81   :  { %v1029_v1 = vadd.f32 %v1028_v27, %v1027_v32 }
 0xa83   :  { %v1030_v60 = vrot.slane %v1029_v1, 1 }
 0xa85   :  { %v1031_v7 = vadd.f32 %v1030_v60, %v1029_v1 }
 0xa87   :  { %1109 = vpush %v1031_v7 }
 0xab8   :  { %s1110_s8 = spop %1109 }
 0xab9   :  { %v1034_v9 = vstv %s1110_s8 }
 0xaba   :  { %v1035_v25 = vsel %vm1033_vm14, %v1034_v9, 0.0 }
 0xabb   :  { %v1036_v3 = vadd.f32 %v1035_v25, %v713_v16 }
 0xabd   :  { %1037 = vst [vmem:[%s1868_s7] sm:$0x1] %v1036_v3 }

</bundles_post_ra>
